<compile_context>
chip_gen: v5e
topology: v5e:2x2
jax: 0.10.0
libtpu: 0.0.40
codegen_flags: <defaults>
</compile_context>

<pallas_src>
import numpy as np
import jax
import jax.numpy as jnp
from jax.experimental import pallas as pl
from jax.experimental.pallas import tpu as pltpu

# ----------------------------- tiny T5 config -------------------------------
VOCAB = 128
D_MODEL = 32
N_HEADS = 4
D_HEAD = 8
INNER = N_HEADS * D_HEAD
D_FF = 64
NUM_BUCKETS = 32
MAX_DISTANCE = 128
LN_EPS = 1e-6
NEG_INF = -1e9


# ------------------------------ small helpers -------------------------------
def _full_spec(shape):
    """BlockSpec covering the whole array (grid=(1,))."""
    zeros = (0,) * len(shape)
    return pl.BlockSpec(shape, lambda i: zeros)


def _bf(x):
    """Cast to bf16 only at matmul boundaries (VPU math stays f32)."""
    return x.astype(jnp.bfloat16)


def _rms(x, w):
    """T5 LayerNorm: no mean subtraction, elementwise weight w of shape (1, D)."""
    var = jnp.mean(x * x, axis=-1, keepdims=True)
    return x * jax.lax.rsqrt(var + LN_EPS) * w


def _softmax_last(s):
    m = jnp.max(s, axis=-1, keepdims=True)
    e = jnp.exp(s - m)
    return e * pl.reciprocal(jnp.sum(e, axis=-1, keepdims=True), approx=True)


def _heads_project(xb, w_hd):
    """Head-batched projection. xb: (H, N, D) bf16, w_hd: (H, D, Dh) bf16 -> (H, N, Dh) f32."""
    return jax.lax.dot_general(xb, w_hd, (((2,), (1,)), ((0,), (0,))),
                               preferred_element_type=jnp.float32)


def _attn_heads(q, k, v, bias):
    """All-heads attention for one batch element as two batched contractions.

    q: (H, Sq, Dh), k/v: (H, Sk, Dh), bias: (H, Sq, Sk).  T5: NO 1/sqrt(d) scaling.
    """
    s = jax.lax.dot_general(_bf(q), _bf(k), (((2,), (2,)), ((0,), (0,))),
                            preferred_element_type=jnp.float32)       # (H, Sq, Sk)
    p = _softmax_last(s + bias)
    return jax.lax.dot_general(_bf(p), _bf(v), (((2,), (1,)), ((0,), (0,))),
                               preferred_element_type=jnp.float32)    # (H, Sq, Dh)


def _merge_heads_project(ctx, wo_hd):
    """Head merge + output projection as one batched matmul + head-axis reduce.

    ctx: (H, S, Dh) f32, wo_hd: (H, Dh, D) bf16 -> (S, D) f32
    (equivalent to concat_h(ctx_h) @ Wo, no lane shuffles, no scratch stores).
    """
    per_head = jax.lax.dot_general(_bf(ctx), wo_hd, (((2,), (1,)), ((0,), (0,))),
                                   preferred_element_type=jnp.float32)   # (H, S, D)
    return jnp.sum(per_head, axis=0)


def _self_attention(h, ln_w, qkv_w, wo_hd, bias, B, S, per_batch_bias):
    """Pre-norm self-attention block over all batch elements (context is a pure value)."""
    x = _bf(_rms(h, ln_w))
    xb = jnp.broadcast_to(x[None], (N_HEADS, B * S, D_MODEL))   # hoisted, reused for Q/K/V
    q = _heads_project(xb, qkv_w[0])
    k = _heads_project(xb, qkv_w[1])
    v = _heads_project(xb, qkv_w[2])
    outs = []
    for b in range(B):                                           # small static unroll (B=2)
        rows = slice(b * S, (b + 1) * S)
        bias_b = bias[b] if per_batch_bias else bias
        ctx = _attn_heads(q[:, rows, :], k[:, rows, :], v[:, rows, :], bias_b)
        outs.append(_merge_heads_project(ctx, wo_hd))
    return jnp.concatenate(outs, axis=0)                         # (B*S, D)


def _cross_attention(h_dec, h_enc, ln_w, qkv_w, wo_hd, bias, B, Sq, Sk):
    """Pre-norm cross-attention: Q from normed decoder stream, K/V from raw encoder output."""
    x = _bf(_rms(h_dec, ln_w))
    xq = jnp.broadcast_to(x[None], (N_HEADS, B * Sq, D_MODEL))
    xe = jnp.broadcast_to(_bf(h_enc)[None], (N_HEADS, B * Sk, D_MODEL))
    q = _heads_project(xq, qkv_w[0])
    k = _heads_project(xe, qkv_w[1])
    v = _heads_project(xe, qkv_w[2])
    outs = []
    for b in range(B):
        qr = slice(b * Sq, (b + 1) * Sq)
        kr = slice(b * Sk, (b + 1) * Sk)
        ctx = _attn_heads(q[:, qr, :], k[:, kr, :], v[:, kr, :], bias[b])
        outs.append(_merge_heads_project(ctx, wo_hd))
    return jnp.concatenate(outs, axis=0)                         # (B*Sq, D)


def _ffn(h, ln_w, wi, wo_ff):
    """Pre-norm ReLU FFN block."""
    x = _bf(_rms(h, ln_w))
    ff = jnp.maximum(jnp.dot(x, wi, preferred_element_type=jnp.float32), 0.0)
    return jnp.dot(_bf(ff), wo_ff, preferred_element_type=jnp.float32)


# ------------------------------ fused kernel --------------------------------
def _t5_fused_kernel(henc_ref, hdec_ref, e_lns_ref, d_lns_ref,
                     e_qkv_ref, e_wo_ref, e_wi_ref, e_wof_ref,
                     d_qkv_ref, d_wo_ref, c_qkv_ref, c_wo_ref,
                     d_wi_ref, d_wof_ref,
                     enc_bias_ref, dec_bias_ref, cross_bias_ref,
                     emb_ref, labels_ref,
                     logits_ref, loss_ref):
    B, _, Se, _ = enc_bias_ref.shape
    Sd = dec_bias_ref.shape[1]

    # ------------------------ encoder layer (stays in VMEM) ------------------------
    e_lns = e_lns_ref[...]
    h = henc_ref[...]                                            # (B*Se, D) f32
    h = h + _self_attention(h, e_lns[0], e_qkv_ref[...], e_wo_ref[...],
                            enc_bias_ref[...], B, Se, per_batch_bias=True)
    h = h + _ffn(h, e_lns[1], e_wi_ref[...], e_wof_ref[...])
    h_enc = _rms(h, e_lns[2])                                    # encoder last_hidden_state

    # ------------------------------- decoder layer --------------------------------
    d_lns = d_lns_ref[...]
    hd = hdec_ref[...]                                           # (B*Sd, D) f32
    hd = hd + _self_attention(hd, d_lns[0], d_qkv_ref[...], d_wo_ref[...],
                              dec_bias_ref[...], B, Sd, per_batch_bias=False)
    hd = hd + _cross_attention(hd, h_enc, d_lns[1], c_qkv_ref[...], c_wo_ref[...],
                               cross_bias_ref[...], B, Sd, Se)
    hd = hd + _ffn(hd, d_lns[2], d_wi_ref[...], d_wof_ref[...])
    seq = _rms(hd, d_lns[3]) * (D_MODEL ** -0.5)                 # tied-embedding scaling

    # ----------------------- tied LM head (lane-dense 128 wide) --------------------
    logits = jax.lax.dot_general(_bf(seq), emb_ref[...], (((1,), (1,)), ((), ())),
                                 preferred_element_type=jnp.float32)   # (B*Sd, V)
    logits_ref[...] = logits

    # ------------------ CrossEntropy(ignore_index=-100), masked mean ---------------
    labels = labels_ref[...]                                     # (B*Sd, 1) int32
    iota = jax.lax.broadcasted_iota(jnp.int32, logits.shape, 1)
    picked = jnp.sum(jnp.where(iota == labels, logits, 0.0), axis=-1, keepdims=True)
    m = jnp.max(logits, axis=-1, keepdims=True)
    lse = m + jnp.log(jnp.sum(jnp.exp(logits - m), axis=-1, keepdims=True))
    nll = lse - picked                                           # (B*Sd, 1)
    valid = (labels != -100).astype(jnp.float32)
    loss_sum = jnp.sum(nll * valid, axis=0, keepdims=True)       # (1, 1)
    count = jnp.sum(valid, axis=0, keepdims=True)
    # NOTE: an all-ignored batch yields 0 here (PyTorch returns NaN for the empty mean).
    loss_ref[...] = loss_sum * pl.reciprocal(jnp.maximum(count, 1.0), approx=True)


# ------------------------- T5 relative position bias -------------------------
def _relative_position_bucket(relative_position, bidirectional,
                              num_buckets=NUM_BUCKETS, max_distance=MAX_DISTANCE):
    relative_buckets = jnp.zeros_like(relative_position)
    if bidirectional:
        num_buckets //= 2
        relative_buckets = relative_buckets + (relative_position > 0).astype(jnp.int32) * num_buckets
        relative_position = jnp.abs(relative_position)
    else:
        relative_position = -jnp.minimum(relative_position, 0)
    max_exact = num_buckets // 2
    is_small = relative_position < max_exact
    rel_f = jnp.maximum(relative_position, 1).astype(jnp.float32)
    val_if_large = max_exact + (
        jnp.log(rel_f / max_exact) / np.log(max_distance / max_exact)
        * (num_buckets - max_exact)
    ).astype(jnp.int32)
    val_if_large = jnp.minimum(val_if_large, num_buckets - 1)
    relative_buckets = relative_buckets + jnp.where(is_small, relative_position, val_if_large)
    return relative_buckets


def compute_position_bias(rel_emb, q_len, k_len, bidirectional):
    """Batch-independent relative position bias, shape (H, q_len, k_len)."""
    ctx = jnp.arange(q_len, dtype=jnp.int32)[:, None]
    mem = jnp.arange(k_len, dtype=jnp.int32)[None, :]
    buckets = _relative_position_bucket(mem - ctx, bidirectional)     # (q, k)
    bias = jnp.take(rel_emb, buckets, axis=0)                         # (q, k, H)
    return jnp.transpose(bias, (2, 0, 1))                             # (H, q, k)


# ------------------------ weight layout preparation --------------------------
def _head_major_qkv(wq, wk, wv):
    """(D, INNER) x3 -> stacked head-major (3, H, D, Dh) bf16."""
    def hm(w):
        return jnp.transpose(w.reshape(D_MODEL, N_HEADS, D_HEAD), (1, 0, 2))
    return jnp.stack([hm(wq), hm(wk), hm(wv)]).astype(jnp.bfloat16)


def _head_major_out(wo):
    """(INNER, D) -> head-major (H, Dh, D) bf16."""
    return wo.reshape(N_HEADS, D_HEAD, D_MODEL).astype(jnp.bfloat16)


# ------------------------------ model forward --------------------------------
def t5_mtl_forward(params, input_ids, attention_mask, decoder_input_ids=None, labels=None):
    if decoder_input_ids is None:
        # TODO(synk): decoder.generate() autoregressive greedy loop is not implemented;
        # only the teacher-forced (decoder_input_ids/labels) path is exercised.
        raise NotImplementedError("generate() path not implemented")

    enc, dec = params['enc'], params['dec']
    B, Se = input_ids.shape
    Sd = decoder_input_ids.shape[1]

    # --- embeddings (shared, tied) ---
    emb = params['shared_emb']
    h_enc = jnp.take(emb, input_ids, axis=0).astype(jnp.float32).reshape(B * Se, D_MODEL)
    h_dec = jnp.take(emb, decoder_input_ids, axis=0).astype(jnp.float32).reshape(B * Sd, D_MODEL)

    # --- attention biases combined on the host (tiny tensors, ~2 KiB each) ---
    add_mask = (1.0 - attention_mask.astype(jnp.float32)) * NEG_INF                 # (B, Se)
    enc_pos = compute_position_bias(enc['rel_emb'], Se, Se, bidirectional=True)     # (H, Se, Se)
    enc_bias = enc_pos[None] + add_mask[:, None, None, :]                           # (B, H, Se, Se)

    dec_pos = compute_position_bias(dec['rel_emb'], Sd, Sd, bidirectional=False)
    causal = (1.0 - jnp.tril(jnp.ones((Sd, Sd), jnp.float32))) * NEG_INF
    dec_bias = dec_pos + causal[None]                                               # (H, Sd, Sd)

    cross_bias = jnp.broadcast_to(add_mask[:, None, None, :], (B, N_HEADS, Sd, Se)) # (B, H, Sd, Se)

    # --- weights in head-major bf16 layout (host-side layout plumbing only) ---
    e_lns = jnp.stack([enc['ln1'], enc['ln2'], enc['ln_final']])                    # (3, 1, D)
    d_lns = jnp.stack([dec['ln1'], dec['ln2'], dec['ln3'], dec['ln_final']])        # (4, 1, D)
    e_qkv = _head_major_qkv(enc['wq'], enc['wk'], enc['wv'])
    e_wo = _head_major_out(enc['wo'])
    d_qkv = _head_major_qkv(dec['wq'], dec['wk'], dec['wv'])
    d_wo = _head_major_out(dec['wo'])
    c_qkv = _head_major_qkv(dec['cwq'], dec['cwk'], dec['cwv'])
    c_wo = _head_major_out(dec['cwo'])
    e_wi, e_wof = _bf(enc['wi']), _bf(enc['wo_ff'])
    d_wi, d_wof = _bf(dec['wi']), _bf(dec['wo_ff'])
    emb_bf = _bf(emb)

    if labels is None:
        labels_flat = jnp.full((B * Sd, 1), -100, jnp.int32)
    else:
        labels_flat = labels.reshape(B * Sd, 1).astype(jnp.int32)

    operands = (h_enc, h_dec, e_lns, d_lns,
                e_qkv, e_wo, e_wi, e_wof,
                d_qkv, d_wo, c_qkv, c_wo, d_wi, d_wof,
                enc_bias, dec_bias, cross_bias, emb_bf, labels_flat)

    logits2d, loss11 = pl.pallas_call(
        _t5_fused_kernel,
        out_shape=(jax.ShapeDtypeStruct((B * Sd, VOCAB), jnp.float32),
                   jax.ShapeDtypeStruct((1, 1), jnp.float32)),
        grid=(1,),
        in_specs=[_full_spec(x.shape) for x in operands],
        out_specs=(_full_spec((B * Sd, VOCAB)), _full_spec((1, 1))),
        compiler_params=pltpu.CompilerParams(dimension_semantics=("arbitrary",)),
    )(*operands)

    logits = logits2d.reshape(B, Sd, VOCAB)
    loss = None if labels is None else loss11[0, 0]
    return loss, logits


# --------------------------- deterministic params ----------------------------
def init_params(key):
    keys = iter(jax.random.split(key, 32))

    def nrm(shape, scale=0.05):
        return jax.random.normal(next(keys), shape, jnp.float32) * scale

    ln = lambda: jnp.ones((1, D_MODEL), jnp.float32)
    return {
        'shared_emb': nrm((VOCAB, D_MODEL), 1.0),
        'enc': {
            'wq': nrm((D_MODEL, INNER)), 'wk': nrm((D_MODEL, INNER)),
            'wv': nrm((D_MODEL, INNER)), 'wo': nrm((INNER, D_MODEL)),
            'rel_emb': nrm((NUM_BUCKETS, N_HEADS)),
            'wi': nrm((D_MODEL, D_FF)), 'wo_ff': nrm((D_FF, D_MODEL)),
            'ln1': ln(), 'ln2': ln(), 'ln_final': ln(),
        },
        'dec': {
            'wq': nrm((D_MODEL, INNER)), 'wk': nrm((D_MODEL, INNER)),
            'wv': nrm((D_MODEL, INNER)), 'wo': nrm((INNER, D_MODEL)),
            'cwq': nrm((D_MODEL, INNER)), 'cwk': nrm((D_MODEL, INNER)),
            'cwv': nrm((D_MODEL, INNER)), 'cwo': nrm((INNER, D_MODEL)),
            'rel_emb': nrm((NUM_BUCKETS, N_HEADS)),
            'wi': nrm((D_MODEL, D_FF)), 'wo_ff': nrm((D_FF, D_MODEL)),
            'ln1': ln(), 'ln2': ln(), 'ln3': ln(), 'ln_final': ln(),
        },
    }


# ----------------------------------- main ------------------------------------
if __name__ == "__main__":
    key = jax.random.PRNGKey(0)
    pk, k1, k2, k3 = jax.random.split(key, 4)
    params = init_params(pk)

    B, S_ENC, S_DEC = 2, 8, 8
    input_ids = jax.random.randint(k1, (B, S_ENC), 0, VOCAB, dtype=jnp.int32)
    lengths = jnp.array([S_ENC, S_ENC - 3], jnp.int32)
    attention_mask = (jnp.arange(S_ENC)[None, :] < lengths[:, None]).astype(jnp.float32)
    decoder_input_ids = jax.random.randint(k2, (B, S_DEC), 0, VOCAB, dtype=jnp.int32)
    labels = jax.random.randint(k3, (B, S_DEC), 0, VOCAB, dtype=jnp.int32)
    labels = labels.at[1, -2:].set(-100)  # exercise ignore_index=-100

    fwd = jax.jit(t5_mtl_forward)
    loss, logits = fwd(params, input_ids, attention_mask,
                       decoder_input_ids=decoder_input_ids, labels=labels)
    jax.block_until_ready((loss, logits))

    assert logits.shape == (B, S_DEC, VOCAB)
    assert bool(jnp.isfinite(loss))
    print("KERNEL_OK")
</pallas_src>

<mosaic_0001>
module attributes {stable_mosaic.version = 11 : i64} {
  func.func @_t5_fused_kernel(%arg0: i32, %arg1: memref<16x32xf32, #tpu.memory_space<vmem>>, %arg2: memref<16x32xf32, #tpu.memory_space<vmem>>, %arg3: memref<3x1x32xf32, #tpu.memory_space<vmem>>, %arg4: memref<4x1x32xf32, #tpu.memory_space<vmem>>, %arg5: memref<3x4x32x8xbf16, #tpu.memory_space<vmem>>, %arg6: memref<4x8x32xbf16, #tpu.memory_space<vmem>>, %arg7: memref<32x64xbf16, #tpu.memory_space<vmem>>, %arg8: memref<64x32xbf16, #tpu.memory_space<vmem>>, %arg9: memref<3x4x32x8xbf16, #tpu.memory_space<vmem>>, %arg10: memref<4x8x32xbf16, #tpu.memory_space<vmem>>, %arg11: memref<3x4x32x8xbf16, #tpu.memory_space<vmem>>, %arg12: memref<4x8x32xbf16, #tpu.memory_space<vmem>>, %arg13: memref<32x64xbf16, #tpu.memory_space<vmem>>, %arg14: memref<64x32xbf16, #tpu.memory_space<vmem>>, %arg15: memref<2x4x8x8xf32, #tpu.memory_space<vmem>>, %arg16: memref<4x8x8xf32, #tpu.memory_space<vmem>>, %arg17: memref<2x4x8x8xf32, #tpu.memory_space<vmem>>, %arg18: memref<128x32xbf16, #tpu.memory_space<vmem>>, %arg19: memref<16x1xi32, #tpu.memory_space<vmem>>, %arg20: memref<16x128xf32, #tpu.memory_space<vmem>>, %arg21: memref<1x1xf32, #tpu.memory_space<vmem>>) attributes {dimension_semantics = [#tpu.dimension_semantics<arbitrary>], iteration_bounds = array<i64: 1>, scalar_prefetch = 0 : i64, scratch_operands = 0 : i64, tpu.core_type = #tpu.core_type<tc>, window_params = [{pipeline_mode = #tpu.pipeline_mode<synchronous>, transform_indices = @transform_0, window_bounds = array<i64: 16, 32>}, {pipeline_mode = #tpu.pipeline_mode<synchronous>, transform_indices = @transform_1, window_bounds = array<i64: 16, 32>}, {pipeline_mode = #tpu.pipeline_mode<synchronous>, transform_indices = @transform_2, window_bounds = array<i64: 3, 1, 32>}, {pipeline_mode = #tpu.pipeline_mode<synchronous>, transform_indices = @transform_3, window_bounds = array<i64: 4, 1, 32>}, {pipeline_mode = #tpu.pipeline_mode<synchronous>, transform_indices = @transform_4, window_bounds = array<i64: 3, 4, 32, 8>}, {pipeline_mode = #tpu.pipeline_mode<synchronous>, transform_indices = @transform_5, window_bounds = array<i64: 4, 8, 32>}, {pipeline_mode = #tpu.pipeline_mode<synchronous>, transform_indices = @transform_6, window_bounds = array<i64: 32, 64>}, {pipeline_mode = #tpu.pipeline_mode<synchronous>, transform_indices = @transform_7, window_bounds = array<i64: 64, 32>}, {pipeline_mode = #tpu.pipeline_mode<synchronous>, transform_indices = @transform_8, window_bounds = array<i64: 3, 4, 32, 8>}, {pipeline_mode = #tpu.pipeline_mode<synchronous>, transform_indices = @transform_9, window_bounds = array<i64: 4, 8, 32>}, {pipeline_mode = #tpu.pipeline_mode<synchronous>, transform_indices = @transform_10, window_bounds = array<i64: 3, 4, 32, 8>}, {pipeline_mode = #tpu.pipeline_mode<synchronous>, transform_indices = @transform_11, window_bounds = array<i64: 4, 8, 32>}, {pipeline_mode = #tpu.pipeline_mode<synchronous>, transform_indices = @transform_12, window_bounds = array<i64: 32, 64>}, {pipeline_mode = #tpu.pipeline_mode<synchronous>, transform_indices = @transform_13, window_bounds = array<i64: 64, 32>}, {pipeline_mode = #tpu.pipeline_mode<synchronous>, transform_indices = @transform_14, window_bounds = array<i64: 2, 4, 8, 8>}, {pipeline_mode = #tpu.pipeline_mode<synchronous>, transform_indices = @transform_15, window_bounds = array<i64: 4, 8, 8>}, {pipeline_mode = #tpu.pipeline_mode<synchronous>, transform_indices = @transform_16, window_bounds = array<i64: 2, 4, 8, 8>}, {pipeline_mode = #tpu.pipeline_mode<synchronous>, transform_indices = @transform_17, window_bounds = array<i64: 128, 32>}, {pipeline_mode = #tpu.pipeline_mode<synchronous>, transform_indices = @transform_18, window_bounds = array<i64: 16, 1>}, {pipeline_mode = #tpu.pipeline_mode<synchronous>, transform_indices = @transform_19, window_bounds = array<i64: 16, 128>}, {pipeline_mode = #tpu.pipeline_mode<synchronous>, transform_indices = @transform_20, window_bounds = array<i64: 1, 1>}]} {
    %c0 = arith.constant 0 : index
    %c0_0 = arith.constant 0 : index
    %c0_1 = arith.constant 0 : index
    %0 = vector.load %arg3[%c0, %c0_0, %c0_1] : memref<3x1x32xf32, #tpu.memory_space<vmem>>, vector<3x1x32xf32>
    %c0_2 = arith.constant 0 : index
    %c0_3 = arith.constant 0 : index
    %1 = vector.load %arg1[%c0_2, %c0_3] : memref<16x32xf32, #tpu.memory_space<vmem>>, vector<16x32xf32>
    %2 = vector.extract_strided_slice %0 {offsets = [0, 0, 0], sizes = [1, 1, 32], strides = [1, 1, 1]} : vector<3x1x32xf32> to vector<1x1x32xf32>
    %3 = vector.shape_cast %2 : vector<1x1x32xf32> to vector<1x32xf32>
    %c0_4 = arith.constant 0 : index
    %c0_5 = arith.constant 0 : index
    %c0_6 = arith.constant 0 : index
    %c0_7 = arith.constant 0 : index
    %4 = vector.load %arg5[%c0_4, %c0_5, %c0_6, %c0_7] : memref<3x4x32x8xbf16, #tpu.memory_space<vmem>>, vector<3x4x32x8xbf16>
    %c0_8 = arith.constant 0 : index
    %c0_9 = arith.constant 0 : index
    %c0_10 = arith.constant 0 : index
    %5 = vector.load %arg6[%c0_8, %c0_9, %c0_10] : memref<4x8x32xbf16, #tpu.memory_space<vmem>>, vector<4x8x32xbf16>
    %c0_11 = arith.constant 0 : index
    %c0_12 = arith.constant 0 : index
    %c0_13 = arith.constant 0 : index
    %c0_14 = arith.constant 0 : index
    %6 = vector.load %arg15[%c0_11, %c0_12, %c0_13, %c0_14] : memref<2x4x8x8xf32, #tpu.memory_space<vmem>>, vector<2x4x8x8xf32>
    %7 = arith.mulf %1, %1 : vector<16x32xf32>
    %cst = arith.constant dense<0.000000e+00> : vector<16xf32>
    %8 = vector.multi_reduction <add>, %7, %cst [1] : vector<16x32xf32> to vector<16xf32>
    %9 = vector.shape_cast %8 : vector<16xf32> to vector<16x1xf32>
    %cst_15 = arith.constant 3.200000e+01 : f32
    %10 = vector.broadcast %cst_15 : f32 to vector<16x1xf32>
    %11 = arith.divf %9, %10 : vector<16x1xf32>
    %cst_16 = arith.constant 9.99999997E-7 : f32
    %12 = vector.broadcast %cst_16 : f32 to vector<16x1xf32>
    %13 = arith.addf %11, %12 : vector<16x1xf32>
    %14 = math.rsqrt %13 : vector<16x1xf32>
    %15 = vector.broadcast %14 : vector<16x1xf32> to vector<16x32xf32>
    %16 = arith.mulf %1, %15 : vector<16x32xf32>
    %17 = vector.broadcast %3 : vector<1x32xf32> to vector<16x32xf32>
    %18 = arith.mulf %16, %17 : vector<16x32xf32>
    %19 = arith.truncf %18 : vector<16x32xf32> to vector<16x32xbf16>
    %20 = vector.shape_cast %19 : vector<16x32xbf16> to vector<1x16x32xbf16>
    %21 = vector.shape_cast %20 : vector<1x16x32xbf16> to vector<1x16x32xbf16>
    %22 = vector.broadcast %21 : vector<1x16x32xbf16> to vector<4x16x32xbf16>
    %23 = vector.extract_strided_slice %4 {offsets = [0, 0, 0, 0], sizes = [1, 4, 32, 8], strides = [1, 1, 1, 1]} : vector<3x4x32x8xbf16> to vector<1x4x32x8xbf16>
    %24 = vector.shape_cast %23 : vector<1x4x32x8xbf16> to vector<4x32x8xbf16>
    %cst_17 = arith.constant dense<0.000000e+00> : vector<4x16x8xf32>
    %25 = tpu.matmul %22, %24, %cst_17 {dimension_numbers = #tpu.dot_dimension_numbers<[2], [1], [1], [2], [0, 0, 0, 1, 1, 2], [0], [0]>} : vector<4x16x32xbf16>, vector<4x32x8xbf16>, vector<4x16x8xf32> -> vector<4x16x8xf32>
    %26 = vector.extract_strided_slice %4 {offsets = [1, 0, 0, 0], sizes = [1, 4, 32, 8], strides = [1, 1, 1, 1]} : vector<3x4x32x8xbf16> to vector<1x4x32x8xbf16>
    %27 = vector.shape_cast %26 : vector<1x4x32x8xbf16> to vector<4x32x8xbf16>
    %cst_18 = arith.constant dense<0.000000e+00> : vector<4x16x8xf32>
    %28 = tpu.matmul %22, %27, %cst_18 {dimension_numbers = #tpu.dot_dimension_numbers<[2], [1], [1], [2], [0, 0, 0, 1, 1, 2], [0], [0]>} : vector<4x16x32xbf16>, vector<4x32x8xbf16>, vector<4x16x8xf32> -> vector<4x16x8xf32>
    %29 = vector.extract_strided_slice %4 {offsets = [2, 0, 0, 0], sizes = [1, 4, 32, 8], strides = [1, 1, 1, 1]} : vector<3x4x32x8xbf16> to vector<1x4x32x8xbf16>
    %30 = vector.shape_cast %29 : vector<1x4x32x8xbf16> to vector<4x32x8xbf16>
    %cst_19 = arith.constant dense<0.000000e+00> : vector<4x16x8xf32>
    %31 = tpu.matmul %22, %30, %cst_19 {dimension_numbers = #tpu.dot_dimension_numbers<[2], [1], [1], [2], [0, 0, 0, 1, 1, 2], [0], [0]>} : vector<4x16x32xbf16>, vector<4x32x8xbf16>, vector<4x16x8xf32> -> vector<4x16x8xf32>
    %32 = vector.extract_strided_slice %6 {offsets = [0, 0, 0, 0], sizes = [1, 4, 8, 8], strides = [1, 1, 1, 1]} : vector<2x4x8x8xf32> to vector<1x4x8x8xf32>
    %33 = vector.shape_cast %32 : vector<1x4x8x8xf32> to vector<4x8x8xf32>
    %34 = vector.extract_strided_slice %25 {offsets = [0, 0, 0], sizes = [4, 8, 8], strides = [1, 1, 1]} : vector<4x16x8xf32> to vector<4x8x8xf32>
    %35 = vector.extract_strided_slice %28 {offsets = [0, 0, 0], sizes = [4, 8, 8], strides = [1, 1, 1]} : vector<4x16x8xf32> to vector<4x8x8xf32>
    %36 = vector.extract_strided_slice %31 {offsets = [0, 0, 0], sizes = [4, 8, 8], strides = [1, 1, 1]} : vector<4x16x8xf32> to vector<4x8x8xf32>
    %37 = arith.truncf %34 : vector<4x8x8xf32> to vector<4x8x8xbf16>
    %38 = arith.truncf %35 : vector<4x8x8xf32> to vector<4x8x8xbf16>
    %cst_20 = arith.constant dense<0.000000e+00> : vector<4x8x8xf32>
    %39 = tpu.matmul %37, %38, %cst_20 {dimension_numbers = #tpu.dot_dimension_numbers<[2], [2], [1], [1], [0, 0, 0, 1, 1, 1], [0], [0]>} : vector<4x8x8xbf16>, vector<4x8x8xbf16>, vector<4x8x8xf32> -> vector<4x8x8xf32>
    %40 = arith.addf %39, %33 : vector<4x8x8xf32>
    %cst_21 = arith.constant dense<0xFF800000> : vector<4x8xf32>
    %41 = vector.multi_reduction <maximumf>, %40, %cst_21 [2] : vector<4x8x8xf32> to vector<4x8xf32>
    %42 = vector.shape_cast %41 : vector<4x8xf32> to vector<4x8x1xf32>
    %43 = vector.broadcast %42 : vector<4x8x1xf32> to vector<4x8x8xf32>
    %44 = arith.subf %40, %43 : vector<4x8x8xf32>
    %45 = math.exp %44 : vector<4x8x8xf32>
    %cst_22 = arith.constant dense<0.000000e+00> : vector<4x8xf32>
    %46 = vector.multi_reduction <add>, %45, %cst_22 [2] : vector<4x8x8xf32> to vector<4x8xf32>
    %47 = vector.shape_cast %46 : vector<4x8xf32> to vector<4x8x1xf32>
    %48 = tpu.reciprocal %47 {approx = true} : vector<4x8x1xf32> -> vector<4x8x1xf32>
    %49 = vector.broadcast %48 : vector<4x8x1xf32> to vector<4x8x8xf32>
    %50 = arith.mulf %45, %49 : vector<4x8x8xf32>
    %51 = arith.truncf %50 : vector<4x8x8xf32> to vector<4x8x8xbf16>
    %52 = arith.truncf %36 : vector<4x8x8xf32> to vector<4x8x8xbf16>
    %cst_23 = arith.constant dense<0.000000e+00> : vector<4x8x8xf32>
    %53 = tpu.matmul %51, %52, %cst_23 {dimension_numbers = #tpu.dot_dimension_numbers<[2], [1], [1], [2], [0, 0, 0, 1, 1, 2], [0], [0]>} : vector<4x8x8xbf16>, vector<4x8x8xbf16>, vector<4x8x8xf32> -> vector<4x8x8xf32>
    %54 = arith.truncf %53 : vector<4x8x8xf32> to vector<4x8x8xbf16>
    %cst_24 = arith.constant dense<0.000000e+00> : vector<4x8x32xf32>
    %55 = tpu.matmul %54, %5, %cst_24 {dimension_numbers = #tpu.dot_dimension_numbers<[2], [1], [1], [2], [0, 0, 0, 1, 1, 2], [0], [0]>} : vector<4x8x8xbf16>, vector<4x8x32xbf16>, vector<4x8x32xf32> -> vector<4x8x32xf32>
    %cst_25 = arith.constant dense<0.000000e+00> : vector<8x32xf32>
    %56 = vector.multi_reduction <add>, %55, %cst_25 [0] : vector<4x8x32xf32> to vector<8x32xf32>
    %57 = vector.extract_strided_slice %6 {offsets = [1, 0, 0, 0], sizes = [1, 4, 8, 8], strides = [1, 1, 1, 1]} : vector<2x4x8x8xf32> to vector<1x4x8x8xf32>
    %58 = vector.shape_cast %57 : vector<1x4x8x8xf32> to vector<4x8x8xf32>
    %59 = vector.extract_strided_slice %25 {offsets = [0, 8, 0], sizes = [4, 8, 8], strides = [1, 1, 1]} : vector<4x16x8xf32> to vector<4x8x8xf32>
    %60 = vector.extract_strided_slice %28 {offsets = [0, 8, 0], sizes = [4, 8, 8], strides = [1, 1, 1]} : vector<4x16x8xf32> to vector<4x8x8xf32>
    %61 = vector.extract_strided_slice %31 {offsets = [0, 8, 0], sizes = [4, 8, 8], strides = [1, 1, 1]} : vector<4x16x8xf32> to vector<4x8x8xf32>
    %62 = arith.truncf %59 : vector<4x8x8xf32> to vector<4x8x8xbf16>
    %63 = arith.truncf %60 : vector<4x8x8xf32> to vector<4x8x8xbf16>
    %cst_26 = arith.constant dense<0.000000e+00> : vector<4x8x8xf32>
    %64 = tpu.matmul %62, %63, %cst_26 {dimension_numbers = #tpu.dot_dimension_numbers<[2], [2], [1], [1], [0, 0, 0, 1, 1, 1], [0], [0]>} : vector<4x8x8xbf16>, vector<4x8x8xbf16>, vector<4x8x8xf32> -> vector<4x8x8xf32>
    %65 = arith.addf %64, %58 : vector<4x8x8xf32>
    %cst_27 = arith.constant dense<0xFF800000> : vector<4x8xf32>
    %66 = vector.multi_reduction <maximumf>, %65, %cst_27 [2] : vector<4x8x8xf32> to vector<4x8xf32>
    %67 = vector.shape_cast %66 : vector<4x8xf32> to vector<4x8x1xf32>
    %68 = vector.broadcast %67 : vector<4x8x1xf32> to vector<4x8x8xf32>
    %69 = arith.subf %65, %68 : vector<4x8x8xf32>
    %70 = math.exp %69 : vector<4x8x8xf32>
    %cst_28 = arith.constant dense<0.000000e+00> : vector<4x8xf32>
    %71 = vector.multi_reduction <add>, %70, %cst_28 [2] : vector<4x8x8xf32> to vector<4x8xf32>
    %72 = vector.shape_cast %71 : vector<4x8xf32> to vector<4x8x1xf32>
    %73 = tpu.reciprocal %72 {approx = true} : vector<4x8x1xf32> -> vector<4x8x1xf32>
    %74 = vector.broadcast %73 : vector<4x8x1xf32> to vector<4x8x8xf32>
    %75 = arith.mulf %70, %74 : vector<4x8x8xf32>
    %76 = arith.truncf %75 : vector<4x8x8xf32> to vector<4x8x8xbf16>
    %77 = arith.truncf %61 : vector<4x8x8xf32> to vector<4x8x8xbf16>
    %cst_29 = arith.constant dense<0.000000e+00> : vector<4x8x8xf32>
    %78 = tpu.matmul %76, %77, %cst_29 {dimension_numbers = #tpu.dot_dimension_numbers<[2], [1], [1], [2], [0, 0, 0, 1, 1, 2], [0], [0]>} : vector<4x8x8xbf16>, vector<4x8x8xbf16>, vector<4x8x8xf32> -> vector<4x8x8xf32>
    %79 = arith.truncf %78 : vector<4x8x8xf32> to vector<4x8x8xbf16>
    %cst_30 = arith.constant dense<0.000000e+00> : vector<4x8x32xf32>
    %80 = tpu.matmul %79, %5, %cst_30 {dimension_numbers = #tpu.dot_dimension_numbers<[2], [1], [1], [2], [0, 0, 0, 1, 1, 2], [0], [0]>} : vector<4x8x8xbf16>, vector<4x8x32xbf16>, vector<4x8x32xf32> -> vector<4x8x32xf32>
    %cst_31 = arith.constant dense<0.000000e+00> : vector<8x32xf32>
    %81 = vector.multi_reduction <add>, %80, %cst_31 [0] : vector<4x8x32xf32> to vector<8x32xf32>
    %82 = tpu.concatenate %56, %81 in 0 : vector<8x32xf32>, vector<8x32xf32> -> vector<16x32xf32>
    %83 = arith.addf %1, %82 : vector<16x32xf32>
    %84 = vector.extract_strided_slice %0 {offsets = [1, 0, 0], sizes = [1, 1, 32], strides = [1, 1, 1]} : vector<3x1x32xf32> to vector<1x1x32xf32>
    %85 = vector.shape_cast %84 : vector<1x1x32xf32> to vector<1x32xf32>
    %c0_32 = arith.constant 0 : index
    %c0_33 = arith.constant 0 : index
    %86 = vector.load %arg7[%c0_32, %c0_33] : memref<32x64xbf16, #tpu.memory_space<vmem>>, vector<32x64xbf16>
    %c0_34 = arith.constant 0 : index
    %c0_35 = arith.constant 0 : index
    %87 = vector.load %arg8[%c0_34, %c0_35] : memref<64x32xbf16, #tpu.memory_space<vmem>>, vector<64x32xbf16>
    %88 = arith.mulf %83, %83 : vector<16x32xf32>
    %cst_36 = arith.constant dense<0.000000e+00> : vector<16xf32>
    %89 = vector.multi_reduction <add>, %88, %cst_36 [1] : vector<16x32xf32> to vector<16xf32>
    %90 = vector.shape_cast %89 : vector<16xf32> to vector<16x1xf32>
    %cst_37 = arith.constant 3.200000e+01 : f32
    %91 = vector.broadcast %cst_37 : f32 to vector<16x1xf32>
    %92 = arith.divf %90, %91 : vector<16x1xf32>
    %cst_38 = arith.constant 9.99999997E-7 : f32
    %93 = vector.broadcast %cst_38 : f32 to vector<16x1xf32>
    %94 = arith.addf %92, %93 : vector<16x1xf32>
    %95 = math.rsqrt %94 : vector<16x1xf32>
    %96 = vector.broadcast %95 : vector<16x1xf32> to vector<16x32xf32>
    %97 = arith.mulf %83, %96 : vector<16x32xf32>
    %98 = vector.broadcast %85 : vector<1x32xf32> to vector<16x32xf32>
    %99 = arith.mulf %97, %98 : vector<16x32xf32>
    %100 = arith.truncf %99 : vector<16x32xf32> to vector<16x32xbf16>
    %cst_39 = arith.constant dense<0.000000e+00> : vector<16x64xf32>
    %101 = tpu.matmul %100, %86, %cst_39 {dimension_numbers = #tpu.dot_dimension_numbers<[1], [0], [0], [1], [0, 0, 1, 1], [], []>} : vector<16x32xbf16>, vector<32x64xbf16>, vector<16x64xf32> -> vector<16x64xf32>
    %cst_40 = arith.constant 0.000000e+00 : f32
    %102 = vector.broadcast %cst_40 : f32 to vector<16x64xf32>
    %103 = arith.maximumf %101, %102 : vector<16x64xf32>
    %104 = arith.truncf %103 : vector<16x64xf32> to vector<16x64xbf16>
    %cst_41 = arith.constant dense<0.000000e+00> : vector<16x32xf32>
    %105 = tpu.matmul %104, %87, %cst_41 {dimension_numbers = #tpu.dot_dimension_numbers<[1], [0], [0], [1], [0, 0, 1, 1], [], []>} : vector<16x64xbf16>, vector<64x32xbf16>, vector<16x32xf32> -> vector<16x32xf32>
    %106 = arith.addf %83, %105 : vector<16x32xf32>
    %107 = vector.extract_strided_slice %0 {offsets = [2, 0, 0], sizes = [1, 1, 32], strides = [1, 1, 1]} : vector<3x1x32xf32> to vector<1x1x32xf32>
    %108 = vector.shape_cast %107 : vector<1x1x32xf32> to vector<1x32xf32>
    %109 = arith.mulf %106, %106 : vector<16x32xf32>
    %cst_42 = arith.constant dense<0.000000e+00> : vector<16xf32>
    %110 = vector.multi_reduction <add>, %109, %cst_42 [1] : vector<16x32xf32> to vector<16xf32>
    %111 = vector.shape_cast %110 : vector<16xf32> to vector<16x1xf32>
    %cst_43 = arith.constant 3.200000e+01 : f32
    %112 = vector.broadcast %cst_43 : f32 to vector<16x1xf32>
    %113 = arith.divf %111, %112 : vector<16x1xf32>
    %cst_44 = arith.constant 9.99999997E-7 : f32
    %114 = vector.broadcast %cst_44 : f32 to vector<16x1xf32>
    %115 = arith.addf %113, %114 : vector<16x1xf32>
    %116 = math.rsqrt %115 : vector<16x1xf32>
    %117 = vector.broadcast %116 : vector<16x1xf32> to vector<16x32xf32>
    %118 = arith.mulf %106, %117 : vector<16x32xf32>
    %119 = vector.broadcast %108 : vector<1x32xf32> to vector<16x32xf32>
    %120 = arith.mulf %118, %119 : vector<16x32xf32>
    %c0_45 = arith.constant 0 : index
    %c0_46 = arith.constant 0 : index
    %c0_47 = arith.constant 0 : index
    %121 = vector.load %arg4[%c0_45, %c0_46, %c0_47] : memref<4x1x32xf32, #tpu.memory_space<vmem>>, vector<4x1x32xf32>
    %c0_48 = arith.constant 0 : index
    %c0_49 = arith.constant 0 : index
    %122 = vector.load %arg2[%c0_48, %c0_49] : memref<16x32xf32, #tpu.memory_space<vmem>>, vector<16x32xf32>
    %123 = vector.extract_strided_slice %121 {offsets = [0, 0, 0], sizes = [1, 1, 32], strides = [1, 1, 1]} : vector<4x1x32xf32> to vector<1x1x32xf32>
    %124 = vector.shape_cast %123 : vector<1x1x32xf32> to vector<1x32xf32>
    %c0_50 = arith.constant 0 : index
    %c0_51 = arith.constant 0 : index
    %c0_52 = arith.constant 0 : index
    %c0_53 = arith.constant 0 : index
    %125 = vector.load %arg9[%c0_50, %c0_51, %c0_52, %c0_53] : memref<3x4x32x8xbf16, #tpu.memory_space<vmem>>, vector<3x4x32x8xbf16>
    %c0_54 = arith.constant 0 : index
    %c0_55 = arith.constant 0 : index
    %c0_56 = arith.constant 0 : index
    %126 = vector.load %arg10[%c0_54, %c0_55, %c0_56] : memref<4x8x32xbf16, #tpu.memory_space<vmem>>, vector<4x8x32xbf16>
    %c0_57 = arith.constant 0 : index
    %c0_58 = arith.constant 0 : index
    %c0_59 = arith.constant 0 : index
    %127 = vector.load %arg16[%c0_57, %c0_58, %c0_59] : memref<4x8x8xf32, #tpu.memory_space<vmem>>, vector<4x8x8xf32>
    %128 = arith.mulf %122, %122 : vector<16x32xf32>
    %cst_60 = arith.constant dense<0.000000e+00> : vector<16xf32>
    %129 = vector.multi_reduction <add>, %128, %cst_60 [1] : vector<16x32xf32> to vector<16xf32>
    %130 = vector.shape_cast %129 : vector<16xf32> to vector<16x1xf32>
    %cst_61 = arith.constant 3.200000e+01 : f32
    %131 = vector.broadcast %cst_61 : f32 to vector<16x1xf32>
    %132 = arith.divf %130, %131 : vector<16x1xf32>
    %cst_62 = arith.constant 9.99999997E-7 : f32
    %133 = vector.broadcast %cst_62 : f32 to vector<16x1xf32>
    %134 = arith.addf %132, %133 : vector<16x1xf32>
    %135 = math.rsqrt %134 : vector<16x1xf32>
    %136 = vector.broadcast %135 : vector<16x1xf32> to vector<16x32xf32>
    %137 = arith.mulf %122, %136 : vector<16x32xf32>
    %138 = vector.broadcast %124 : vector<1x32xf32> to vector<16x32xf32>
    %139 = arith.mulf %137, %138 : vector<16x32xf32>
    %140 = arith.truncf %139 : vector<16x32xf32> to vector<16x32xbf16>
    %141 = vector.shape_cast %140 : vector<16x32xbf16> to vector<1x16x32xbf16>
    %142 = vector.shape_cast %141 : vector<1x16x32xbf16> to vector<1x16x32xbf16>
    %143 = vector.broadcast %142 : vector<1x16x32xbf16> to vector<4x16x32xbf16>
    %144 = vector.extract_strided_slice %125 {offsets = [0, 0, 0, 0], sizes = [1, 4, 32, 8], strides = [1, 1, 1, 1]} : vector<3x4x32x8xbf16> to vector<1x4x32x8xbf16>
    %145 = vector.shape_cast %144 : vector<1x4x32x8xbf16> to vector<4x32x8xbf16>
    %cst_63 = arith.constant dense<0.000000e+00> : vector<4x16x8xf32>
    %146 = tpu.matmul %143, %145, %cst_63 {dimension_numbers = #tpu.dot_dimension_numbers<[2], [1], [1], [2], [0, 0, 0, 1, 1, 2], [0], [0]>} : vector<4x16x32xbf16>, vector<4x32x8xbf16>, vector<4x16x8xf32> -> vector<4x16x8xf32>
    %147 = vector.extract_strided_slice %125 {offsets = [1, 0, 0, 0], sizes = [1, 4, 32, 8], strides = [1, 1, 1, 1]} : vector<3x4x32x8xbf16> to vector<1x4x32x8xbf16>
    %148 = vector.shape_cast %147 : vector<1x4x32x8xbf16> to vector<4x32x8xbf16>
    %cst_64 = arith.constant dense<0.000000e+00> : vector<4x16x8xf32>
    %149 = tpu.matmul %143, %148, %cst_64 {dimension_numbers = #tpu.dot_dimension_numbers<[2], [1], [1], [2], [0, 0, 0, 1, 1, 2], [0], [0]>} : vector<4x16x32xbf16>, vector<4x32x8xbf16>, vector<4x16x8xf32> -> vector<4x16x8xf32>
    %150 = vector.extract_strided_slice %125 {offsets = [2, 0, 0, 0], sizes = [1, 4, 32, 8], strides = [1, 1, 1, 1]} : vector<3x4x32x8xbf16> to vector<1x4x32x8xbf16>
    %151 = vector.shape_cast %150 : vector<1x4x32x8xbf16> to vector<4x32x8xbf16>
    %cst_65 = arith.constant dense<0.000000e+00> : vector<4x16x8xf32>
    %152 = tpu.matmul %143, %151, %cst_65 {dimension_numbers = #tpu.dot_dimension_numbers<[2], [1], [1], [2], [0, 0, 0, 1, 1, 2], [0], [0]>} : vector<4x16x32xbf16>, vector<4x32x8xbf16>, vector<4x16x8xf32> -> vector<4x16x8xf32>
    %153 = vector.extract_strided_slice %146 {offsets = [0, 0, 0], sizes = [4, 8, 8], strides = [1, 1, 1]} : vector<4x16x8xf32> to vector<4x8x8xf32>
    %154 = vector.extract_strided_slice %149 {offsets = [0, 0, 0], sizes = [4, 8, 8], strides = [1, 1, 1]} : vector<4x16x8xf32> to vector<4x8x8xf32>
    %155 = vector.extract_strided_slice %152 {offsets = [0, 0, 0], sizes = [4, 8, 8], strides = [1, 1, 1]} : vector<4x16x8xf32> to vector<4x8x8xf32>
    %156 = arith.truncf %153 : vector<4x8x8xf32> to vector<4x8x8xbf16>
    %157 = arith.truncf %154 : vector<4x8x8xf32> to vector<4x8x8xbf16>
    %cst_66 = arith.constant dense<0.000000e+00> : vector<4x8x8xf32>
    %158 = tpu.matmul %156, %157, %cst_66 {dimension_numbers = #tpu.dot_dimension_numbers<[2], [2], [1], [1], [0, 0, 0, 1, 1, 1], [0], [0]>} : vector<4x8x8xbf16>, vector<4x8x8xbf16>, vector<4x8x8xf32> -> vector<4x8x8xf32>
    %159 = arith.addf %158, %127 : vector<4x8x8xf32>
    %cst_67 = arith.constant dense<0xFF800000> : vector<4x8xf32>
    %160 = vector.multi_reduction <maximumf>, %159, %cst_67 [2] : vector<4x8x8xf32> to vector<4x8xf32>
    %161 = vector.shape_cast %160 : vector<4x8xf32> to vector<4x8x1xf32>
    %162 = vector.broadcast %161 : vector<4x8x1xf32> to vector<4x8x8xf32>
    %163 = arith.subf %159, %162 : vector<4x8x8xf32>
    %164 = math.exp %163 : vector<4x8x8xf32>
    %cst_68 = arith.constant dense<0.000000e+00> : vector<4x8xf32>
    %165 = vector.multi_reduction <add>, %164, %cst_68 [2] : vector<4x8x8xf32> to vector<4x8xf32>
    %166 = vector.shape_cast %165 : vector<4x8xf32> to vector<4x8x1xf32>
    %167 = tpu.reciprocal %166 {approx = true} : vector<4x8x1xf32> -> vector<4x8x1xf32>
    %168 = vector.broadcast %167 : vector<4x8x1xf32> to vector<4x8x8xf32>
    %169 = arith.mulf %164, %168 : vector<4x8x8xf32>
    %170 = arith.truncf %169 : vector<4x8x8xf32> to vector<4x8x8xbf16>
    %171 = arith.truncf %155 : vector<4x8x8xf32> to vector<4x8x8xbf16>
    %cst_69 = arith.constant dense<0.000000e+00> : vector<4x8x8xf32>
    %172 = tpu.matmul %170, %171, %cst_69 {dimension_numbers = #tpu.dot_dimension_numbers<[2], [1], [1], [2], [0, 0, 0, 1, 1, 2], [0], [0]>} : vector<4x8x8xbf16>, vector<4x8x8xbf16>, vector<4x8x8xf32> -> vector<4x8x8xf32>
    %173 = arith.truncf %172 : vector<4x8x8xf32> to vector<4x8x8xbf16>
    %cst_70 = arith.constant dense<0.000000e+00> : vector<4x8x32xf32>
    %174 = tpu.matmul %173, %126, %cst_70 {dimension_numbers = #tpu.dot_dimension_numbers<[2], [1], [1], [2], [0, 0, 0, 1, 1, 2], [0], [0]>} : vector<4x8x8xbf16>, vector<4x8x32xbf16>, vector<4x8x32xf32> -> vector<4x8x32xf32>
    %cst_71 = arith.constant dense<0.000000e+00> : vector<8x32xf32>
    %175 = vector.multi_reduction <add>, %174, %cst_71 [0] : vector<4x8x32xf32> to vector<8x32xf32>
    %176 = vector.extract_strided_slice %146 {offsets = [0, 8, 0], sizes = [4, 8, 8], strides = [1, 1, 1]} : vector<4x16x8xf32> to vector<4x8x8xf32>
    %177 = vector.extract_strided_slice %149 {offsets = [0, 8, 0], sizes = [4, 8, 8], strides = [1, 1, 1]} : vector<4x16x8xf32> to vector<4x8x8xf32>
    %178 = vector.extract_strided_slice %152 {offsets = [0, 8, 0], sizes = [4, 8, 8], strides = [1, 1, 1]} : vector<4x16x8xf32> to vector<4x8x8xf32>
    %179 = arith.truncf %176 : vector<4x8x8xf32> to vector<4x8x8xbf16>
    %180 = arith.truncf %177 : vector<4x8x8xf32> to vector<4x8x8xbf16>
    %cst_72 = arith.constant dense<0.000000e+00> : vector<4x8x8xf32>
    %181 = tpu.matmul %179, %180, %cst_72 {dimension_numbers = #tpu.dot_dimension_numbers<[2], [2], [1], [1], [0, 0, 0, 1, 1, 1], [0], [0]>} : vector<4x8x8xbf16>, vector<4x8x8xbf16>, vector<4x8x8xf32> -> vector<4x8x8xf32>
    %182 = arith.addf %181, %127 : vector<4x8x8xf32>
    %cst_73 = arith.constant dense<0xFF800000> : vector<4x8xf32>
    %183 = vector.multi_reduction <maximumf>, %182, %cst_73 [2] : vector<4x8x8xf32> to vector<4x8xf32>
    %184 = vector.shape_cast %183 : vector<4x8xf32> to vector<4x8x1xf32>
    %185 = vector.broadcast %184 : vector<4x8x1xf32> to vector<4x8x8xf32>
    %186 = arith.subf %182, %185 : vector<4x8x8xf32>
    %187 = math.exp %186 : vector<4x8x8xf32>
    %cst_74 = arith.constant dense<0.000000e+00> : vector<4x8xf32>
    %188 = vector.multi_reduction <add>, %187, %cst_74 [2] : vector<4x8x8xf32> to vector<4x8xf32>
    %189 = vector.shape_cast %188 : vector<4x8xf32> to vector<4x8x1xf32>
    %190 = tpu.reciprocal %189 {approx = true} : vector<4x8x1xf32> -> vector<4x8x1xf32>
    %191 = vector.broadcast %190 : vector<4x8x1xf32> to vector<4x8x8xf32>
    %192 = arith.mulf %187, %191 : vector<4x8x8xf32>
    %193 = arith.truncf %192 : vector<4x8x8xf32> to vector<4x8x8xbf16>
    %194 = arith.truncf %178 : vector<4x8x8xf32> to vector<4x8x8xbf16>
    %cst_75 = arith.constant dense<0.000000e+00> : vector<4x8x8xf32>
    %195 = tpu.matmul %193, %194, %cst_75 {dimension_numbers = #tpu.dot_dimension_numbers<[2], [1], [1], [2], [0, 0, 0, 1, 1, 2], [0], [0]>} : vector<4x8x8xbf16>, vector<4x8x8xbf16>, vector<4x8x8xf32> -> vector<4x8x8xf32>
    %196 = arith.truncf %195 : vector<4x8x8xf32> to vector<4x8x8xbf16>
    %cst_76 = arith.constant dense<0.000000e+00> : vector<4x8x32xf32>
    %197 = tpu.matmul %196, %126, %cst_76 {dimension_numbers = #tpu.dot_dimension_numbers<[2], [1], [1], [2], [0, 0, 0, 1, 1, 2], [0], [0]>} : vector<4x8x8xbf16>, vector<4x8x32xbf16>, vector<4x8x32xf32> -> vector<4x8x32xf32>
    %cst_77 = arith.constant dense<0.000000e+00> : vector<8x32xf32>
    %198 = vector.multi_reduction <add>, %197, %cst_77 [0] : vector<4x8x32xf32> to vector<8x32xf32>
    %199 = tpu.concatenate %175, %198 in 0 : vector<8x32xf32>, vector<8x32xf32> -> vector<16x32xf32>
    %200 = arith.addf %122, %199 : vector<16x32xf32>
    %201 = vector.extract_strided_slice %121 {offsets = [1, 0, 0], sizes = [1, 1, 32], strides = [1, 1, 1]} : vector<4x1x32xf32> to vector<1x1x32xf32>
    %202 = vector.shape_cast %201 : vector<1x1x32xf32> to vector<1x32xf32>
    %c0_78 = arith.constant 0 : index
    %c0_79 = arith.constant 0 : index
    %c0_80 = arith.constant 0 : index
    %c0_81 = arith.constant 0 : index
    %203 = vector.load %arg11[%c0_78, %c0_79, %c0_80, %c0_81] : memref<3x4x32x8xbf16, #tpu.memory_space<vmem>>, vector<3x4x32x8xbf16>
    %c0_82 = arith.constant 0 : index
    %c0_83 = arith.constant 0 : index
    %c0_84 = arith.constant 0 : index
    %204 = vector.load %arg12[%c0_82, %c0_83, %c0_84] : memref<4x8x32xbf16, #tpu.memory_space<vmem>>, vector<4x8x32xbf16>
    %c0_85 = arith.constant 0 : index
    %c0_86 = arith.constant 0 : index
    %c0_87 = arith.constant 0 : index
    %c0_88 = arith.constant 0 : index
    %205 = vector.load %arg17[%c0_85, %c0_86, %c0_87, %c0_88] : memref<2x4x8x8xf32, #tpu.memory_space<vmem>>, vector<2x4x8x8xf32>
    %206 = arith.mulf %200, %200 : vector<16x32xf32>
    %cst_89 = arith.constant dense<0.000000e+00> : vector<16xf32>
    %207 = vector.multi_reduction <add>, %206, %cst_89 [1] : vector<16x32xf32> to vector<16xf32>
    %208 = vector.shape_cast %207 : vector<16xf32> to vector<16x1xf32>
    %cst_90 = arith.constant 3.200000e+01 : f32
    %209 = vector.broadcast %cst_90 : f32 to vector<16x1xf32>
    %210 = arith.divf %208, %209 : vector<16x1xf32>
    %cst_91 = arith.constant 9.99999997E-7 : f32
    %211 = vector.broadcast %cst_91 : f32 to vector<16x1xf32>
    %212 = arith.addf %210, %211 : vector<16x1xf32>
    %213 = math.rsqrt %212 : vector<16x1xf32>
    %214 = vector.broadcast %213 : vector<16x1xf32> to vector<16x32xf32>
    %215 = arith.mulf %200, %214 : vector<16x32xf32>
    %216 = vector.broadcast %202 : vector<1x32xf32> to vector<16x32xf32>
    %217 = arith.mulf %215, %216 : vector<16x32xf32>
    %218 = arith.truncf %217 : vector<16x32xf32> to vector<16x32xbf16>
    %219 = vector.shape_cast %218 : vector<16x32xbf16> to vector<1x16x32xbf16>
    %220 = vector.shape_cast %219 : vector<1x16x32xbf16> to vector<1x16x32xbf16>
    %221 = vector.broadcast %220 : vector<1x16x32xbf16> to vector<4x16x32xbf16>
    %222 = arith.truncf %120 : vector<16x32xf32> to vector<16x32xbf16>
    %223 = vector.shape_cast %222 : vector<16x32xbf16> to vector<1x16x32xbf16>
    %224 = vector.shape_cast %223 : vector<1x16x32xbf16> to vector<1x16x32xbf16>
    %225 = vector.broadcast %224 : vector<1x16x32xbf16> to vector<4x16x32xbf16>
    %226 = vector.extract_strided_slice %203 {offsets = [0, 0, 0, 0], sizes = [1, 4, 32, 8], strides = [1, 1, 1, 1]} : vector<3x4x32x8xbf16> to vector<1x4x32x8xbf16>
    %227 = vector.shape_cast %226 : vector<1x4x32x8xbf16> to vector<4x32x8xbf16>
    %cst_92 = arith.constant dense<0.000000e+00> : vector<4x16x8xf32>
    %228 = tpu.matmul %221, %227, %cst_92 {dimension_numbers = #tpu.dot_dimension_numbers<[2], [1], [1], [2], [0, 0, 0, 1, 1, 2], [0], [0]>} : vector<4x16x32xbf16>, vector<4x32x8xbf16>, vector<4x16x8xf32> -> vector<4x16x8xf32>
    %229 = vector.extract_strided_slice %203 {offsets = [1, 0, 0, 0], sizes = [1, 4, 32, 8], strides = [1, 1, 1, 1]} : vector<3x4x32x8xbf16> to vector<1x4x32x8xbf16>
    %230 = vector.shape_cast %229 : vector<1x4x32x8xbf16> to vector<4x32x8xbf16>
    %cst_93 = arith.constant dense<0.000000e+00> : vector<4x16x8xf32>
    %231 = tpu.matmul %225, %230, %cst_93 {dimension_numbers = #tpu.dot_dimension_numbers<[2], [1], [1], [2], [0, 0, 0, 1, 1, 2], [0], [0]>} : vector<4x16x32xbf16>, vector<4x32x8xbf16>, vector<4x16x8xf32> -> vector<4x16x8xf32>
    %232 = vector.extract_strided_slice %203 {offsets = [2, 0, 0, 0], sizes = [1, 4, 32, 8], strides = [1, 1, 1, 1]} : vector<3x4x32x8xbf16> to vector<1x4x32x8xbf16>
    %233 = vector.shape_cast %232 : vector<1x4x32x8xbf16> to vector<4x32x8xbf16>
    %cst_94 = arith.constant dense<0.000000e+00> : vector<4x16x8xf32>
    %234 = tpu.matmul %225, %233, %cst_94 {dimension_numbers = #tpu.dot_dimension_numbers<[2], [1], [1], [2], [0, 0, 0, 1, 1, 2], [0], [0]>} : vector<4x16x32xbf16>, vector<4x32x8xbf16>, vector<4x16x8xf32> -> vector<4x16x8xf32>
    %235 = vector.extract_strided_slice %228 {offsets = [0, 0, 0], sizes = [4, 8, 8], strides = [1, 1, 1]} : vector<4x16x8xf32> to vector<4x8x8xf32>
    %236 = vector.extract_strided_slice %231 {offsets = [0, 0, 0], sizes = [4, 8, 8], strides = [1, 1, 1]} : vector<4x16x8xf32> to vector<4x8x8xf32>
    %237 = vector.extract_strided_slice %234 {offsets = [0, 0, 0], sizes = [4, 8, 8], strides = [1, 1, 1]} : vector<4x16x8xf32> to vector<4x8x8xf32>
    %238 = vector.extract_strided_slice %205 {offsets = [0, 0, 0, 0], sizes = [1, 4, 8, 8], strides = [1, 1, 1, 1]} : vector<2x4x8x8xf32> to vector<1x4x8x8xf32>
    %239 = vector.shape_cast %238 : vector<1x4x8x8xf32> to vector<4x8x8xf32>
    %240 = arith.truncf %235 : vector<4x8x8xf32> to vector<4x8x8xbf16>
    %241 = arith.truncf %236 : vector<4x8x8xf32> to vector<4x8x8xbf16>
    %cst_95 = arith.constant dense<0.000000e+00> : vector<4x8x8xf32>
    %242 = tpu.matmul %240, %241, %cst_95 {dimension_numbers = #tpu.dot_dimension_numbers<[2], [2], [1], [1], [0, 0, 0, 1, 1, 1], [0], [0]>} : vector<4x8x8xbf16>, vector<4x8x8xbf16>, vector<4x8x8xf32> -> vector<4x8x8xf32>
    %243 = arith.addf %242, %239 : vector<4x8x8xf32>
    %cst_96 = arith.constant dense<0xFF800000> : vector<4x8xf32>
    %244 = vector.multi_reduction <maximumf>, %243, %cst_96 [2] : vector<4x8x8xf32> to vector<4x8xf32>
    %245 = vector.shape_cast %244 : vector<4x8xf32> to vector<4x8x1xf32>
    %246 = vector.broadcast %245 : vector<4x8x1xf32> to vector<4x8x8xf32>
    %247 = arith.subf %243, %246 : vector<4x8x8xf32>
    %248 = math.exp %247 : vector<4x8x8xf32>
    %cst_97 = arith.constant dense<0.000000e+00> : vector<4x8xf32>
    %249 = vector.multi_reduction <add>, %248, %cst_97 [2] : vector<4x8x8xf32> to vector<4x8xf32>
    %250 = vector.shape_cast %249 : vector<4x8xf32> to vector<4x8x1xf32>
    %251 = tpu.reciprocal %250 {approx = true} : vector<4x8x1xf32> -> vector<4x8x1xf32>
    %252 = vector.broadcast %251 : vector<4x8x1xf32> to vector<4x8x8xf32>
    %253 = arith.mulf %248, %252 : vector<4x8x8xf32>
    %254 = arith.truncf %253 : vector<4x8x8xf32> to vector<4x8x8xbf16>
    %255 = arith.truncf %237 : vector<4x8x8xf32> to vector<4x8x8xbf16>
    %cst_98 = arith.constant dense<0.000000e+00> : vector<4x8x8xf32>
    %256 = tpu.matmul %254, %255, %cst_98 {dimension_numbers = #tpu.dot_dimension_numbers<[2], [1], [1], [2], [0, 0, 0, 1, 1, 2], [0], [0]>} : vector<4x8x8xbf16>, vector<4x8x8xbf16>, vector<4x8x8xf32> -> vector<4x8x8xf32>
    %257 = arith.truncf %256 : vector<4x8x8xf32> to vector<4x8x8xbf16>
    %cst_99 = arith.constant dense<0.000000e+00> : vector<4x8x32xf32>
    %258 = tpu.matmul %257, %204, %cst_99 {dimension_numbers = #tpu.dot_dimension_numbers<[2], [1], [1], [2], [0, 0, 0, 1, 1, 2], [0], [0]>} : vector<4x8x8xbf16>, vector<4x8x32xbf16>, vector<4x8x32xf32> -> vector<4x8x32xf32>
    %cst_100 = arith.constant dense<0.000000e+00> : vector<8x32xf32>
    %259 = vector.multi_reduction <add>, %258, %cst_100 [0] : vector<4x8x32xf32> to vector<8x32xf32>
    %260 = vector.extract_strided_slice %228 {offsets = [0, 8, 0], sizes = [4, 8, 8], strides = [1, 1, 1]} : vector<4x16x8xf32> to vector<4x8x8xf32>
    %261 = vector.extract_strided_slice %231 {offsets = [0, 8, 0], sizes = [4, 8, 8], strides = [1, 1, 1]} : vector<4x16x8xf32> to vector<4x8x8xf32>
    %262 = vector.extract_strided_slice %234 {offsets = [0, 8, 0], sizes = [4, 8, 8], strides = [1, 1, 1]} : vector<4x16x8xf32> to vector<4x8x8xf32>
    %263 = vector.extract_strided_slice %205 {offsets = [1, 0, 0, 0], sizes = [1, 4, 8, 8], strides = [1, 1, 1, 1]} : vector<2x4x8x8xf32> to vector<1x4x8x8xf32>
    %264 = vector.shape_cast %263 : vector<1x4x8x8xf32> to vector<4x8x8xf32>
    %265 = arith.truncf %260 : vector<4x8x8xf32> to vector<4x8x8xbf16>
    %266 = arith.truncf %261 : vector<4x8x8xf32> to vector<4x8x8xbf16>
    %cst_101 = arith.constant dense<0.000000e+00> : vector<4x8x8xf32>
    %267 = tpu.matmul %265, %266, %cst_101 {dimension_numbers = #tpu.dot_dimension_numbers<[2], [2], [1], [1], [0, 0, 0, 1, 1, 1], [0], [0]>} : vector<4x8x8xbf16>, vector<4x8x8xbf16>, vector<4x8x8xf32> -> vector<4x8x8xf32>
    %268 = arith.addf %267, %264 : vector<4x8x8xf32>
    %cst_102 = arith.constant dense<0xFF800000> : vector<4x8xf32>
    %269 = vector.multi_reduction <maximumf>, %268, %cst_102 [2] : vector<4x8x8xf32> to vector<4x8xf32>
    %270 = vector.shape_cast %269 : vector<4x8xf32> to vector<4x8x1xf32>
    %271 = vector.broadcast %270 : vector<4x8x1xf32> to vector<4x8x8xf32>
    %272 = arith.subf %268, %271 : vector<4x8x8xf32>
    %273 = math.exp %272 : vector<4x8x8xf32>
    %cst_103 = arith.constant dense<0.000000e+00> : vector<4x8xf32>
    %274 = vector.multi_reduction <add>, %273, %cst_103 [2] : vector<4x8x8xf32> to vector<4x8xf32>
    %275 = vector.shape_cast %274 : vector<4x8xf32> to vector<4x8x1xf32>
    %276 = tpu.reciprocal %275 {approx = true} : vector<4x8x1xf32> -> vector<4x8x1xf32>
    %277 = vector.broadcast %276 : vector<4x8x1xf32> to vector<4x8x8xf32>
    %278 = arith.mulf %273, %277 : vector<4x8x8xf32>
    %279 = arith.truncf %278 : vector<4x8x8xf32> to vector<4x8x8xbf16>
    %280 = arith.truncf %262 : vector<4x8x8xf32> to vector<4x8x8xbf16>
    %cst_104 = arith.constant dense<0.000000e+00> : vector<4x8x8xf32>
    %281 = tpu.matmul %279, %280, %cst_104 {dimension_numbers = #tpu.dot_dimension_numbers<[2], [1], [1], [2], [0, 0, 0, 1, 1, 2], [0], [0]>} : vector<4x8x8xbf16>, vector<4x8x8xbf16>, vector<4x8x8xf32> -> vector<4x8x8xf32>
    %282 = arith.truncf %281 : vector<4x8x8xf32> to vector<4x8x8xbf16>
    %cst_105 = arith.constant dense<0.000000e+00> : vector<4x8x32xf32>
    %283 = tpu.matmul %282, %204, %cst_105 {dimension_numbers = #tpu.dot_dimension_numbers<[2], [1], [1], [2], [0, 0, 0, 1, 1, 2], [0], [0]>} : vector<4x8x8xbf16>, vector<4x8x32xbf16>, vector<4x8x32xf32> -> vector<4x8x32xf32>
    %cst_106 = arith.constant dense<0.000000e+00> : vector<8x32xf32>
    %284 = vector.multi_reduction <add>, %283, %cst_106 [0] : vector<4x8x32xf32> to vector<8x32xf32>
    %285 = tpu.concatenate %259, %284 in 0 : vector<8x32xf32>, vector<8x32xf32> -> vector<16x32xf32>
    %286 = arith.addf %200, %285 : vector<16x32xf32>
    %287 = vector.extract_strided_slice %121 {offsets = [2, 0, 0], sizes = [1, 1, 32], strides = [1, 1, 1]} : vector<4x1x32xf32> to vector<1x1x32xf32>
    %288 = vector.shape_cast %287 : vector<1x1x32xf32> to vector<1x32xf32>
    %c0_107 = arith.constant 0 : index
    %c0_108 = arith.constant 0 : index
    %289 = vector.load %arg13[%c0_107, %c0_108] : memref<32x64xbf16, #tpu.memory_space<vmem>>, vector<32x64xbf16>
    %c0_109 = arith.constant 0 : index
    %c0_110 = arith.constant 0 : index
    %290 = vector.load %arg14[%c0_109, %c0_110] : memref<64x32xbf16, #tpu.memory_space<vmem>>, vector<64x32xbf16>
    %291 = arith.mulf %286, %286 : vector<16x32xf32>
    %cst_111 = arith.constant dense<0.000000e+00> : vector<16xf32>
    %292 = vector.multi_reduction <add>, %291, %cst_111 [1] : vector<16x32xf32> to vector<16xf32>
    %293 = vector.shape_cast %292 : vector<16xf32> to vector<16x1xf32>
    %cst_112 = arith.constant 3.200000e+01 : f32
    %294 = vector.broadcast %cst_112 : f32 to vector<16x1xf32>
    %295 = arith.divf %293, %294 : vector<16x1xf32>
    %cst_113 = arith.constant 9.99999997E-7 : f32
    %296 = vector.broadcast %cst_113 : f32 to vector<16x1xf32>
    %297 = arith.addf %295, %296 : vector<16x1xf32>
    %298 = math.rsqrt %297 : vector<16x1xf32>
    %299 = vector.broadcast %298 : vector<16x1xf32> to vector<16x32xf32>
    %300 = arith.mulf %286, %299 : vector<16x32xf32>
    %301 = vector.broadcast %288 : vector<1x32xf32> to vector<16x32xf32>
    %302 = arith.mulf %300, %301 : vector<16x32xf32>
    %303 = arith.truncf %302 : vector<16x32xf32> to vector<16x32xbf16>
    %cst_114 = arith.constant dense<0.000000e+00> : vector<16x64xf32>
    %304 = tpu.matmul %303, %289, %cst_114 {dimension_numbers = #tpu.dot_dimension_numbers<[1], [0], [0], [1], [0, 0, 1, 1], [], []>} : vector<16x32xbf16>, vector<32x64xbf16>, vector<16x64xf32> -> vector<16x64xf32>
    %cst_115 = arith.constant 0.000000e+00 : f32
    %305 = vector.broadcast %cst_115 : f32 to vector<16x64xf32>
    %306 = arith.maximumf %304, %305 : vector<16x64xf32>
    %307 = arith.truncf %306 : vector<16x64xf32> to vector<16x64xbf16>
    %cst_116 = arith.constant dense<0.000000e+00> : vector<16x32xf32>
    %308 = tpu.matmul %307, %290, %cst_116 {dimension_numbers = #tpu.dot_dimension_numbers<[1], [0], [0], [1], [0, 0, 1, 1], [], []>} : vector<16x64xbf16>, vector<64x32xbf16>, vector<16x32xf32> -> vector<16x32xf32>
    %309 = arith.addf %286, %308 : vector<16x32xf32>
    %310 = vector.extract_strided_slice %121 {offsets = [3, 0, 0], sizes = [1, 1, 32], strides = [1, 1, 1]} : vector<4x1x32xf32> to vector<1x1x32xf32>
    %311 = vector.shape_cast %310 : vector<1x1x32xf32> to vector<1x32xf32>
    %312 = arith.mulf %309, %309 : vector<16x32xf32>
    %cst_117 = arith.constant dense<0.000000e+00> : vector<16xf32>
    %313 = vector.multi_reduction <add>, %312, %cst_117 [1] : vector<16x32xf32> to vector<16xf32>
    %314 = vector.shape_cast %313 : vector<16xf32> to vector<16x1xf32>
    %cst_118 = arith.constant 3.200000e+01 : f32
    %315 = vector.broadcast %cst_118 : f32 to vector<16x1xf32>
    %316 = arith.divf %314, %315 : vector<16x1xf32>
    %cst_119 = arith.constant 9.99999997E-7 : f32
    %317 = vector.broadcast %cst_119 : f32 to vector<16x1xf32>
    %318 = arith.addf %316, %317 : vector<16x1xf32>
    %319 = math.rsqrt %318 : vector<16x1xf32>
    %320 = vector.broadcast %319 : vector<16x1xf32> to vector<16x32xf32>
    %321 = arith.mulf %309, %320 : vector<16x32xf32>
    %322 = vector.broadcast %311 : vector<1x32xf32> to vector<16x32xf32>
    %323 = arith.mulf %321, %322 : vector<16x32xf32>
    %cst_120 = arith.constant 0.176776692 : f32
    %324 = vector.broadcast %cst_120 : f32 to vector<16x32xf32>
    %325 = arith.mulf %323, %324 : vector<16x32xf32>
    %326 = arith.truncf %325 : vector<16x32xf32> to vector<16x32xbf16>
    %c0_121 = arith.constant 0 : index
    %c0_122 = arith.constant 0 : index
    %327 = vector.load %arg18[%c0_121, %c0_122] : memref<128x32xbf16, #tpu.memory_space<vmem>>, vector<128x32xbf16>
    %cst_123 = arith.constant dense<0.000000e+00> : vector<16x128xf32>
    %328 = tpu.matmul %326, %327, %cst_123 {dimension_numbers = #tpu.dot_dimension_numbers<[1], [1], [0], [0], [0, 0, 1, 0], [], []>} : vector<16x32xbf16>, vector<128x32xbf16>, vector<16x128xf32> -> vector<16x128xf32>
    %c0_124 = arith.constant 0 : index
    %c0_125 = arith.constant 0 : index
    %329 = vector.load %arg20[%c0_124, %c0_125] : memref<16x128xf32, #tpu.memory_space<vmem>>, vector<16x128xf32>
    tpu.vector_store %arg20[%c0_124, %c0_125], %328 {strides = array<i32>} : memref<16x128xf32, #tpu.memory_space<vmem>>, vector<16x128xf32>,
    %c0_126 = arith.constant 0 : index
    %c0_127 = arith.constant 0 : index
    %330 = vector.load %arg19[%c0_126, %c0_127] : memref<16x1xi32, #tpu.memory_space<vmem>>, vector<16x1xi32>
    %331 = tpu.iota {dimensions = array<i32: 1>} : vector<16x128xi32>
    %332 = vector.broadcast %330 : vector<16x1xi32> to vector<16x128xi32>
    %333 = arith.cmpi eq, %331, %332 : vector<16x128xi32>
    %cst_128 = arith.constant 0.000000e+00 : f32
    %334 = vector.broadcast %cst_128 : f32 to vector<16x128xf32>
    %335 = arith.select %333, %328, %334 : vector<16x128xi1>, vector<16x128xf32>
    %cst_129 = arith.constant dense<0.000000e+00> : vector<16xf32>
    %336 = vector.multi_reduction <add>, %335, %cst_129 [1] : vector<16x128xf32> to vector<16xf32>
    %337 = vector.shape_cast %336 : vector<16xf32> to vector<16x1xf32>
    %cst_130 = arith.constant dense<0xFF800000> : vector<16xf32>
    %338 = vector.multi_reduction <maximumf>, %328, %cst_130 [1] : vector<16x128xf32> to vector<16xf32>
    %339 = vector.shape_cast %338 : vector<16xf32> to vector<16x1xf32>
    %340 = vector.broadcast %339 : vector<16x1xf32> to vector<16x128xf32>
    %341 = arith.subf %328, %340 : vector<16x128xf32>
    %342 = math.exp %341 : vector<16x128xf32>
    %cst_131 = arith.constant dense<0.000000e+00> : vector<16xf32>
    %343 = vector.multi_reduction <add>, %342, %cst_131 [1] : vector<16x128xf32> to vector<16xf32>
    %344 = vector.shape_cast %343 : vector<16xf32> to vector<16x1xf32>
    %345 = math.log %344 : vector<16x1xf32>
    %346 = arith.addf %339, %345 : vector<16x1xf32>
    %347 = arith.subf %346, %337 : vector<16x1xf32>
    %c-100_i32 = arith.constant -100 : i32
    %348 = vector.broadcast %c-100_i32 : i32 to vector<16x1xi32>
    %349 = arith.cmpi ne, %330, %348 : vector<16x1xi32>
    %350 = arith.extui %349 : vector<16x1xi1> to vector<16x1xi32>
    %351 = arith.sitofp %350 : vector<16x1xi32> to vector<16x1xf32>
    %352 = arith.mulf %347, %351 : vector<16x1xf32>
    %cst_132 = arith.constant dense<0.000000e+00> : vector<1xf32>
    %353 = vector.multi_reduction <add>, %352, %cst_132 [0] : vector<16x1xf32> to vector<1xf32>
    %354 = vector.shape_cast %353 : vector<1xf32> to vector<1x1xf32>
    %cst_133 = arith.constant dense<0.000000e+00> : vector<1xf32>
    %355 = vector.multi_reduction <add>, %351, %cst_133 [0] : vector<16x1xf32> to vector<1xf32>
    %356 = vector.shape_cast %355 : vector<1xf32> to vector<1x1xf32>
    %cst_134 = arith.constant 1.000000e+00 : f32
    %357 = vector.broadcast %cst_134 : f32 to vector<1x1xf32>
    %358 = arith.maximumf %356, %357 : vector<1x1xf32>
    %359 = tpu.reciprocal %358 {approx = true} : vector<1x1xf32> -> vector<1x1xf32>
    %360 = arith.mulf %354, %359 : vector<1x1xf32>
    %c0_135 = arith.constant 0 : index
    %c0_136 = arith.constant 0 : index
    %361 = vector.load %arg21[%c0_135, %c0_136] : memref<1x1xf32, #tpu.memory_space<vmem>>, vector<1x1xf32>
    tpu.vector_store %arg21[%c0_135, %c0_136], %360 {strides = array<i32>} : memref<1x1xf32, #tpu.memory_space<vmem>>, vector<1x1xf32>,
    return
  }
  func.func @transform_0(%arg0: i32) -> (i32, i32) {
    %c0_i32 = arith.constant 0 : i32
    %c0_i32_0 = arith.constant 0 : i32
    %c0_i32_1 = arith.constant 0 : i32
    return %c0_i32, %c0_i32_0 : i32, i32
  }
  func.func @transform_1(%arg0: i32) -> (i32, i32) {
    %c0_i32 = arith.constant 0 : i32
    %c0_i32_0 = arith.constant 0 : i32
    %c0_i32_1 = arith.constant 0 : i32
    return %c0_i32, %c0_i32_0 : i32, i32
  }
  func.func @transform_2(%arg0: i32) -> (i32, i32, i32) {
    %c0_i32 = arith.constant 0 : i32
    %c0_i32_0 = arith.constant 0 : i32
    %c0_i32_1 = arith.constant 0 : i32
    %c0_i32_2 = arith.constant 0 : i32
    return %c0_i32, %c0_i32_0, %c0_i32_1 : i32, i32, i32
  }
  func.func @transform_3(%arg0: i32) -> (i32, i32, i32) {
    %c0_i32 = arith.constant 0 : i32
    %c0_i32_0 = arith.constant 0 : i32
    %c0_i32_1 = arith.constant 0 : i32
    %c0_i32_2 = arith.constant 0 : i32
    return %c0_i32, %c0_i32_0, %c0_i32_1 : i32, i32, i32
  }
  func.func @transform_4(%arg0: i32) -> (i32, i32, i32, i32) {
    %c0_i32 = arith.constant 0 : i32
    %c0_i32_0 = arith.constant 0 : i32
    %c0_i32_1 = arith.constant 0 : i32
    %c0_i32_2 = arith.constant 0 : i32
    %c0_i32_3 = arith.constant 0 : i32
    return %c0_i32, %c0_i32_0, %c0_i32_1, %c0_i32_2 : i32, i32, i32, i32
  }
  func.func @transform_5(%arg0: i32) -> (i32, i32, i32) {
    %c0_i32 = arith.constant 0 : i32
    %c0_i32_0 = arith.constant 0 : i32
    %c0_i32_1 = arith.constant 0 : i32
    %c0_i32_2 = arith.constant 0 : i32
    return %c0_i32, %c0_i32_0, %c0_i32_1 : i32, i32, i32
  }
  func.func @transform_6(%arg0: i32) -> (i32, i32) {
    %c0_i32 = arith.constant 0 : i32
    %c0_i32_0 = arith.constant 0 : i32
    %c0_i32_1 = arith.constant 0 : i32
    return %c0_i32, %c0_i32_0 : i32, i32
  }
  func.func @transform_7(%arg0: i32) -> (i32, i32) {
    %c0_i32 = arith.constant 0 : i32
    %c0_i32_0 = arith.constant 0 : i32
    %c0_i32_1 = arith.constant 0 : i32
    return %c0_i32, %c0_i32_0 : i32, i32
  }
  func.func @transform_8(%arg0: i32) -> (i32, i32, i32, i32) {
    %c0_i32 = arith.constant 0 : i32
    %c0_i32_0 = arith.constant 0 : i32
    %c0_i32_1 = arith.constant 0 : i32
    %c0_i32_2 = arith.constant 0 : i32
    %c0_i32_3 = arith.constant 0 : i32
    return %c0_i32, %c0_i32_0, %c0_i32_1, %c0_i32_2 : i32, i32, i32, i32
  }
  func.func @transform_9(%arg0: i32) -> (i32, i32, i32) {
    %c0_i32 = arith.constant 0 : i32
    %c0_i32_0 = arith.constant 0 : i32
    %c0_i32_1 = arith.constant 0 : i32
    %c0_i32_2 = arith.constant 0 : i32
    return %c0_i32, %c0_i32_0, %c0_i32_1 : i32, i32, i32
  }
  func.func @transform_10(%arg0: i32) -> (i32, i32, i32, i32) {
    %c0_i32 = arith.constant 0 : i32
    %c0_i32_0 = arith.constant 0 : i32
    %c0_i32_1 = arith.constant 0 : i32
    %c0_i32_2 = arith.constant 0 : i32
    %c0_i32_3 = arith.constant 0 : i32
    return %c0_i32, %c0_i32_0, %c0_i32_1, %c0_i32_2 : i32, i32, i32, i32
  }
  func.func @transform_11(%arg0: i32) -> (i32, i32, i32) {
    %c0_i32 = arith.constant 0 : i32
    %c0_i32_0 = arith.constant 0 : i32
    %c0_i32_1 = arith.constant 0 : i32
    %c0_i32_2 = arith.constant 0 : i32
    return %c0_i32, %c0_i32_0, %c0_i32_1 : i32, i32, i32
  }
  func.func @transform_12(%arg0: i32) -> (i32, i32) {
    %c0_i32 = arith.constant 0 : i32
    %c0_i32_0 = arith.constant 0 : i32
    %c0_i32_1 = arith.constant 0 : i32
    return %c0_i32, %c0_i32_0 : i32, i32
  }
  func.func @transform_13(%arg0: i32) -> (i32, i32) {
    %c0_i32 = arith.constant 0 : i32
    %c0_i32_0 = arith.constant 0 : i32
    %c0_i32_1 = arith.constant 0 : i32
    return %c0_i32, %c0_i32_0 : i32, i32
  }
  func.func @transform_14(%arg0: i32) -> (i32, i32, i32, i32) {
    %c0_i32 = arith.constant 0 : i32
    %c0_i32_0 = arith.constant 0 : i32
    %c0_i32_1 = arith.constant 0 : i32
    %c0_i32_2 = arith.constant 0 : i32
    %c0_i32_3 = arith.constant 0 : i32
    return %c0_i32, %c0_i32_0, %c0_i32_1, %c0_i32_2 : i32, i32, i32, i32
  }
  func.func @transform_15(%arg0: i32) -> (i32, i32, i32) {
    %c0_i32 = arith.constant 0 : i32
    %c0_i32_0 = arith.constant 0 : i32
    %c0_i32_1 = arith.constant 0 : i32
    %c0_i32_2 = arith.constant 0 : i32
    return %c0_i32, %c0_i32_0, %c0_i32_1 : i32, i32, i32
  }
  func.func @transform_16(%arg0: i32) -> (i32, i32, i32, i32) {
    %c0_i32 = arith.constant 0 : i32
    %c0_i32_0 = arith.constant 0 : i32
    %c0_i32_1 = arith.constant 0 : i32
    %c0_i32_2 = arith.constant 0 : i32
    %c0_i32_3 = arith.constant 0 : i32
    return %c0_i32, %c0_i32_0, %c0_i32_1, %c0_i32_2 : i32, i32, i32, i32
  }
  func.func @transform_17(%arg0: i32) -> (i32, i32) {
    %c0_i32 = arith.constant 0 : i32
    %c0_i32_0 = arith.constant 0 : i32
    %c0_i32_1 = arith.constant 0 : i32
    return %c0_i32, %c0_i32_0 : i32, i32
  }
  func.func @transform_18(%arg0: i32) -> (i32, i32) {
    %c0_i32 = arith.constant 0 : i32
    %c0_i32_0 = arith.constant 0 : i32
    %c0_i32_1 = arith.constant 0 : i32
    return %c0_i32, %c0_i32_0 : i32, i32
  }
  func.func @transform_19(%arg0: i32) -> (i32, i32) {
    %c0_i32 = arith.constant 0 : i32
    %c0_i32_0 = arith.constant 0 : i32
    %c0_i32_1 = arith.constant 0 : i32
    return %c0_i32, %c0_i32_0 : i32, i32
  }
  func.func @transform_20(%arg0: i32) -> (i32, i32) {
    %c0_i32 = arith.constant 0 : i32
    %c0_i32_0 = arith.constant 0 : i32
    %c0_i32_1 = arith.constant 0 : i32
    return %c0_i32, %c0_i32_0 : i32, i32
  }
}

</mosaic_0001>

<bundles_post_ra>
// kernel: t5_mtl_forward.1
= control target key start
LH: loop header
LB: loop body
LE: loop exit
PB: predicated region body
PF: predicated region fallthrough
CT: control target
= control target key end

     0   :  { %s5578_s0 = inlined_call_operand.vmem [shape: f32[16,32], index: 0, kind: input, shape index: {}]   ;;  %s5579_s1 = inlined_call_operand.vmem [shape: f32[16,32], index: 1, kind: input, shape index: {}]   ;;  %s5580_s2 = inlined_call_operand.vmem [shape: f32[3,1,32], index: 2, kind: input, shape index: {}]   ;;  %s5581_s3 = inlined_call_operand.vmem [shape: f32[4,1,32], index: 3, kind: input, shape index: {}]   ;;  %s5582_s4 = inlined_call_operand.vmem [shape: bf16[3,4,32,8], index: 4, kind: input, shape index: {}]   ;;  %s5583_s5 = inlined_call_operand.vmem [shape: bf16[4,8,32], index: 5, kind: input, shape index: {}]   ;;  %s5584_s6 = inlined_call_operand.vmem [shape: bf16[32,64], index: 6, kind: input, shape index: {}]   ;;  %s5585_s7 = inlined_call_operand.vmem [shape: bf16[64,32], index: 7, kind: input, shape index: {}]   ;;  %s5586_s8 = inlined_call_operand.vmem [shape: bf16[3,4,32,8], index: 8, kind: input, shape index: {}]   ;;  %s5587_s9 = inlined_call_operand.vmem [shape: bf16[4,8,32], index: 9, kind: input, shape index: {}]   ;;  %s5588_s10 = inlined_call_operand.vmem [shape: bf16[3,4,32,8], index: 10, kind: input, shape index: {}]   ;;  %s5589_s11 = inlined_call_operand.vmem [shape: bf16[4,8,32], index: 11, kind: input, shape index: {}]   ;;  %s5590_s12 = inlined_call_operand.vmem [shape: bf16[32,64], index: 12, kind: input, shape index: {}]   ;;  %s5591_s13 = inlined_call_operand.vmem [shape: bf16[64,32], index: 13, kind: input, shape index: {}]   ;;  %s5592_s14 = inlined_call_operand.vmem [shape: f32[2,4,8,8], index: 14, kind: input, shape index: {}]   ;;  %s5593_s15 = inlined_call_operand.vmem [shape: f32[4,8,8], index: 15, kind: input, shape index: {}]   ;;  %s5594_s16 = inlined_call_operand.vmem [shape: f32[2,4,8,8], index: 16, kind: input, shape index: {}]   ;;  %s5595_s17 = inlined_call_operand.vmem [shape: bf16[128,32], index: 17, kind: input, shape index: {}]   ;;  %s5596_s18 = inlined_call_operand.vmem [shape: s32[16,1], index: 18, kind: input, shape index: {}]   ;;  %s5597_s19 = inlined_call_operand.hbm [shape: f32[16,128], index: 19, kind: output, shape index: {0}]   ;;  %s5598_s20 = inlined_call_operand.hbm [shape: f32[1,1], index: 20, kind: output, shape index: {1}]  }
   0x1   :  { %5604 = sst [smem:[#allocation8_spill]] %s5578_s0 }
   0x2   :  { %5605 = sst [smem:[#allocation9_spill]] %s5579_s1 }
   0x3   :  { %5606 = sst [smem:[#allocation10_spill]] %s5580_s2 }
   0x4   :  { %5607 = sst [smem:[#allocation11_spill]] %s5581_s3 }
   0x5   :  { %5608 = sst [smem:[#allocation12_spill]] %s5582_s4 }
   0x6   :  { %26 = vsyncpa [#allocation3], 0  ;;  %s5609_s23 = sld [smem:[#allocation8_spill]]  ;;  %vm134_vm0 = vcmask 261120  }
   0xc   :  { %v4559_v0 = vld [vmem:[%s5609_s23] sm:$0xff]  ;;  %v4564_v1 = vld [vmem:[%s5609_s23 + $0x8] sm:$0xff] }
   0xd   :  { %v132_v2 = vmul.f32 %v4559_v0, %v4559_v0 }
   0xf   :  { %v135_v3 = vsel %vm134_vm0, %v132_v2, 0.0 }
  0x10   :  { %27 = vsyncpa [#allocation5], 0  ;;  %136 = vadd.xlane.f32.xlu0 %v135_v3  ;;  %v133_v4 = vmul.f32 %v4564_v1, %v4564_v1  ;;  %v4444_v6 = vmov 32.0   ;;  %s5610_s26 = sld [smem:[#allocation12_spill]]  ;;  %vm509_vm8 = vcmask 64512   ;;  %vm641_vm9 = vcmask 1043456  }
  0x11   :  { %4254 = vrcp.f32 %v4444_v6  ;;  %s5611_s25 = sld [smem:[#allocation10_spill]]  ;;  %s4446_s0 = smov [#allocation2]  }
  0x12   :  { %v138_v5 = vsel %vm134_vm0, %v133_v4, 0.0  ;;  %s5612_s24 = sld [smem:[#allocation9_spill]]  ;;  %s4447_s21 = smov 128  }
  0x13   :  { %s5613_s30 = sld [smem:[#allocation11_spill]]  ;;  %s4448_s1 = smov 8  }
  0x16   :  { %v4146_v14 = vld [vmem:[%s5610_s26 + $0x8] sm:$0xff]  ;;  %v4152_v16 = vld [vmem:[%s5610_s26 + $0x38] sm:$0xff]  ;;  %v4145_v19 = vld [vmem:[%s5610_s26] sm:$0xff] }
  0x17   :  { %v4255_v7 = vpop.eup %4254  ;;  %v4150_v15 = vld [vmem:[%s5610_s26 + $0x28] sm:$0xff]  ;;  %207 = vmatpush.bf16.msra.mxu1 %v4146_v14  ;;  %285 = vmatpush.bf16.msra.mxu3 %v4152_v16  ;;  %v4149_v20 = vld [vmem:[%s5610_s26 + $0x20] sm:$0xff]  ;;  %v4151_v21 = vld [vmem:[%s5610_s26 + $0x30] sm:$0xff] }
  0x18   :  { %139 = vadd.xlane.f32.xlu0 %v138_v5  ;;  %v142_v8 = vmul.f32 32.0, %v4255_v7  ;;  %vm146_vm1 = vweird.f32 %v4255_v7  ;;  %259 = vmatpush.bf16.msra.mxu2 %v4150_v15  ;;  %v4148_v24 = vld [vmem:[%s5610_s26 + $0x18] sm:$0xff]  ;;  %v4154_v25 = vld [vmem:[%s5610_s26 + $0x48] sm:$0xff]  ;;  %v4147_v30 = vld [vmem:[%s5610_s26 + $0x10] sm:$0xff] }
  0x19   :  { %v4160_v26 = vld [vmem:[%s5610_s26 + $0x78] sm:$0xff]  ;;  %v4153_v31 = vld [vmem:[%s5610_s26 + $0x40] sm:$0xff]  ;;  %v4159_v32 = vld [vmem:[%s5610_s26 + $0x70] sm:$0xff] }
  0x1a   :  { %v143_v9 = vsub.f32 1.0, %v142_v8  ;;  %v4247_v43 = vld [vmem:[%s5611_s25] ss:$0 sm:$0xff]  ;;  %v4156_v54 = vld [vmem:[%s5610_s26 + $0x58] sm:$0xff]  ;;  %v4158_v56 = vld [vmem:[%s5610_s26 + $0x68] sm:$0xff] }
  0x1b   :  { %208 = vmatpush.bf16.msra.mxu1 %v4145_v19  ;;  %286 = vmatpush.bf16.msra.mxu3 %v4151_v21  ;;  %v4162_v57 = vld [vmem:[%s5610_s26 + $0x88] sm:$0xff]  ;;  %v4155_v58 = vld [vmem:[%s5610_s26 + $0x50] sm:$0xff]  ;;  %v4157_v59 = vld [vmem:[%s5610_s26 + $0x60] sm:$0xff] }
  0x1c   :  { %v144_v10 = vmul.f32 %v4255_v7, %v143_v9  ;;  %260 = vmatpush.bf16.msra.mxu2 %v4149_v20  ;;  %v4161_v60 = vld [vmem:[%s5610_s26 + $0x80] sm:$0xff]  ;;  %v4164_v61 = vld [vmem:[%s5610_s26 + $0x98] sm:$0xff]  ;;  %v4166_v62 = vld [vmem:[%s5610_s26 + $0xa8] sm:$0xff] }
  0x1d   :  { %v4168_v63 = vld [vmem:[%s5610_s26 + $0xb8] sm:$0xff]  ;;  %v4165_v2 = vld [vmem:[%s5610_s26 + $0xa0] sm:$0xff]  ;;  %v4167_v3 = vld [vmem:[%s5610_s26 + $0xb0] sm:$0xff] }
  0x1e   :  { %v145_v11 = vadd.f32 %v4255_v7, %v144_v10 }
  0x1f   :  { %233 = vmatpush.bf16.msrb.mxu1 %v4148_v24  ;;  %389 = vmatpush.bf16.msrb.mxu3 %v4160_v26 }
  0x20   :  { %v4572_v12 = vsel %vm146_vm1, %v4255_v7, %v145_v11  ;;  %311 = vmatpush.bf16.msrb.mxu2 %v4154_v25 }
  0x23   :  { %234 = vmatpush.bf16.msrb.mxu1 %v4147_v30  ;;  %390 = vmatpush.bf16.msrb.mxu3 %v4159_v32 }
  0x24   :  { %312 = vmatpush.bf16.msrb.mxu2 %v4153_v31 }
  0x83   :  { %v137_v13 = vpop.xlane.xlu0 %136 }
  0x84   :  { %v148_v17 = vmul.f32 %v4572_v12, %v137_v13 }
  0x86   :  { %v150_v18 = vadd.f32 1e-06, %v148_v17 }
  0x88   :  { %4256 = vrsqrt.f32 %v150_v18  ;;  %vm158_vm3 = vweird.f32 %v150_v18 }
  0x8b   :  { %v140_v22 = vpop.xlane.xlu0 %139 }
  0x8c   :  { %v149_v23 = vmul.f32 %v4572_v12, %v140_v22 }
  0x8e   :  { %v4257_v27 = vpop.eup %4256  ;;  %v151_v28 = vadd.f32 1e-06, %v149_v23 }
  0x8f   :  { %v153_v29 = vmul.f32 %v4257_v27, %v150_v18  ;;  %vm159_vm2 = vweird.f32 %v4257_v27 }
  0x90   :  { %4258 = vrsqrt.f32 %v151_v28  ;;  %vm160_vm4 = vmor %vm158_vm3, %vm159_vm2  ;;  %vm168_vm6 = vweird.f32 %v151_v28 }
  0x91   :  { %v154_v33 = vmul.f32 %v4257_v27, %v153_v29 }
  0x93   :  { %v155_v34 = vmul.f32 0.5, %v154_v33 }
  0x95   :  { %v156_v35 = vsub.f32 1.5, %v155_v34 }
  0x96   :  { %v4259_v36 = vpop.eup %4258 }
  0x97   :  { %v157_v37 = vmul.f32 %v4257_v27, %v156_v35  ;;  %v163_v38 = vmul.f32 %v4259_v36, %v151_v28  ;;  %vm169_vm5 = vweird.f32 %v4259_v36 }
  0x98   :  { %vm170_vm7 = vmor %vm168_vm6, %vm169_vm5 }
  0x99   :  { %v161_v39 = vsel %vm160_vm4, %v4257_v27, %v157_v37  ;;  %v164_v40 = vmul.f32 %v4259_v36, %v163_v38 }
  0x9a   :  { %v172_v42 = vmul.f32 %v161_v39, %v4559_v0 }
  0x9b   :  { %v165_v41 = vmul.f32 0.5, %v164_v40 }
  0x9c   :  { %v177_v46 = vmul.f32 %v4247_v43, %v172_v42 }
  0x9d   :  { %v166_v44 = vsub.f32 1.5, %v165_v41 }
  0x9e   :  { %v179_v49 = vpack.c.bf16 %v177_v46, %v177_v46  ;;  %v124_v46 = vld [vmem:[%s5592_s14] sm:$0xff] }
  0x9f   :  { %v167_v45 = vmul.f32 %v4259_v36, %v166_v44 }
  0xa0   :  { %v183_v52 = vunpack.c.l.b16 %v179_v49 }
  0xa1   :  { %v171_v47 = vsel %vm170_vm7, %v4259_v36, %v167_v45  ;;  %vm1199_vm7 = vcmask 523264  }
  0xa2   :  { %v173_v48 = vmul.f32 %v171_v47, %v4564_v1  ;;  %v4163_v1 = vld [vmem:[%s5610_s26 + $0x90] sm:$0xff] }
  0xa4   :  { %v178_v50 = vmul.f32 %v4247_v43, %v173_v48 }
  0xa6   :  { %v180_v51 = vpack.c.bf16 %v178_v50, %v178_v50 }
  0xa8   :  { %v184_v53 = vunpack.c.l.b16 %v180_v51 }
  0xaa   :  { %v185_v55 = vpack.c.b16 %v184_v53, %v183_v52 }
  0xac   :  { %3670 = vmatmul.msk.bf16.vlgmr.msra.gmra.mxu1 %vm134_vm0, %v185_v55  ;;  %3688 = vmatmul.msk.bf16.vlgmr.msra.gmra.mxu2 %vm134_vm0, %v185_v55 }
  0xad   :  { %3697 = vmatmul.msk.bf16.vlgmr.msra.gmra.mxu3 %vm134_vm0, %v185_v55  ;;  %337 = vmatpush.bf16.msra.mxu1 %v4156_v54  ;;  %v125_v54 = vld [vmem:[%s5592_s14 + $0x8] sm:$0xff] }
  0xae   :  { %363 = vmatpush.bf16.msra.mxu2 %v4158_v56  ;;  %415 = vmatpush.bf16.msra.mxu3 %v4162_v57 }
  0xb1   :  { %338 = vmatpush.bf16.msra.mxu1 %v4155_v58 }
  0xb2   :  { %364 = vmatpush.bf16.msra.mxu2 %v4157_v59  ;;  %416 = vmatpush.bf16.msra.mxu3 %v4161_v60 }
  0xbc   :  { %3679 = vmatmul.msk.bf16.vlgmr.msrb.gmra.mxu1 %vm134_vm0, %v185_v55  ;;  %3706 = vmatmul.msk.bf16.vlgmr.msrb.gmra.mxu2 %vm134_vm0, %v185_v55 }
  0xbd   :  { %3733 = vmatmul.msk.bf16.vlgmr.msrb.gmra.mxu3 %vm134_vm0, %v185_v55  ;;  %441 = vmatpush.bf16.msrb.mxu1 %v4164_v61  ;;  %v126_v61 = vld [vmem:[%s5592_s14 + $0x10] sm:$0xff] }
  0xbe   :  { %467 = vmatpush.bf16.msrb.mxu2 %v4166_v62  ;;  %493 = vmatpush.bf16.msrb.mxu3 %v4168_v63 }
  0xc1   :  { %442 = vmatpush.bf16.msrb.mxu1 %v4163_v1 }
  0xc2   :  { %468 = vmatpush.bf16.msrb.mxu2 %v4165_v2  ;;  %494 = vmatpush.bf16.msrb.mxu3 %v4167_v3  ;;  %v127_v2 = vld [vmem:[%s5592_s14 + $0x18] sm:$0xff] }
  0xcc   :  { %3715 = vmatmul.msk.bf16.vlgmr.msra.gmra.mxu1 %vm134_vm0, %v185_v55  ;;  %3724 = vmatmul.msk.bf16.vlgmr.msra.gmra.mxu2 %vm134_vm0, %v185_v55 }
  0xcd   :  { %3742 = vmatmul.msk.bf16.vlgmr.msra.gmra.mxu3 %vm134_vm0, %v185_v55 }
  0xdc   :  { %3751 = vmatmul.msk.bf16.vlgmr.msrb.gmra.mxu1 %vm134_vm0, %v185_v55  ;;  %3760 = vmatmul.msk.bf16.vlgmr.msrb.gmra.mxu2 %vm134_vm0, %v185_v55 }
  0xdd   :  { %3769 = vmatmul.msk.bf16.vlgmr.msrb.gmra.mxu3 %vm134_vm0, %v185_v55 }
 0x129   :  { %v210_v4 = vpop.f32.mrf.mxu1 }
 0x12a   :  { %v501_v20 = vpack.c.bf16 %v210_v4, %v210_v4 }
 0x12f   :  { %v262_v5 = vpop.f32.mrf.mxu2 }
 0x130   :  { %v288_v6 = vpop.f32.mrf.mxu3  ;;  %v503_v35 = vpack.c.bf16 %v262_v5, %v262_v5 }
 0x131   :  { %v4665_v7 = vpop.f32.mrf.mxu1  ;;  %v504_v22 = vpack.c.bf16 %v288_v6, %v288_v6 }
 0x137   :  { %v4667_v8 = vpop.f32.mrf.mxu2 }
 0x138   :  { %v4669_v9 = vpop.f32.mrf.mxu3 }
 0x139   :  { %v236_v10 = vpop.f32.mrf.mxu1 }
 0x13a   :  { %v502_v31 = vpack.c.bf16 %v236_v10, %v236_v10 }
 0x13f   :  { %v314_v11 = vpop.f32.mrf.mxu2 }
 0x140   :  { %v505_v13 = vpack.c.bf16 %v314_v11, %v314_v11  ;;  %v392_v14 = vpop.f32.mrf.mxu3 }
 0x141   :  { %v508_v15 = vpack.c.bf16 %v392_v14, %v392_v14  ;;  %v4671_v16 = vpop.f32.mrf.mxu1 }
 0x142   :  { %v514_v17 = vsel %vm509_vm8, %v505_v13, 0 }
 0x143   :  { %v571_v18 = vsel %vm509_vm8, %v508_v15, 0  ;;  %523 = vmatpush.bf16.xpose.msra.mxu0 %v514_v17 }
 0x144   :  { %580 = vmatpush.bf16.xpose.msra.mxu3 %v571_v18 }
 0x147   :  { %v4675_v19 = vpop.f32.mrf.mxu2 }
 0x148   :  { %v4677_v21 = vpop.f32.mrf.mxu3 }
 0x149   :  { %v340_v23 = vpop.f32.mrf.mxu1 }
 0x14a   :  { %v506_v24 = vpack.c.bf16 %v340_v23, %v340_v23  ;;  %3770 = vmatmul.msk.bf16.vlgmr.msra.gmra.mxu0 %vm509_vm8, %v501_v20 }
 0x14b   :  { %3773 = vmatmul.msk.bf16.vlgmr.msra.gmra.mxu3 %vm509_vm8, %v504_v22 }
 0x14c   :  { %v533_v25 = vsel %vm509_vm8, %v506_v24, 0 }
 0x14d   :  { %542 = vmatpush.bf16.xpose.msra.mxu1 %v533_v25 }
 0x14f   :  { %v366_v26 = vpop.f32.mrf.mxu2 }
 0x150   :  { %v507_v27 = vpack.c.bf16 %v366_v26, %v366_v26  ;;  %v418_v28 = vpop.f32.mrf.mxu3 }
 0x151   :  { %v634_v29 = vpack.c.bf16 %v418_v28, %v418_v28  ;;  %v4682_v30 = vpop.f32.mrf.mxu1 }
 0x152   :  { %v552_v32 = vsel %vm509_vm8, %v507_v27, 0 }
 0x153   :  { %561 = vmatpush.bf16.xpose.msra.mxu2 %v552_v32  ;;  %v643_v33 = vsel %vm641_vm9, %v634_v29, 0 }
 0x154   :  { %652 = vmatpush.bf16.msrb.mxu0 %v643_v33  ;;  %3771 = vmatmul.msk.bf16.vlgmr.msra.gmra.mxu1 %vm509_vm8, %v502_v31 }
 0x157   :  { %v4687_v34 = vpop.f32.mrf.mxu2 }
 0x158   :  { %v4689_v36 = vpop.f32.mrf.mxu3 }
 0x159   :  { %v444_v37 = vpop.f32.mrf.mxu1 }
 0x15a   :  { %v635_v38 = vpack.c.bf16 %v444_v37, %v444_v37  ;;  %3772 = vmatmul.msk.bf16.vlgmr.msra.gmra.mxu2 %vm509_vm8, %v503_v35  ;;  %v120_v35 = vld [vmem:[%s5583_s5] sm:$0xf] }
 0x15b   :  { %v723_v37 = vsel %vm641_vm9, %v120_v35, 0 }
 0x15c   :  { %v662_v39 = vsel %vm641_vm9, %v635_v38, 0  ;;  %732 = vmatpush.bf16.msra.mxu0 %v723_v37 }
 0x15d   :  { %671 = vmatpush.bf16.msrb.mxu1 %v662_v39  ;;  %v122_v39 = vld [vmem:[%s5583_s5 + $0x8] sm:$0xf] }
 0x15f   :  { %v470_v40 = vpop.f32.mrf.mxu2 }
 0x160   :  { %v636_v41 = vpack.c.bf16 %v470_v40, %v470_v40  ;;  %v496_v42 = vpop.f32.mrf.mxu3  ;;  %v4729_v40 = vsel %vm641_vm9, %v122_v39, 0 }
 0x161   :  { %v637_v43 = vpack.c.bf16 %v496_v42, %v496_v42  ;;  %v4700_v50 = vpop.f32.mrf.mxu1  ;;  %v806_v42 = vpack.c.bf16 %v4675_v19, %v4675_v19 }
 0x162   :  { %v681_v44 = vsel %vm641_vm9, %v636_v41, 0 }
 0x163   :  { %v700_v45 = vsel %vm641_vm9, %v637_v43, 0  ;;  %690 = vmatpush.bf16.msrb.mxu2 %v681_v44  ;;  %v121_v44 = vld [vmem:[%s5583_s5 + $0x4] sm:$0xf]  ;;  %v814_v19 = vsel %vm509_vm8, %v806_v42, 0 }
 0x164   :  { %709 = vmatpush.bf16.msrb.mxu3 %v700_v45  ;;  %v123_v45 = vld [vmem:[%s5583_s5 + $0xc] sm:$0xf] }
 0x167   :  { %v4707_v58 = vpop.f32.mrf.mxu2  ;;  %770 = vmatpush.bf16.msra.mxu2 %v4729_v40 }
 0x168   :  { %v4698_v47 = vpop.f32.mrf.mxu3 }
 0x1c7   :  { %v525_v48 = vpop.f32.mrf.mxu0 }
 0x1c8   :  { %v526_v49 = vadd.f32 %v525_v48, %v124_v46  ;;  %v4741_v46 = vsel %vm641_vm9, %v121_v44, 0  ;;  %v4744_v48 = vsel %vm641_vm9, %v123_v45, 0 }
 0x1c9   :  { %751 = vmatpush.bf16.msra.mxu1 %v4741_v46  ;;  %789 = vmatpush.bf16.msra.mxu3 %v4744_v48 }
 0x1ca   :  { %v586_v51 = vsel %vm509_vm8, %v526_v49, -inf }
 0x1cb   :  { %587 = vmax.xlane.f32.xlu2 %v586_v51 }
 0x1ce   :  { %v582_v52 = vpop.f32.mrf.mxu3 }
 0x1cf   :  { %v527_v53 = vpop.f32.mrf.mxu0  ;;  %v583_v3 = vadd.f32 %v582_v52, %v127_v2 }
 0x1d0   :  { %v808_v53 = vpack.c.bf16 %v4687_v34, %v4687_v34  ;;  %v807_v34 = vpack.c.bf16 %v4682_v30, %v4682_v30 }
 0x1d1   :  { %v544_v55 = vpop.f32.mrf.mxu1  ;;  %v595_v5 = vsel %vm509_vm8, %v583_v3, -inf }
 0x1d2   :  { %v545_v56 = vadd.f32 %v544_v55, %v125_v54 }
 0x1d4   :  { %v589_v57 = vsel %vm509_vm8, %v545_v56, -inf }
 0x1d5   :  { %590 = vmax.xlane.f32.xlu2 %v589_v57 }
 0x1d6   :  { %v584_v59 = vpop.f32.mrf.mxu3 }
 0x1d7   :  { %v852_v59 = vsel %vm509_vm8, %v808_v53, 0 }
 0x1d9   :  { %v546_v60 = vpop.f32.mrf.mxu1 }
 0x1dd   :  { %v563_v62 = vpop.f32.mrf.mxu2 }
 0x1de   :  { %v564_v63 = vadd.f32 %v563_v62, %v126_v61  ;;  %v809_v62 = vpack.c.bf16 %v4677_v21, %v4677_v21  ;;  %v934_v21 = vpack.c.bf16 %v4689_v36, %v4689_v36  ;;  %v935_v36 = vpack.c.bf16 %v4700_v50, %v4700_v50 }
 0x1e0   :  { %v592_v1 = vsel %vm509_vm8, %v564_v63, -inf  ;;  %v942_v30 = vsel %vm641_vm9, %v934_v21, 0 }
 0x1e1   :  { %593 = vmax.xlane.f32.xlu1 %v592_v1 }
 0x1e5   :  { %v565_v4 = vpop.f32.mrf.mxu2 }
 0x1e6   :  { %v871_v4 = vsel %vm509_vm8, %v809_v62, 0 }
 0x1e9   :  { %596 = vmax.xlane.f32.xlu1 %v595_v5  ;;  %v833_v5 = vsel %vm509_vm8, %v807_v34, 0 }
 0x23e   :  { %v588_v6 = vpop.xlane.xlu2 %587 }
 0x23f   :  { %v598_v10 = vsub.f32 %v526_v49, %v588_v6 }
 0x241   :  { %v602_v11 = vmul.f32 1.442695, %v598_v10 }
 0x243   :  { %4260 = vpow2.f32 %v602_v11 }
 0x248   :  { %v591_v15 = vpop.xlane.xlu2 %590 }
 0x249   :  { %v4261_v13 = vpop.eup %4260  ;;  %v599_v20 = vsub.f32 %v545_v56, %v591_v15 }
 0x24a   :  { %v610_v14 = vsel %vm509_vm8, %v4261_v13, 0.0 }
 0x24b   :  { %611 = vadd.xlane.f32.xlu2 %v610_v14  ;;  %v604_v23 = vmul.f32 1.442695, %v599_v20  ;;  %v936_v14 = vpack.c.bf16 %v4707_v58, %v4707_v58 }
 0x24d   :  { %v980_v20 = vsel %vm641_vm9, %v936_v14, 0 }
 0x254   :  { %v594_v17 = vpop.xlane.xlu1 %593 }
 0x255   :  { %v600_v18 = vsub.f32 %v564_v63, %v594_v17 }
 0x257   :  { %v606_v22 = vmul.f32 1.442695, %v600_v18 }
 0x259   :  { %4262 = vpow2.f32 %v606_v22 }
 0x25a   :  { %4264 = vpow2.f32 %v604_v23  ;;  %v937_v23 = vpack.c.bf16 %v4698_v47, %v4698_v47  ;;  %v805_v47 = vpack.c.bf16 %v4669_v9, %v4669_v9 }
 0x25c   :  { %v597_v24 = vpop.xlane.xlu1 %596  ;;  %v999_v50 = vsel %vm641_vm9, %v937_v23, 0 }
 0x25d   :  { %v601_v25 = vsub.f32 %v583_v3, %v597_v24 }
 0x25f   :  { %v4263_v26 = vpop.eup %4262  ;;  %v608_v27 = vmul.f32 1.442695, %v601_v25 }
 0x260   :  { %v616_v28 = vsel %vm509_vm8, %v4263_v26, 0.0  ;;  %v4265_v29 = vpop.eup %4264 }
 0x261   :  { %4266 = vpow2.f32 %v608_v27  ;;  %617 = vadd.xlane.f32.xlu0 %v616_v28  ;;  %v613_v33 = vsel %vm509_vm8, %v4265_v29, 0.0  ;;  %v804_v28 = vpack.c.bf16 %v4667_v8, %v4667_v8 }
 0x267   :  { %v4267_v31 = vpop.eup %4266 }
 0x268   :  { %v619_v32 = vsel %vm509_vm8, %v4267_v31, 0.0 }
 0x269   :  { %620 = vadd.xlane.f32.xlu1 %v619_v32  ;;  %614 = vadd.xlane.f32.xlu0 %v613_v33  ;;  %v128_v32 = vld [vmem:[%s5592_s14 + $0x20] sm:$0xff] }
 0x2be   :  { %v612_v38 = vpop.xlane.xlu2 %611 }
 0x2bf   :  { %4268 = vrcp.f32 %v612_v38 }
 0x2c5   :  { %v4269_v41 = vpop.eup %4268 }
 0x2c6   :  { %v626_v43 = vmul.f32 %v4269_v41, %v4261_v13  ;;  %v802_v13 = vpack.c.bf16 %v4665_v7, %v4665_v7  ;;  %v961_v7 = vsel %vm641_vm9, %v935_v36, 0 }
 0x2c8   :  { %v630_v49 = vpack.c.bf16 %v626_v43, %v626_v43 }
 0x2ca   :  { %3774 = vmatmul.msk.bf16.vlgmr.msrb.gmra.mxu0 %vm509_vm8, %v630_v49 }
 0x2cb   :  { %823 = vmatpush.bf16.xpose.msrb.mxu0 %v814_v19 }
 0x2d4   :  { %v618_v51 = vpop.xlane.xlu0 %617 }
 0x2d5   :  { %4270 = vrcp.f32 %v618_v51  ;;  %v130_v51 = vld [vmem:[%s5592_s14 + $0x30] sm:$0xff] }
 0x2db   :  { %v4271_v52 = vpop.eup %4270 }
 0x2dc   :  { %v628_v54 = vmul.f32 %v4271_v52, %v4263_v26  ;;  %v621_v55 = vpop.xlane.xlu1 %620  ;;  %v615_v56 = vpop.xlane.xlu0 %614 }
 0x2dd   :  { %4272 = vrcp.f32 %v621_v55 }
 0x2de   :  { %v632_v57 = vpack.c.bf16 %v628_v54, %v628_v54  ;;  %4274 = vrcp.f32 %v615_v56  ;;  %v129_v56 = vld [vmem:[%s5592_s14 + $0x28] sm:$0xff] }
 0x2e0   :  { %3776 = vmatmul.msk.bf16.vlgmr.msrb.gmra.mxu2 %vm509_vm8, %v632_v57 }
 0x2e1   :  { %861 = vmatpush.bf16.xpose.msrb.mxu2 %v852_v59  ;;  %v131_v59 = vld [vmem:[%s5592_s14 + $0x38] sm:$0xff] }
 0x2e3   :  { %v4273_v60 = vpop.eup %4272 }
 0x2e4   :  { %v4275_v61 = vpop.eup %4274  ;;  %v629_v63 = vmul.f32 %v4273_v60, %v4267_v31 }
 0x2e5   :  { %v627_v1 = vmul.f32 %v4275_v61, %v4265_v29  ;;  %v803_v29 = vpack.c.bf16 %v4671_v16, %v4671_v16 }
 0x2e6   :  { %v633_v2 = vpack.c.bf16 %v629_v63, %v629_v63 }
 0x2e7   :  { %v631_v3 = vpack.c.bf16 %v627_v1, %v627_v1 }
 0x2e8   :  { %3777 = vmatmul.msk.bf16.vlgmr.msrb.gmra.mxu3 %vm509_vm8, %v633_v2 }
 0x2e9   :  { %3775 = vmatmul.msk.bf16.vlgmr.msrb.gmra.mxu1 %vm509_vm8, %v631_v3  ;;  %880 = vmatpush.bf16.xpose.msrb.mxu3 %v871_v4 }
 0x2ea   :  { %842 = vmatpush.bf16.xpose.msrb.mxu1 %v833_v5 }
 0x347   :  { %v654_v6 = vpop.f32.mrf.mxu0 }
 0x348   :  { %v715_v10 = vpack.c.bf16 %v654_v6, %v654_v6 }
 0x34a   :  { %3778 = vmatmul.msk.bf16.vlgmr.msra.gmra.mxu0 %vm509_vm8, %v715_v10 }
 0x34b   :  { %951 = vmatpush.bf16.msra.mxu0 %v942_v30 }
 0x34f   :  { %v656_v11 = vpop.f32.mrf.mxu0 }
 0x35a   :  { %3782 = vmatmul.msk.bf16.vlgmr.msrb.gmra.mxu0 %vm509_vm8, %v802_v13 }
 0x35b   :  { %1028 = vmatpush.bf16.msrb.mxu0 %v723_v37 }
 0x363   :  { %v692_v15 = vpop.f32.mrf.mxu2 }
 0x364   :  { %v717_v17 = vpack.c.bf16 %v692_v15, %v692_v15 }
 0x366   :  { %v673_v18 = vpop.f32.mrf.mxu1  ;;  %3780 = vmatmul.msk.bf16.vlgmr.msra.gmra.mxu2 %vm509_vm8, %v717_v17 }
 0x367   :  { %v716_v22 = vpack.c.bf16 %v673_v18, %v673_v18  ;;  %989 = vmatpush.bf16.msra.mxu2 %v980_v20 }
 0x369   :  { %3779 = vmatmul.msk.bf16.vlgmr.msra.gmra.mxu1 %vm509_vm8, %v716_v22 }
 0x36a   :  { %970 = vmatpush.bf16.msra.mxu1 %v961_v7 }
 0x36b   :  { %v694_v58 = vpop.f32.mrf.mxu2  ;;  %v711_v24 = vpop.f32.mrf.mxu3 }
 0x36c   :  { %v718_v25 = vpack.c.bf16 %v711_v24, %v711_v24 }
 0x36e   :  { %v675_v26 = vpop.f32.mrf.mxu1  ;;  %3781 = vmatmul.msk.bf16.vlgmr.msra.gmra.mxu3 %vm509_vm8, %v718_v25 }
 0x36f   :  { %1008 = vmatpush.bf16.msra.mxu3 %v999_v50 }
 0x373   :  { %v713_v27 = vpop.f32.mrf.mxu3 }
 0x376   :  { %3784 = vmatmul.msk.bf16.vlgmr.msrb.gmra.mxu2 %vm509_vm8, %v804_v28 }
 0x377   :  { %1060 = vmatpush.bf16.msrb.mxu2 %v4729_v40 }
 0x379   :  { %3783 = vmatmul.msk.bf16.vlgmr.msrb.gmra.mxu1 %vm509_vm8, %v803_v29 }
 0x37a   :  { %1044 = vmatpush.bf16.msrb.mxu1 %v4741_v46 }
 0x37e   :  { %3785 = vmatmul.msk.bf16.vlgmr.msrb.gmra.mxu3 %vm509_vm8, %v805_v47 }
 0x37f   :  { %1076 = vmatpush.bf16.msrb.mxu3 %v4744_v48 }
 0x3c7   :  { %v734_v31 = vpop.f32.mrf.mxu0 }
 0x3c8   :  { %v795_v39 = vsel %vm134_vm0, %v734_v31, 0.0  ;;  %v4832_v31 = vld [vmem:[%s5612_s24 + $0x8] sm:$0xff] }
 0x3cf   :  { %v736_v8 = vpop.f32.mrf.mxu0 }
 0x3d7   :  { %v825_v16 = vpop.f32.mrf.mxu0 }
 0x3d8   :  { %v826_v33 = vadd.f32 %v825_v16, %v128_v32  ;;  %v1321_v32 = vmul.f32 %v4832_v31, %v4832_v31 }
 0x3da   :  { %v886_v35 = vsel %vm509_vm8, %v826_v33, -inf }
 0x3db   :  { %887 = vmax.xlane.f32.xlu0 %v886_v35 }
 0x3df   :  { %v827_v37 = vpop.f32.mrf.mxu0 }
 0x3e6   :  { %v753_v38 = vpop.f32.mrf.mxu1 }
 0x3e7   :  { %v796_v9 = vsel %vm134_vm0, %v753_v38, 0.0 }
 0x3e8   :  { %v797_v40 = vadd.f32 %v796_v9, %v795_v39 }
 0x3e9   :  { %v772_v41 = vpop.f32.mrf.mxu2 }
 0x3ea   :  { %v798_v42 = vsel %vm134_vm0, %v772_v41, 0.0 }
 0x3eb   :  { %v799_v43 = vadd.f32 %v798_v42, %v797_v40 }
 0x3ee   :  { %v755_v44 = vpop.f32.mrf.mxu1 }
 0x3f1   :  { %v774_v45 = vpop.f32.mrf.mxu2  ;;  %v791_v46 = vpop.f32.mrf.mxu3 }
 0x3f2   :  { %v800_v48 = vsel %vm134_vm0, %v791_v46, 0.0 }
 0x3f3   :  { %v801_v49 = vadd.f32 %v800_v48, %v799_v43 }
 0x3f5   :  { %v4817_v24 = vadd.f32 %v801_v49, %v4559_v0  ;;  %v4827_v0 = vld [vmem:[%s5612_s24] sm:$0xff] }
 0x3f6   :  { %v844_v19 = vpop.f32.mrf.mxu1  ;;  %v1320_v8 = vmul.f32 %v4827_v0, %v4827_v0 }
 0x3f7   :  { %v845_v60 = vadd.f32 %v844_v19, %v129_v56  ;;  %v1103_v26 = vmul.f32 %v4817_v24, %v4817_v24 }
 0x3f8   :  { %v1322_v16 = vsel %vm134_vm0, %v1320_v8, 0.0 }
 0x3f9   :  { %v793_v52 = vpop.f32.mrf.mxu3  ;;  %v863_v53 = vpop.f32.mrf.mxu2  ;;  %v889_v1 = vsel %vm509_vm8, %v845_v60, -inf  ;;  %v1105_v50 = vsel %vm134_vm0, %v1103_v26, 0.0 }
 0x3fa   :  { %v864_v54 = vadd.f32 %v863_v53, %v130_v51 }
 0x3fc   :  { %v892_v55 = vsel %vm509_vm8, %v864_v54, -inf }
 0x3fd   :  { %893 = vmax.xlane.f32.xlu1 %v892_v55 }
 0x3fe   :  { %v846_v57 = vpop.f32.mrf.mxu1 }
 0x401   :  { %v865_v61 = vpop.f32.mrf.mxu2  ;;  %v882_v62 = vpop.f32.mrf.mxu3 }
 0x402   :  { %v883_v63 = vadd.f32 %v882_v62, %v131_v59 }
 0x404   :  { %v895_v34 = vsel %vm509_vm8, %v883_v63, -inf }
 0x405   :  { %896 = vmax.xlane.f32.xlu2 %v895_v34  ;;  %890 = vmax.xlane.f32.xlu1 %v889_v1  ;;  %v4176_v1 = vld [vmem:[%s5586_s8 + $0x8] sm:$0xff] }
 0x409   :  { %v884_v2 = vpop.f32.mrf.mxu3 }
 0x44e   :  { %v888_v3 = vpop.xlane.xlu0 %887 }
 0x44f   :  { %v898_v4 = vsub.f32 %v826_v33, %v888_v3  ;;  %v1325_v33 = vsel %vm134_vm0, %v1321_v32, 0.0 }
 0x451   :  { %v902_v5 = vmul.f32 1.442695, %v898_v4  ;;  %v4175_v4 = vld [vmem:[%s5586_s8] sm:$0xff] }
 0x453   :  { %4276 = vpow2.f32 %v902_v5 }
 0x459   :  { %v4277_v21 = vpop.eup %4276 }
 0x45a   :  { %v910_v6 = vsel %vm509_vm8, %v4277_v21, 0.0 }
 0x45b   :  { %911 = vadd.xlane.f32.xlu1 %v910_v6 }
 0x470   :  { %v894_v10 = vpop.xlane.xlu1 %893 }
 0x471   :  { %v900_v30 = vsub.f32 %v864_v54, %v894_v10 }
 0x473   :  { %v906_v11 = vmul.f32 1.442695, %v900_v30 }
 0x475   :  { %4278 = vpow2.f32 %v906_v11 }
 0x478   :  { %v891_v13 = vpop.xlane.xlu1 %890  ;;  %v897_v14 = vpop.xlane.xlu2 %896 }
 0x479   :  { %v899_v15 = vsub.f32 %v845_v60, %v891_v13  ;;  %v901_v17 = vsub.f32 %v883_v63, %v897_v14  ;;  %v4249_v13 = vld [vmem:[%s5613_s30] ss:$0 sm:$0xff] }
 0x47b   :  { %v4279_v36 = vpop.eup %4278  ;;  %v904_v18 = vmul.f32 1.442695, %v899_v15  ;;  %v908_v20 = vmul.f32 1.442695, %v901_v17 }
 0x47c   :  { %v916_v22 = vsel %vm509_vm8, %v4279_v36, 0.0 }
 0x47d   :  { %4280 = vpow2.f32 %v904_v18  ;;  %917 = vadd.xlane.f32.xlu2 %v916_v22 }
 0x47e   :  { %4282 = vpow2.f32 %v908_v20 }
 0x483   :  { %v4281_v7 = vpop.eup %4280 }
 0x484   :  { %v4283_v23 = vpop.eup %4282  ;;  %v913_v58 = vsel %vm509_vm8, %v4281_v7, 0.0 }
 0x485   :  { %914 = vadd.xlane.f32.xlu2 %v913_v58  ;;  %v919_v25 = vsel %vm509_vm8, %v4283_v23, 0.0  ;;  %v4183_v58 = vld [vmem:[%s5586_s8 + $0x40] sm:$0xff] }
 0x486   :  { %920 = vadd.xlane.f32.xlu0 %v919_v25 }
 0x48d   :  { %1323 = vadd.xlane.f32.xlu2 %v1322_v16 }
 0x48e   :  { %1106 = vadd.xlane.f32.xlu0 %v1105_v50 }
 0x496   :  { %1326 = vadd.xlane.f32.xlu0 %v1325_v33 }
 0x4ce   :  { %v912_v27 = vpop.xlane.xlu1 %911 }
 0x4cf   :  { %4284 = vrcp.f32 %v912_v27 }
 0x4d5   :  { %v4285_v28 = vpop.eup %4284 }
 0x4d6   :  { %v926_v29 = vmul.f32 %v4285_v28, %v4277_v21 }
 0x4d8   :  { %v930_v47 = vpack.c.bf16 %v926_v29, %v926_v29 }
 0x4da   :  { %3786 = vmatmul.msk.bf16.vlgmr.msra.gmra.mxu0 %vm509_vm8, %v930_v47 }
 0x4f0   :  { %v918_v35 = vpop.xlane.xlu2 %917 }
 0x4f1   :  { %4286 = vrcp.f32 %v918_v35  ;;  %v4178_v35 = vld [vmem:[%s5586_s8 + $0x18] sm:$0xff] }
 0x4f7   :  { %v4287_v37 = vpop.eup %4286 }
 0x4f8   :  { %v928_v38 = vmul.f32 %v4287_v37, %v4279_v36  ;;  %v915_v39 = vpop.xlane.xlu2 %914  ;;  %v4184_v36 = vld [vmem:[%s5586_s8 + $0x48] sm:$0xff]  ;;  %v4177_v37 = vld [vmem:[%s5586_s8 + $0x10] sm:$0xff] }
 0x4f9   :  { %v921_v9 = vpop.xlane.xlu0 %920  ;;  %4288 = vrcp.f32 %v915_v39  ;;  %v4185_v39 = vld [vmem:[%s5586_s8 + $0x50] sm:$0xff] }
 0x4fa   :  { %v932_v40 = vpack.c.bf16 %v928_v38, %v928_v38  ;;  %4290 = vrcp.f32 %v921_v9  ;;  %v4186_v38 = vld [vmem:[%s5586_s8 + $0x58] sm:$0xff]  ;;  %v4192_v9 = vld [vmem:[%s5586_s8 + $0x88] sm:$0xff] }
 0x4fc   :  { %3788 = vmatmul.msk.bf16.vlgmr.msra.gmra.mxu2 %vm509_vm8, %v932_v40  ;;  %v4191_v40 = vld [vmem:[%s5586_s8 + $0x80] sm:$0xff] }
 0x4fd   :  { %1387 = vmatpush.bf16.msra.mxu2 %v4176_v1 }
 0x4ff   :  { %v4289_v41 = vpop.eup %4288 }
 0x500   :  { %v4291_v42 = vpop.eup %4290  ;;  %v927_v43 = vmul.f32 %v4289_v41, %v4281_v7  ;;  %v1324_v19 = vpop.xlane.xlu2 %1323 }
 0x501   :  { %v929_v44 = vmul.f32 %v4291_v42, %v4283_v23  ;;  %v4843_v48 = vpop.xlane.xlu0 %1106  ;;  %v1328_v52 = vmul.f32 %v1324_v19, %v4572_v12  ;;  %1388 = vmatpush.bf16.msra.mxu2 %v4175_v4  ;;  %v4194_v4 = vld [vmem:[%s5586_s8 + $0x98] sm:$0xff] }
 0x502   :  { %v931_v45 = vpack.c.bf16 %v927_v43, %v927_v43 }
 0x503   :  { %v933_v46 = vpack.c.bf16 %v929_v44, %v929_v44  ;;  %v1330_v56 = vadd.f32 1e-06, %v1328_v52 }
 0x504   :  { %3787 = vmatmul.msk.bf16.vlgmr.msra.gmra.mxu1 %vm509_vm8, %v931_v45 }
 0x505   :  { %3789 = vmatmul.msk.bf16.vlgmr.msra.gmra.mxu3 %vm509_vm8, %v933_v46  ;;  %vm1338_vm12 = vweird.f32 %v1330_v56 }
 0x506   :  { %1413 = vmatpush.bf16.msra.mxu3 %v4178_v35 }
 0x509   :  { %v1327_v49 = vpop.xlane.xlu0 %1326 }
 0x50a   :  { %v1329_v51 = vmul.f32 %v1327_v49, %v4572_v12  ;;  %1414 = vmatpush.bf16.msra.mxu3 %v4177_v37 }
 0x50c   :  { %v1331_v55 = vadd.f32 1e-06, %v1329_v51 }
 0x50e   :  { %4292 = vrsqrt.f32 %v1331_v55  ;;  %vm1348_vm10 = vweird.f32 %v1331_v55 }
 0x50f   :  { %4294 = vrsqrt.f32 %v1330_v56 }
 0x514   :  { %v4293_v59 = vpop.eup %4292 }
 0x515   :  { %v4295_v60 = vpop.eup %4294  ;;  %v1343_v61 = vmul.f32 %v4293_v59, %v1331_v55  ;;  %vm1349_vm11 = vweird.f32 %v4293_v59  ;;  %v4390_v55 = vld [vmem:[%s5609_s23 + $0x8] sm:$0xff] }
 0x516   :  { %v1333_v62 = vmul.f32 %v4295_v60, %v1330_v56  ;;  %vm1339_vm13 = vweird.f32 %v4295_v60  ;;  %vm1350_vm14 = vmor %vm1348_vm10, %vm1349_vm11 }
 0x517   :  { %v1344_v63 = vmul.f32 %v4293_v59, %v1343_v61  ;;  %vm1340_vm15 = vmor %vm1338_vm12, %vm1339_vm13 }
 0x518   :  { %v1334_v34 = vmul.f32 %v4295_v60, %v1333_v62 }
 0x519   :  { %v1345_v2 = vmul.f32 0.5, %v1344_v63 }
 0x51a   :  { %v1335_v3 = vmul.f32 0.5, %v1334_v34 }
 0x51b   :  { %v1346_v5 = vsub.f32 1.5, %v1345_v2 }
 0x51c   :  { %v1336_v21 = vsub.f32 1.5, %v1335_v3 }
 0x51d   :  { %v1347_v6 = vmul.f32 %v4293_v59, %v1346_v5  ;;  %v4193_v5 = vld [vmem:[%s5586_s8 + $0x90] sm:$0xff] }
 0x51e   :  { %v1337_v10 = vmul.f32 %v4295_v60, %v1336_v21  ;;  %v1111_v21 = vmul.f32 %v4843_v48, %v4572_v12  ;;  %v4169_v48 = vld [vmem:[%s5584_s6] sm:$0xff] }
 0x51f   :  { %v1351_v30 = vsel %vm1350_vm14, %v4293_v59, %v1347_v6 }
 0x520   :  { %v1341_v11 = vsel %vm1340_vm15, %v4295_v60, %v1337_v10  ;;  %v1353_v14 = vmul.f32 %v1351_v30, %v4832_v31  ;;  %v1113_v10 = vadd.f32 1e-06, %v1111_v21  ;;  %v4171_v21 = vld [vmem:[%s5585_s7] sm:$0xff] }
 0x521   :  { %v1352_v15 = vmul.f32 %v1341_v11, %v4827_v0 }
 0x522   :  { %v1358_v22 = vmul.f32 %v4249_v13, %v1353_v14  ;;  %4296 = vrsqrt.f32 %v1113_v10  ;;  %vm1121_vm2 = vweird.f32 %v1113_v10 }
 0x523   :  { %v1357_v7 = vmul.f32 %v4249_v13, %v1352_v15  ;;  %v4170_v13 = vld [vmem:[%s5584_s6 + $0x8] sm:$0xff] }
 0x524   :  { %v1360_v25 = vpack.c.bf16 %v1358_v22, %v1358_v22  ;;  %1164 = vmatpush.bf16.msra.mxu0 %v4170_v13  ;;  %v4180_v22 = vld [vmem:[%s5586_s8 + $0x28] sm:$0xff] }
 0x525   :  { %v1359_v26 = vpack.c.bf16 %v1357_v7, %v1357_v7 }
 0x526   :  { %v1364_v47 = vunpack.c.l.b16 %v1360_v25 }
 0x527   :  { %v1363_v31 = vunpack.c.l.b16 %v1359_v26 }
 0x528   :  { %1165 = vmatpush.bf16.msra.mxu0 %v4169_v48 }
 0x529   :  { %v4868_v8 = vpack.c.b16 %v1364_v47, %v1363_v31 }
 0x557   :  { %v953_v53 = vpop.f32.mrf.mxu0 }
 0x558   :  { %v1014_v54 = vpack.c.bf16 %v953_v53, %v953_v53 }
 0x55a   :  { %3790 = vmatmul.msk.bf16.vlgmr.msrb.gmra.mxu0 %vm509_vm8, %v1014_v54 }
 0x55b   :  { %1439 = vmatpush.bf16.msrb.mxu0 %v4180_v22 }
 0x55f   :  { %v955_v57 = vpop.f32.mrf.mxu0 }
 0x57f   :  { %v991_v17 = vpop.f32.mrf.mxu2 }
 0x580   :  { %v1016_v18 = vpack.c.bf16 %v991_v17, %v991_v17  ;;  %v4297_v17 = vpop.eup %4296 }
 0x581   :  { %v972_v20 = vpop.f32.mrf.mxu1  ;;  %v1116_v7 = vmul.f32 %v4297_v17, %v1113_v10  ;;  %vm1122_vm1 = vweird.f32 %v4297_v17 }
 0x582   :  { %v1015_v23 = vpack.c.bf16 %v972_v20, %v972_v20  ;;  %3792 = vmatmul.msk.bf16.vlgmr.msrb.gmra.mxu2 %vm509_vm8, %v1016_v18  ;;  %vm1123_vm3 = vmor %vm1121_vm2, %vm1122_vm1 }
 0x583   :  { %1491 = vmatpush.bf16.msrb.mxu2 %v4184_v36 }
 0x584   :  { %3791 = vmatmul.msk.bf16.vlgmr.msrb.gmra.mxu1 %vm509_vm8, %v1015_v23 }
 0x587   :  { %v993_v50 = vpop.f32.mrf.mxu2  ;;  %1492 = vmatpush.bf16.msrb.mxu2 %v4183_v58  ;;  %v4179_v58 = vld [vmem:[%s5586_s8 + $0x20] sm:$0xff] }
 0x588   :  { %v1010_v27 = vpop.f32.mrf.mxu3  ;;  %v1117_v50 = vmul.f32 %v4297_v17, %v1116_v7  ;;  %1440 = vmatpush.bf16.msrb.mxu0 %v4179_v58 }
 0x589   :  { %v1017_v28 = vpack.c.bf16 %v1010_v27, %v1010_v27  ;;  %v974_v29 = vpop.f32.mrf.mxu1 }
 0x58b   :  { %3793 = vmatmul.msk.bf16.vlgmr.msrb.gmra.mxu3 %vm509_vm8, %v1017_v28  ;;  %v1118_v28 = vmul.f32 0.5, %v1117_v50 }
 0x58c   :  { %1517 = vmatpush.bf16.msrb.mxu3 %v4186_v38 }
 0x58d   :  { %v1119_v29 = vsub.f32 1.5, %v1118_v28 }
 0x590   :  { %v1012_v32 = vpop.f32.mrf.mxu3  ;;  %1518 = vmatpush.bf16.msrb.mxu3 %v4185_v39  ;;  %v4248_v39 = vld [vmem:[%s5611_s25 + $0x1] ss:$0 sm:$0xff] }
 0x591   :  { %v1120_v32 = vmul.f32 %v4297_v17, %v1119_v29  ;;  %v4198_v29 = vld [vmem:[%s5586_s8 + $0xb8] sm:$0xff] }
 0x592   :  { %3828 = vmatmul.msk.bf16.vlgmr.msra.gmra.mxu2 %vm134_vm0, %v4868_v8 }
 0x593   :  { %1595 = vmatpush.bf16.msra.mxu2 %v4192_v9  ;;  %v1124_v35 = vsel %vm1123_vm3, %v4297_v17, %v1120_v32 }
 0x594   :  { %v1135_v9 = vmul.f32 %v1124_v35, %v4817_v24 }
 0x597   :  { %1596 = vmatpush.bf16.msra.mxu2 %v4191_v40 }
 0x59b   :  { %3837 = vmatmul.msk.bf16.vlgmr.msra.gmra.mxu3 %vm134_vm0, %v4868_v8 }
 0x59c   :  { %1621 = vmatpush.bf16.msra.mxu3 %v4194_v4  ;;  %v4994_v4 = vld [vmem:[%s5593_s15 + $0x8] sm:$0xff] }
 0x5a0   :  { %1622 = vmatpush.bf16.msra.mxu3 %v4193_v5 }
 0x5a2   :  { %3864 = vmatmul.msk.bf16.vlgmr.msrb.gmra.mxu2 %vm134_vm0, %v4868_v8 }
 0x5ab   :  { %3873 = vmatmul.msk.bf16.vlgmr.msrb.gmra.mxu3 %vm134_vm0, %v4868_v8 }
 0x5b2   :  { %3900 = vmatmul.msk.bf16.vlgmr.msra.gmra.mxu2 %vm134_vm0, %v4868_v8 }
 0x5bb   :  { %3909 = vmatmul.msk.bf16.vlgmr.msra.gmra.mxu3 %vm134_vm0, %v4868_v8 }
 0x5d7   :  { %v1030_v16 = vpop.f32.mrf.mxu0 }
 0x5d8   :  { %v1082_v45 = vsel %vm134_vm0, %v1030_v16, 0.0 }
 0x5df   :  { %v1032_v33 = vpop.f32.mrf.mxu0 }
 0x601   :  { %v1046_v41 = vpop.f32.mrf.mxu1 }
 0x602   :  { %v1083_v43 = vsel %vm134_vm0, %v1046_v41, 0.0 }
 0x603   :  { %v1084_v49 = vadd.f32 %v1083_v43, %v1082_v45 }
 0x605   :  { %v1062_v42 = vpop.f32.mrf.mxu2 }
 0x606   :  { %v1085_v46 = vsel %vm134_vm0, %v1062_v42, 0.0  ;;  %v1140_v42 = vmul.f32 %v4248_v39, %v1135_v9  ;;  %v1312_v9 = vld [vmem:[%s5587_s9] sm:$0xf] }
 0x607   :  { %v1086_v51 = vadd.f32 %v1085_v46, %v1084_v49  ;;  %v4187_v46 = vld [vmem:[%s5586_s8 + $0x60] sm:$0xff] }
 0x609   :  { %v1048_v44 = vpop.f32.mrf.mxu1 }
 0x60a   :  { %v4188_v44 = vld [vmem:[%s5586_s8 + $0x68] sm:$0xff] }
 0x60d   :  { %v1064_v19 = vpop.f32.mrf.mxu2 }
 0x60e   :  { %v1078_v52 = vpop.f32.mrf.mxu3  ;;  %v4961_v19 = vld [vmem:[%s5593_s15] sm:$0xff] }
 0x60f   :  { %v1087_v53 = vsel %vm134_vm0, %v1078_v52, 0.0 }
 0x610   :  { %v1088_v54 = vadd.f32 %v1087_v53, %v1086_v51  ;;  %v4196_v53 = vld [vmem:[%s5586_s8 + $0xa8] sm:$0xff] }
 0x612   :  { %v4905_v56 = vadd.f32 %v4390_v55, %v1088_v54  ;;  %v4195_v55 = vld [vmem:[%s5586_s8 + $0xa0] sm:$0xff] }
 0x614   :  { %v1104_v57 = vmul.f32 %v4905_v56, %v4905_v56 }
 0x615   :  { %v1390_v59 = vpop.f32.mrf.mxu2 }
 0x616   :  { %v1080_v60 = vpop.f32.mrf.mxu3  ;;  %v1108_v61 = vsel %vm134_vm0, %v1104_v57, 0.0  ;;  %v1681_v2 = vpack.c.bf16 %v1390_v59, %v1390_v59  ;;  %v4174_v59 = vld [vmem:[%s5585_s7 + $0x18] sm:$0xff] }
 0x617   :  { %1109 = vadd.xlane.f32.xlu1 %v1108_v61  ;;  %1207 = vmatpush.bf16.msra.mxu1 %v4174_v59 }
 0x61d   :  { %v4910_v62 = vpop.f32.mrf.mxu2 }
 0x61e   :  { %v1416_v3 = vpop.f32.mrf.mxu3 }
 0x61f   :  { %v1682_v18 = vpack.c.bf16 %v1416_v3, %v1416_v3  ;;  %v4172_v3 = vld [vmem:[%s5585_s7 + $0x8] sm:$0xff] }
 0x625   :  { %v1494_v63 = vpop.f32.mrf.mxu2 }
 0x626   :  { %v1685_v34 = vpack.c.bf16 %v1494_v63, %v1494_v63  ;;  %v4922_v6 = vpop.f32.mrf.mxu3 }
 0x628   :  { %v1693_v1 = vsel %vm509_vm8, %v1685_v34, 0 }
 0x629   :  { %1702 = vmatpush.bf16.xpose.msrb.mxu2 %v1693_v1 }
 0x62d   :  { %v4926_v30 = vpop.f32.mrf.mxu2 }
 0x62e   :  { %v1520_v11 = vpop.f32.mrf.mxu3 }
 0x62f   :  { %v1686_v14 = vpack.c.bf16 %v1520_v11, %v1520_v11 }
 0x630   :  { %3928 = vmatmul.msk.bf16.vlgmr.msrb.gmra.mxu2 %vm509_vm8, %v1681_v2  ;;  %v4173_v2 = vld [vmem:[%s5585_s7 + $0x10] sm:$0xff] }
 0x631   :  { %v1712_v15 = vsel %vm509_vm8, %v1686_v14, 0  ;;  %1208 = vmatpush.bf16.msra.mxu1 %v4173_v2  ;;  %v4182_v14 = vld [vmem:[%s5586_s8 + $0x38] sm:$0xff] }
 0x632   :  { %1721 = vmatpush.bf16.xpose.msrb.mxu3 %v1712_v15  ;;  %v4181_v15 = vld [vmem:[%s5586_s8 + $0x30] sm:$0xff] }
 0x635   :  { %v1598_v36 = vpop.f32.mrf.mxu2  ;;  %1209 = vmatpush.bf16.msra.mxu1 %v4172_v3 }
 0x636   :  { %v1813_v20 = vpack.c.bf16 %v1598_v36, %v1598_v36  ;;  %v4980_v60 = vpop.f32.mrf.mxu3 }
 0x638   :  { %v1821_v23 = vsel %vm641_vm9, %v1813_v20, 0 }
 0x639   :  { %1830 = vmatpush.bf16.msra.mxu2 %v1821_v23  ;;  %3929 = vmatmul.msk.bf16.vlgmr.msrb.gmra.mxu3 %vm509_vm8, %v1682_v18  ;;  %v4190_v23 = vld [vmem:[%s5586_s8 + $0x78] sm:$0xff] }
 0x63a   :  { %1210 = vmatpush.bf16.msra.mxu1 %v4171_v21 }
 0x63d   :  { %v4956_v49 = vpop.f32.mrf.mxu2 }
 0x63e   :  { %v1624_v61 = vpop.f32.mrf.mxu3  ;;  %1465 = vmatpush.bf16.msrb.mxu1 %v4182_v14 }
 0x63f   :  { %v1814_v63 = vpack.c.bf16 %v1624_v61, %v1624_v61 }
 0x641   :  { %v1840_v34 = vsel %vm641_vm9, %v1814_v63, 0 }
 0x642   :  { %1849 = vmatpush.bf16.msra.mxu3 %v1840_v34  ;;  %1466 = vmatpush.bf16.msrb.mxu1 %v4181_v15 }
 0x646   :  { %v4983_v1 = vpop.f32.mrf.mxu3 }
 0x68a   :  { %v1110_v25 = vpop.xlane.xlu1 %1109 }
 0x68b   :  { %v1112_v26 = vmul.f32 %v1110_v25, %v4572_v12  ;;  %v4189_v25 = vld [vmem:[%s5586_s8 + $0x70] sm:$0xff] }
 0x68d   :  { %v1114_v27 = vadd.f32 1e-06, %v1112_v26 }
 0x68f   :  { %4298 = vrsqrt.f32 %v1114_v27  ;;  %vm1131_vm5 = vweird.f32 %v1114_v27 }
 0x695   :  { %v4299_v47 = vpop.eup %4298 }
 0x696   :  { %v1126_v31 = vmul.f32 %v4299_v47, %v1114_v27  ;;  %vm1132_vm4 = vweird.f32 %v4299_v47 }
 0x697   :  { %vm1133_vm6 = vmor %vm1131_vm5, %vm1132_vm4 }
 0x698   :  { %v1127_v16 = vmul.f32 %v4299_v47, %v1126_v31 }
 0x69a   :  { %v1128_v33 = vmul.f32 0.5, %v1127_v16 }
 0x69c   :  { %v1129_v37 = vsub.f32 1.5, %v1128_v33 }
 0x69e   :  { %v1130_v38 = vmul.f32 %v4299_v47, %v1129_v37 }
 0x6a0   :  { %v1134_v40 = vsel %vm1133_vm6, %v4299_v47, %v1130_v38  ;;  %v4197_v47 = vld [vmem:[%s5586_s8 + $0xb0] sm:$0xff] }
 0x6a1   :  { %v1136_v41 = vmul.f32 %v1134_v40, %v4905_v56  ;;  %v1901_v40 = vsel %vm641_vm9, %v1312_v9, 0 }
 0x6a2   :  { %1910 = vmatpush.bf16.msrb.mxu2 %v1901_v40 }
 0x6a3   :  { %v1141_v43 = vmul.f32 %v4248_v39, %v1136_v41 }
 0x6a5   :  { %v1142_v45 = vpack.c.bf16 %v1141_v43, %v1140_v42 }
 0x6a7   :  { %3802 = vmatmul.msk.bf16.vlgmr.msra.gmra.mxu0 %vm134_vm0, %v1142_v45  ;;  %v1984_v45 = vpack.c.bf16 %v4926_v30, %v4926_v30  ;;  %v5057_v30 = vld [vmem:[%s5593_s15 + $0x10] sm:$0xff] }
 0x6a8   :  { %1543 = vmatpush.bf16.msra.mxu0 %v4188_v44 }
 0x6ac   :  { %1544 = vmatpush.bf16.msra.mxu0 %v4187_v46 }
 0x6b3   :  { %v1704_v51 = vpop.f32.mrf.mxu2 }
 0x6b4   :  { %v1705_v52 = vadd.f32 %v1704_v51, %v4961_v19 }
 0x6b6   :  { %v1765_v54 = vsel %vm509_vm8, %v1705_v52, -inf }
 0x6b7   :  { %3846 = vmatmul.msk.bf16.vlgmr.msrb.gmra.mxu0 %vm134_vm0, %v4868_v8  ;;  %1766 = vmax.xlane.f32.xlu1 %v1765_v54 }
 0x6b8   :  { %1647 = vmatpush.bf16.msrb.mxu0 %v4196_v53 }
 0x6bb   :  { %v1706_v57 = vpop.f32.mrf.mxu2 }
 0x6bc   :  { %1648 = vmatpush.bf16.msrb.mxu0 %v4195_v55  ;;  %v1723_v5 = vpop.f32.mrf.mxu3 }
 0x6bd   :  { %v5000_v10 = vadd.f32 %v1723_v5, %v4994_v4 }
 0x6bf   :  { %v1768_v11 = vsel %vm509_vm8, %v5000_v10, -inf }
 0x6c0   :  { %1769 = vmax.xlane.f32.xlu2 %v1768_v11 }
 0x6c4   :  { %v1725_v13 = vpop.f32.mrf.mxu3 }
 0x6c7   :  { %3882 = vmatmul.msk.bf16.vlgmr.msra.gmra.mxu0 %vm134_vm0, %v4868_v8 }
 0x6d7   :  { %3918 = vmatmul.msk.bf16.vlgmr.msrb.gmra.mxu0 %vm134_vm0, %v4868_v8 }
 0x724   :  { %v1167_v48 = vpop.f32.mrf.mxu0 }
 0x725   :  { %v1172_v20 = vmax.f32 %v1167_v48, 0.0 }
 0x72a   :  { %v1767_v17 = vpop.xlane.xlu1 %1766 }
 0x72b   :  { %v1777_v36 = vsub.f32 %v1705_v52, %v1767_v17 }
 0x72c   :  { %v1169_v18 = vpop.f32.mrf.mxu0 }
 0x72d   :  { %v1781_v22 = vmul.f32 1.442695, %v1777_v36  ;;  %v1173_v7 = vmax.f32 %v1169_v18, 0.0  ;;  %v1313_v36 = vld [vmem:[%s5587_s9 + $0x4] sm:$0xf] }
 0x72e   :  { %v5071_v18 = vsel %vm641_vm9, %v1313_v36, 0 }
 0x72f   :  { %4300 = vpow2.f32 %v1781_v22  ;;  %v1174_v58 = vpack.c.bf16 %v1173_v7, %v1172_v20  ;;  %1929 = vmatpush.bf16.msrb.mxu3 %v5071_v18  ;;  %v2112_v20 = vpack.c.bf16 %v4956_v49, %v4956_v49 }
 0x731   :  { %3819 = vmatmul.msk.bf16.vlgmr.msra.gmra.mxu1 %vm1199_vm7, %v1174_v58 }
 0x732   :  { %1569 = vmatpush.bf16.msra.mxu1 %v4190_v23  ;;  %v2120_v23 = vsel %vm641_vm9, %v2112_v20, 0 }
 0x733   :  { %v1770_v41 = vpop.xlane.xlu2 %1769 }
 0x734   :  { %v1442_v26 = vpop.f32.mrf.mxu0  ;;  %v1778_v55 = vsub.f32 %v5000_v10, %v1770_v41 }
 0x735   :  { %v4301_v50 = vpop.eup %4300  ;;  %v1683_v33 = vpack.c.bf16 %v1442_v26, %v1442_v26  ;;  %v1980_v26 = vpack.c.bf16 %v4910_v62, %v4910_v62 }
 0x736   :  { %v1789_v27 = vsel %vm509_vm8, %v4301_v50, 0.0  ;;  %1570 = vmatpush.bf16.msra.mxu1 %v4189_v25  ;;  %v1783_v59 = vmul.f32 1.442695, %v1778_v55 }
 0x737   :  { %1790 = vadd.xlane.f32.xlu2 %v1789_v27 }
 0x73c   :  { %v5018_v28 = vpop.f32.mrf.mxu0 }
 0x741   :  { %3855 = vmatmul.msk.bf16.vlgmr.msrb.gmra.mxu1 %vm134_vm0, %v4868_v8 }
 0x742   :  { %1673 = vmatpush.bf16.msrb.mxu1 %v4198_v29 }
 0x744   :  { %v1546_v31 = vpop.f32.mrf.mxu0 }
 0x745   :  { %v1687_v32 = vpack.c.bf16 %v1546_v31, %v1546_v31 }
 0x746   :  { %1674 = vmatpush.bf16.msrb.mxu1 %v4197_v47  ;;  %v1985_v47 = vpack.c.bf16 %v4980_v60, %v4980_v60 }
 0x747   :  { %v1731_v16 = vsel %vm509_vm8, %v1687_v32, 0 }
 0x748   :  { %1740 = vmatpush.bf16.xpose.msra.mxu0 %v1731_v16  ;;  %v5088_v16 = vld [vmem:[%s5593_s15 + $0x18] sm:$0xff] }
 0x74c   :  { %v5029_v35 = vpop.f32.mrf.mxu0 }
 0x74f   :  { %3930 = vmatmul.msk.bf16.vlgmr.msra.gmra.mxu0 %vm509_vm8, %v1683_v33 }
 0x751   :  { %3891 = vmatmul.msk.bf16.vlgmr.msra.gmra.mxu1 %vm134_vm0, %v4868_v8 }
 0x754   :  { %v1650_v37 = vpop.f32.mrf.mxu0 }
 0x755   :  { %v1815_v38 = vpack.c.bf16 %v1650_v37, %v1650_v37 }
 0x757   :  { %v1859_v39 = vsel %vm641_vm9, %v1815_v38, 0  ;;  %v2011_v38 = vsel %vm509_vm8, %v1985_v47, 0 }
 0x758   :  { %1868 = vmatpush.bf16.msrb.mxu0 %v1859_v39 }
 0x75c   :  { %v5049_v54 = vpop.f32.mrf.mxu0 }
 0x761   :  { %3927 = vmatmul.msk.bf16.vlgmr.msrb.gmra.mxu1 %vm134_vm0, %v4868_v8  ;;  %v1992_v8 = vsel %vm509_vm8, %v1984_v45, 0 }
 0x7aa   :  { %v1791_v42 = vpop.xlane.xlu2 %1790 }
 0x7ab   :  { %4302 = vrcp.f32 %v1791_v42  ;;  %v1314_v42 = vld [vmem:[%s5587_s9 + $0x8] sm:$0xf] }
 0x7ac   :  { %4304 = vpow2.f32 %v1783_v59 }
 0x7ae   :  { %v5041_v43 = vpop.f32.mrf.mxu1 }
 0x7b1   :  { %v4303_v44 = vpop.eup %4302 }
 0x7b2   :  { %v1805_v46 = vmul.f32 %v4303_v44, %v4301_v50  ;;  %v4305_v21 = vpop.eup %4304  ;;  %v5099_v44 = vsel %vm641_vm9, %v1314_v42, 0 }
 0x7b3   :  { %v1792_v11 = vsel %vm509_vm8, %v4305_v21, 0.0  ;;  %1948 = vmatpush.bf16.msra.mxu0 %v5099_v44 }
 0x7b4   :  { %v1809_v51 = vpack.c.bf16 %v1805_v46, %v1805_v46 }
 0x7b6   :  { %v5045_v52 = vpop.f32.mrf.mxu1  ;;  %3932 = vmatmul.msk.bf16.vlgmr.msra.gmra.mxu2 %vm509_vm8, %v1809_v51 }
 0x7b7   :  { %2001 = vmatpush.bf16.xpose.msra.mxu2 %v1992_v8 }
 0x7be   :  { %v1468_v53 = vpop.f32.mrf.mxu1 }
 0x7bf   :  { %v1684_v14 = vpack.c.bf16 %v1468_v53, %v1468_v53 }
 0x7c6   :  { %v5052_v57 = vpop.f32.mrf.mxu1 }
 0x7cc   :  { %v1742_v61 = vpop.f32.mrf.mxu0 }
 0x7cd   :  { %v1743_v63 = vadd.f32 %v1742_v61, %v5057_v30 }
 0x7ce   :  { %v1572_v34 = vpop.f32.mrf.mxu1 }
 0x7cf   :  { %v1688_v2 = vpack.c.bf16 %v1572_v34, %v1572_v34  ;;  %v1771_v3 = vsel %vm509_vm8, %v1743_v63, -inf }
 0x7d0   :  { %1772 = vmax.xlane.f32.xlu0 %v1771_v3 }
 0x7d1   :  { %v1750_v5 = vsel %vm509_vm8, %v1688_v2, 0  ;;  %v2113_v2 = vpack.c.bf16 %v4983_v1, %v4983_v1 }
 0x7d2   :  { %1759 = vmatpush.bf16.xpose.msra.mxu1 %v1750_v5 }
 0x7d4   :  { %v1744_v10 = vpop.f32.mrf.mxu0 }
 0x7d6   :  { %v5063_v13 = vpop.f32.mrf.mxu1 }
 0x7d8   :  { %1793 = vadd.xlane.f32.xlu0 %v1792_v11 }
 0x7d9   :  { %3931 = vmatmul.msk.bf16.vlgmr.msra.gmra.mxu1 %vm509_vm8, %v1684_v14  ;;  %v2139_v14 = vsel %vm641_vm9, %v2113_v2, 0 }
 0x7de   :  { %v1676_v15 = vpop.f32.mrf.mxu1 }
 0x7df   :  { %v1816_v48 = vpack.c.bf16 %v1676_v15, %v1676_v15 }
 0x7e1   :  { %v1878_v17 = vsel %vm641_vm9, %v1816_v48, 0 }
 0x7e2   :  { %1887 = vmatpush.bf16.msrb.mxu1 %v1878_v17  ;;  %v1981_v17 = vpack.c.bf16 %v4922_v6, %v4922_v6 }
 0x7e6   :  { %v5081_v27 = vpop.f32.mrf.mxu1 }
 0x7e7   :  { %v2115_v42 = vpack.c.bf16 %v5081_v27, %v5081_v27 }
 0x839   :  { %v1832_v22 = vpop.f32.mrf.mxu2 }
 0x83a   :  { %v1893_v7 = vpack.c.bf16 %v1832_v22, %v1832_v22 }
 0x83c   :  { %3936 = vmatmul.msk.bf16.vlgmr.msrb.gmra.mxu2 %vm509_vm8, %v1893_v7  ;;  %v1987_v7 = vpack.c.bf16 %v5063_v13, %v5063_v13 }
 0x83d   :  { %2129 = vmatpush.bf16.msrb.mxu2 %v2120_v23 }
 0x83e   :  { %v2049_v6 = vsel %vm509_vm8, %v1987_v7, 0 }
 0x841   :  { %v1834_v58 = vpop.f32.mrf.mxu2 }
 0x843   :  { %v1773_v25 = vpop.xlane.xlu0 %1772 }
 0x844   :  { %v1779_v49 = vsub.f32 %v1743_v63, %v1773_v25 }
 0x846   :  { %v1785_v32 = vmul.f32 1.442695, %v1779_v49 }
 0x84b   :  { %v1794_v50 = vpop.xlane.xlu0 %1793 }
 0x84c   :  { %4306 = vrcp.f32 %v1794_v50  ;;  %3940 = vmatmul.msk.bf16.vlgmr.msra.gmra.mxu2 %vm509_vm8, %v1980_v26 }
 0x84d   :  { %2206 = vmatpush.bf16.msra.mxu2 %v1901_v40  ;;  %4308 = vpow2.f32 %v1785_v32 }
 0x852   :  { %v4307_v29 = vpop.eup %4306 }
 0x853   :  { %v1806_v31 = vmul.f32 %v4307_v29, %v4305_v21  ;;  %v4309_v60 = vpop.eup %4308 }
 0x854   :  { %v1795_v40 = vsel %vm509_vm8, %v4309_v60, 0.0 }
 0x855   :  { %v1810_v62 = vpack.c.bf16 %v1806_v31, %v1806_v31 }
 0x856   :  { %v1761_v33 = vpop.f32.mrf.mxu1 }
 0x857   :  { %v1762_v37 = vadd.f32 %v1761_v33, %v5088_v16  ;;  %3933 = vmatmul.msk.bf16.vlgmr.msra.gmra.mxu3 %vm509_vm8, %v1810_v62 }
 0x858   :  { %2020 = vmatpush.bf16.xpose.msra.mxu3 %v2011_v38 }
 0x859   :  { %v1774_v39 = vsel %vm509_vm8, %v1762_v37, -inf }
 0x85a   :  { %1775 = vmax.xlane.f32.xlu1 %v1774_v39 }
 0x85e   :  { %v1763_v9 = vpop.f32.mrf.mxu1 }
 0x862   :  { %1796 = vadd.xlane.f32.xlu1 %v1795_v40 }
 0x8bf   :  { %v1912_v41 = vpop.f32.mrf.mxu2 }
 0x8c0   :  { %v1973_v49 = vsel %vm134_vm0, %v1912_v41, 0.0 }
 0x8c7   :  { %v1914_v45 = vpop.f32.mrf.mxu2 }
 0x8cd   :  { %v1776_v46 = vpop.xlane.xlu1 %1775 }
 0x8ce   :  { %v1780_v51 = vsub.f32 %v1762_v37, %v1776_v46 }
 0x8cf   :  { %v2003_v8 = vpop.f32.mrf.mxu2 }
 0x8d0   :  { %v1787_v53 = vmul.f32 1.442695, %v1780_v51  ;;  %v2004_v55 = vadd.f32 %v2003_v8, %v4961_v19  ;;  %v1986_v19 = vpack.c.bf16 %v5029_v35, %v5029_v35  ;;  %v1315_v35 = vld [vmem:[%s5587_s9 + $0xc] sm:$0xf]  ;;  %s3634_s9 = sshll.u32 %s5597_s19, 4  ;;  %s4450_s19 = smov [#allocation4]   ;;  %s3635_s9 = int_to_ptr.hbm [resolvable:$true] %s3634_s9 }
 0x8d1   :  { %v1958_v36 = vsel %vm641_vm9, %v1315_v35, 0  ;;  %s3646_s6 = sshll.u32 %s4450_s19, 4  ;;  %s3647_s6 = int_to_ptr.vmem [resolvable:$true] %s3646_s6 }
 0x8d2   :  { %4310 = vpow2.f32 %v1787_v53  ;;  %v2064_v59 = vsel %vm509_vm8, %v2004_v55, -inf  ;;  %v2030_v1 = vsel %vm509_vm8, %v1986_v19, 0  ;;  %1967 = vmatpush.bf16.msra.mxu1 %v1958_v36 }
 0x8d3   :  { %2065 = vmax.xlane.f32.xlu0 %v2064_v59 }
 0x8d5   :  { %v1797_v61 = vpop.xlane.xlu1 %1796 }
 0x8d6   :  { %4312 = vrcp.f32 %v1797_v61 }
 0x8d7   :  { %v2005_v63 = vpop.f32.mrf.mxu2 }
 0x8d8   :  { %v4311_v34 = vpop.eup %4310 }
 0x8d9   :  { %v1798_v3 = vsel %vm509_vm8, %v4311_v34, 0.0 }
 0x8da   :  { %v1851_v5 = vpop.f32.mrf.mxu3  ;;  %1799 = vadd.xlane.f32.xlu2 %v1798_v3 }
 0x8db   :  { %v1894_v21 = vpack.c.bf16 %v1851_v5, %v1851_v5 }
 0x8dc   :  { %v4313_v10 = vpop.eup %4312 }
 0x8dd   :  { %v1807_v11 = vmul.f32 %v4313_v10, %v4309_v60  ;;  %3937 = vmatmul.msk.bf16.vlgmr.msrb.gmra.mxu3 %vm509_vm8, %v1894_v21 }
 0x8de   :  { %2148 = vmatpush.bf16.msrb.mxu3 %v2139_v14 }
 0x8df   :  { %v1811_v15 = vpack.c.bf16 %v1807_v11, %v1807_v11 }
 0x8e1   :  { %3934 = vmatmul.msk.bf16.vlgmr.msrb.gmra.mxu0 %vm509_vm8, %v1811_v15 }
 0x8e2   :  { %2039 = vmatpush.bf16.xpose.msrb.mxu0 %v2030_v1  ;;  %v1853_v48 = vpop.f32.mrf.mxu3 }
 0x8ed   :  { %3941 = vmatmul.msk.bf16.vlgmr.msra.gmra.mxu3 %vm509_vm8, %v1981_v17  ;;  %v5158_v17 = vadd.f32 %v5045_v52, %v4905_v56 }
 0x8ee   :  { %2222 = vmatpush.bf16.msra.mxu3 %v5071_v18  ;;  %v2114_v18 = vpack.c.bf16 %v5049_v54, %v5049_v54  ;;  %v1982_v54 = vpack.c.bf16 %v5018_v28, %v5018_v28 }
 0x8f0   :  { %v2158_v13 = vsel %vm641_vm9, %v2114_v18, 0 }
 0x946   :  { %v2066_v32 = vpop.xlane.xlu0 %2065 }
 0x947   :  { %v2076_v33 = vsub.f32 %v2004_v55, %v2066_v32  ;;  %v1983_v55 = vpack.c.bf16 %v5052_v57, %v5052_v57 }
 0x949   :  { %v2080_v37 = vmul.f32 1.442695, %v2076_v33 }
 0x94d   :  { %v1800_v20 = vpop.xlane.xlu2 %1799 }
 0x94e   :  { %4314 = vrcp.f32 %v1800_v20  ;;  %v1220_v20 = vmul.f32 %v5158_v17, %v5158_v17 }
 0x94f   :  { %4316 = vpow2.f32 %v2080_v37 }
 0x954   :  { %v4315_v22 = vpop.eup %4314 }
 0x955   :  { %v1808_v23 = vmul.f32 %v4315_v22, %v4311_v34  ;;  %v4317_v9 = vpop.eup %4316 }
 0x956   :  { %v2088_v41 = vsel %vm509_vm8, %v4317_v9, 0.0 }
 0x957   :  { %v1812_v58 = vpack.c.bf16 %v1808_v23, %v1808_v23 }
 0x959   :  { %3935 = vmatmul.msk.bf16.vlgmr.msrb.gmra.mxu1 %vm509_vm8, %v1812_v58 }
 0x95a   :  { %2058 = vmatpush.bf16.xpose.msrb.mxu1 %v2049_v6 }
 0x95e   :  { %v1870_v25 = vpop.f32.mrf.mxu0 }
 0x95f   :  { %v1895_v26 = vpack.c.bf16 %v1870_v25, %v1870_v25 }
 0x960   :  { %v1931_v50 = vpop.f32.mrf.mxu3 }
 0x961   :  { %v1974_v29 = vsel %vm134_vm0, %v1931_v50, 0.0  ;;  %3938 = vmatmul.msk.bf16.vlgmr.msra.gmra.mxu0 %vm509_vm8, %v1895_v26 }
 0x962   :  { %v1975_v47 = vadd.f32 %v1974_v29, %v1973_v49  ;;  %2167 = vmatpush.bf16.msra.mxu0 %v2158_v13 }
 0x966   :  { %v1872_v31 = vpop.f32.mrf.mxu0 }
 0x968   :  { %v1933_v62 = vpop.f32.mrf.mxu3 }
 0x970   :  { %v2022_v38 = vpop.f32.mrf.mxu3 }
 0x971   :  { %v2023_v39 = vadd.f32 %v2022_v38, %v4994_v4  ;;  %3942 = vmatmul.msk.bf16.vlgmr.msrb.gmra.mxu0 %vm509_vm8, %v1982_v54  ;;  %v2177_v4 = vsel %vm641_vm9, %v2115_v42, 0  ;;  %v5171_v54 = vadd.f32 %v5041_v43, %v4817_v24 }
 0x972   :  { %2238 = vmatpush.bf16.msrb.mxu0 %v5099_v44 }
 0x973   :  { %v2067_v60 = vsel %vm509_vm8, %v2023_v39, -inf }
 0x974   :  { %2068 = vmax.xlane.f32.xlu1 %v2067_v60 }
 0x978   :  { %v2024_v40 = vpop.f32.mrf.mxu3 }
 0x97c   :  { %2089 = vadd.xlane.f32.xlu1 %v2088_v41 }
 0x9d6   :  { %v1889_v28 = vpop.f32.mrf.mxu1 }
 0x9d7   :  { %v1896_v45 = vpack.c.bf16 %v1889_v28, %v1889_v28 }
 0x9d9   :  { %3939 = vmatmul.msk.bf16.vlgmr.msra.gmra.mxu1 %vm509_vm8, %v1896_v45 }
 0x9da   :  { %2186 = vmatpush.bf16.msra.mxu1 %v2177_v4 }
 0x9de   :  { %v1891_v46 = vpop.f32.mrf.mxu1  ;;  %v1950_v44 = vpop.f32.mrf.mxu0 }
 0x9df   :  { %v1976_v51 = vsel %vm134_vm0, %v1950_v44, 0.0 }
 0x9e0   :  { %v1977_v8 = vadd.f32 %v1976_v51, %v1975_v47 }
 0x9e6   :  { %v1952_v53 = vpop.f32.mrf.mxu0 }
 0x9e7   :  { %v2069_v59 = vpop.xlane.xlu1 %2068 }
 0x9e8   :  { %v2077_v61 = vsub.f32 %v2023_v39, %v2069_v59 }
 0x9e9   :  { %3943 = vmatmul.msk.bf16.vlgmr.msrb.gmra.mxu1 %vm509_vm8, %v1983_v55 }
 0x9ea   :  { %2254 = vmatpush.bf16.msrb.mxu1 %v1958_v36  ;;  %v2082_v27 = vmul.f32 1.442695, %v2077_v61 }
 0x9ec   :  { %4318 = vpow2.f32 %v2082_v27 }
 0x9ee   :  { %v2041_v63 = vpop.f32.mrf.mxu0 }
 0x9ef   :  { %v2042_v34 = vadd.f32 %v2041_v63, %v5057_v30  ;;  %v2090_v2 = vpop.xlane.xlu1 %2089 }
 0x9f0   :  { %4320 = vrcp.f32 %v2090_v2 }
 0x9f1   :  { %v2070_v3 = vsel %vm509_vm8, %v2042_v34, -inf }
 0x9f2   :  { %2071 = vmax.xlane.f32.xlu2 %v2070_v3  ;;  %v4319_v5 = vpop.eup %4318 }
 0x9f3   :  { %v2091_v11 = vsel %vm509_vm8, %v4319_v5, 0.0 }
 0x9f6   :  { %v4321_v21 = vpop.eup %4320  ;;  %v2043_v10 = vpop.f32.mrf.mxu0 }
 0x9f7   :  { %v2104_v19 = vmul.f32 %v4321_v21, %v4317_v9  ;;  %v1219_v9 = vmul.f32 %v5171_v54, %v5171_v54 }
 0x9f9   :  { %v2108_v57 = vpack.c.bf16 %v2104_v19, %v2104_v19  ;;  %v1221_v41 = vsel %vm134_vm0, %v1219_v9, 0.0  ;;  %v4212_v9 = vld [vmem:[%s5588_s10 + $0x68] sm:$0xff] }
 0x9fa   :  { %2092 = vadd.xlane.f32.xlu2 %v2091_v11 }
 0x9fb   :  { %3944 = vmatmul.msk.bf16.vlgmr.msrb.gmra.mxu2 %vm509_vm8, %v2108_v57 }
 0xa56   :  { %v1969_v14 = vpop.f32.mrf.mxu1 }
 0xa57   :  { %v1978_v15 = vsel %vm134_vm0, %v1969_v14, 0.0 }
 0xa58   :  { %v1979_v1 = vadd.f32 %v1978_v15, %v1977_v8 }
 0xa5a   :  { %v5152_v30 = vadd.f32 %v1979_v1, %v4827_v0  ;;  %v1224_v0 = vsel %vm134_vm0, %v1220_v20, 0.0  ;;  %v4391_v1 = vld [vmem:[%s5612_s24 + $0x8] sm:$0xff]  ;;  %s3632_s24 = sshll.u32 %s4446_s0, 4  ;;  %s3633_s24 = int_to_ptr.vmem [resolvable:$true] %s3632_s24 }
 0xa5c   :  { %v2329_v48 = vmul.f32 %v5152_v30, %v5152_v30 }
 0xa5e   :  { %v1971_v35 = vpop.f32.mrf.mxu1  ;;  %v2331_v36 = vsel %vm134_vm0, %v2329_v48, 0.0 }
 0xa5f   :  { %2332 = vadd.xlane.f32.xlu2 %v2331_v36 }
 0xa65   :  { %v2072_v22 = vpop.xlane.xlu2 %2071 }
 0xa66   :  { %v2078_v7 = vsub.f32 %v2042_v34, %v2072_v22  ;;  %v2060_v23 = vpop.f32.mrf.mxu1 }
 0xa67   :  { %v2061_v58 = vadd.f32 %v2060_v23, %v5088_v16  ;;  %1225 = vadd.xlane.f32.xlu2 %v1224_v0 }
 0xa68   :  { %v2084_v6 = vmul.f32 1.442695, %v2078_v7 }
 0xa69   :  { %v2073_v18 = vsel %vm509_vm8, %v2061_v58, -inf }
 0xa6a   :  { %4322 = vpow2.f32 %v2084_v6  ;;  %2074 = vmax.xlane.f32.xlu0 %v2073_v18 }
 0xa6d   :  { %v2093_v56 = vpop.xlane.xlu2 %2092 }
 0xa6e   :  { %4324 = vrcp.f32 %v2093_v56  ;;  %v2062_v52 = vpop.f32.mrf.mxu1 }
 0xa6f   :  { %v4200_v52 = vld [vmem:[%s5588_s10 + $0x8] sm:$0xff] }
 0xa70   :  { %v4323_v25 = vpop.eup %4322  ;;  %2398 = vmatpush.bf16.msrb.mxu2 %v4200_v52  ;;  %v4216_v52 = vld [vmem:[%s5588_s10 + $0x88] sm:$0xff] }
 0xa71   :  { %v2094_v26 = vsel %vm509_vm8, %v4323_v25, 0.0 }
 0xa72   :  { %2095 = vadd.xlane.f32.xlu0 %v2094_v26  ;;  %v4204_v26 = vld [vmem:[%s5588_s10 + $0x28] sm:$0xff] }
 0xa74   :  { %v4325_v50 = vpop.eup %4324 }
 0xa75   :  { %v2105_v49 = vmul.f32 %v4325_v50, %v4319_v5 }
 0xa77   :  { %v2109_v29 = vpack.c.bf16 %v2105_v49, %v2105_v49  ;;  %v4206_v49 = vld [vmem:[%s5588_s10 + $0x38] sm:$0xff] }
 0xa79   :  { %3945 = vmatmul.msk.bf16.vlgmr.msrb.gmra.mxu3 %vm509_vm8, %v2109_v29 }
 0xa7e   :  { %v2131_v13 = vpop.f32.mrf.mxu2 }
 0xa7f   :  { %v2192_v16 = vpack.c.bf16 %v2131_v13, %v2131_v13 }
 0xa81   :  { %3948 = vmatmul.msk.bf16.vlgmr.msra.gmra.mxu2 %vm509_vm8, %v2192_v16  ;;  %v4199_v16 = vld [vmem:[%s5588_s10] sm:$0xff] }
 0xa82   :  { %2399 = vmatpush.bf16.msrb.mxu2 %v4199_v16  ;;  %v4217_v16 = vld [vmem:[%s5588_s10 + $0x90] sm:$0xff] }
 0xa86   :  { %v2133_v47 = vpop.f32.mrf.mxu2 }
 0xa87   :  { %v4201_v47 = vld [vmem:[%s5588_s10 + $0x10] sm:$0xff] }
 0xad2   :  { %v2333_v22 = vpop.xlane.xlu2 %2332 }
 0xad3   :  { %v2337_v7 = vmul.f32 %v2333_v22, %v4572_v12 }
 0xad5   :  { %v2339_v23 = vadd.f32 1e-06, %v2337_v7 }
 0xad7   :  { %vm2347_vm11 = vweird.f32 %v2339_v23 }
 0xadd   :  { %v2075_v31 = vpop.xlane.xlu0 %2074 }
 0xade   :  { %v2079_v32 = vsub.f32 %v2061_v58, %v2075_v31  ;;  %v1226_v58 = vpop.xlane.xlu2 %1225  ;;  %v4203_v31 = vld [vmem:[%s5588_s10 + $0x20] sm:$0xff] }
 0xadf   :  { %v1228_v56 = vmul.f32 %v1226_v58, %v4572_v12 }
 0xae0   :  { %v2086_v62 = vmul.f32 1.442695, %v2079_v32 }
 0xae1   :  { %v5214_v13 = vadd.f32 1e-06, %v1228_v56 }
 0xae2   :  { %4326 = vpow2.f32 %v2086_v62  ;;  %v4205_v62 = vld [vmem:[%s5588_s10 + $0x30] sm:$0xff] }
 0xae3   :  { %vm1247_vm5 = vweird.f32 %v5214_v13 }
 0xae5   :  { %v2096_v33 = vpop.xlane.xlu0 %2095 }
 0xae6   :  { %4328 = vrcp.f32 %v2096_v33 }
 0xae8   :  { %v4327_v37 = vpop.eup %4326 }
 0xae9   :  { %v2097_v38 = vsel %vm509_vm8, %v4327_v37, 0.0 }
 0xaea   :  { %2098 = vadd.xlane.f32.xlu1 %v2097_v38 }
 0xaec   :  { %v4329_v39 = vpop.eup %4328 }
 0xaed   :  { %v2106_v60 = vmul.f32 %v4329_v39, %v4323_v25  ;;  %v4202_v25 = vld [vmem:[%s5588_s10 + $0x18] sm:$0xff]  ;;  %v4208_v39 = vld [vmem:[%s5588_s10 + $0x48] sm:$0xff] }
 0xaee   :  { %2424 = vmatpush.bf16.msrb.mxu3 %v4202_v25  ;;  %2510 = vmatpush.bf16.msra.mxu2 %v4208_v39  ;;  %v4218_v25 = vld [vmem:[%s5588_s10 + $0x98] sm:$0xff] }
 0xaef   :  { %v2110_v40 = vpack.c.bf16 %v2106_v60, %v2106_v60  ;;  %v4210_v60 = vld [vmem:[%s5588_s10 + $0x58] sm:$0xff] }
 0xaf1   :  { %3946 = vmatmul.msk.bf16.vlgmr.msra.gmra.mxu0 %vm509_vm8, %v2110_v40 }
 0xaf2   :  { %1222 = vadd.xlane.f32.xlu1 %v1221_v41  ;;  %2450 = vmatpush.bf16.msra.mxu0 %v4204_v26  ;;  %v4214_v41 = vld [vmem:[%s5588_s10 + $0x78] sm:$0xff]  ;;  %v4220_v26 = vld [vmem:[%s5588_s10 + $0xa8] sm:$0xff] }
 0xaf3   :  { %2425 = vmatpush.bf16.msrb.mxu3 %v4201_v47  ;;  %v4221_v47 = vld [vmem:[%s5588_s10 + $0xb0] sm:$0xff] }
 0xaf6   :  { %2451 = vmatpush.bf16.msra.mxu0 %v4203_v31 }
 0xafc   :  { %v2150_v42 = vpop.f32.mrf.mxu3 }
 0xafd   :  { %v2193_v28 = vpack.c.bf16 %v2150_v42, %v2150_v42  ;;  %v4207_v42 = vld [vmem:[%s5588_s10 + $0x40] sm:$0xff] }
 0xafe   :  { %2511 = vmatpush.bf16.msra.mxu2 %v4207_v42 }
 0xaff   :  { %3949 = vmatmul.msk.bf16.vlgmr.msra.gmra.mxu3 %vm509_vm8, %v2193_v28  ;;  %v4209_v28 = vld [vmem:[%s5588_s10 + $0x50] sm:$0xff] }
 0xb00   :  { %2536 = vmatpush.bf16.msra.mxu3 %v4210_v60 }
 0xb04   :  { %v2152_v24 = vpop.f32.mrf.mxu3  ;;  %v2208_v43 = vpop.f32.mrf.mxu2  ;;  %2537 = vmatpush.bf16.msra.mxu3 %v4209_v28 }
 0xb05   :  { %v2260_v61 = vsel %vm134_vm0, %v2208_v43, 0.0  ;;  %v4211_v43 = vld [vmem:[%s5588_s10 + $0x60] sm:$0xff] }
 0xb0c   :  { %v2210_v45 = vpop.f32.mrf.mxu2 }
 0xb0d   :  { %v4213_v45 = vld [vmem:[%s5588_s10 + $0x70] sm:$0xff] }
 0xb5d   :  { %v2099_v4 = vpop.xlane.xlu1 %2098 }
 0xb5e   :  { %4330 = vrcp.f32 %v2099_v4 }
 0xb5f   :  { %4332 = vrsqrt.f32 %v2339_v23 }
 0xb64   :  { %v4331_v46 = vpop.eup %4330 }
 0xb65   :  { %v2107_v44 = vmul.f32 %v4331_v46, %v4327_v37  ;;  %v1223_v0 = vpop.xlane.xlu1 %1222  ;;  %v5195_v6 = vpop.eup %4332 }
 0xb66   :  { %v1227_v18 = vmul.f32 %v1223_v0, %v4572_v12  ;;  %v2342_v50 = vmul.f32 %v5195_v6, %v2339_v23  ;;  %vm2348_vm10 = vweird.f32 %v5195_v6 }
 0xb67   :  { %v2111_v51 = vpack.c.bf16 %v2107_v44, %v2107_v44  ;;  %vm2349_vm12 = vmor %vm2347_vm11, %vm2348_vm10 }
 0xb68   :  { %v5212_v29 = vadd.f32 1e-06, %v1227_v18  ;;  %v2343_v32 = vmul.f32 %v5195_v6, %v2342_v50  ;;  %v4222_v50 = vld [vmem:[%s5588_s10 + $0xb8] sm:$0xff] }
 0xb69   :  { %3947 = vmatmul.msk.bf16.vlgmr.msra.gmra.mxu1 %vm509_vm8, %v2111_v51 }
 0xb6a   :  { %2476 = vmatpush.bf16.msra.mxu1 %v4206_v49  ;;  %4334 = vrsqrt.f32 %v5212_v29  ;;  %v2344_v38 = vmul.f32 0.5, %v2343_v32  ;;  %vm1237_vm3 = vweird.f32 %v5212_v29 }
 0xb6b   :  { %4336 = vrsqrt.f32 %v5214_v13 }
 0xb6c   :  { %v2345_v4 = vsub.f32 1.5, %v2344_v38 }
 0xb6e   :  { %v2169_v8 = vpop.f32.mrf.mxu0  ;;  %2477 = vmatpush.bf16.msra.mxu1 %v4205_v62  ;;  %v2346_v51 = vmul.f32 %v5195_v6, %v2345_v4 }
 0xb6f   :  { %v2194_v53 = vpack.c.bf16 %v2169_v8, %v2169_v8 }
 0xb70   :  { %v4335_v24 = vpop.eup %4334 }
 0xb71   :  { %3950 = vmatmul.msk.bf16.vlgmr.msrb.gmra.mxu0 %vm509_vm8, %v2194_v53  ;;  %v4337_v46 = vpop.eup %4336  ;;  %v1232_v44 = vmul.f32 %v4335_v24, %v5212_v29  ;;  %vm1238_vm1 = vweird.f32 %v4335_v24 }
 0xb72   :  { %2562 = vmatpush.bf16.msrb.mxu0 %v4212_v9  ;;  %v1242_v8 = vmul.f32 %v4337_v46, %v5214_v13  ;;  %vm1248_vm2 = vweird.f32 %v4337_v46  ;;  %vm1239_vm4 = vmor %vm1237_vm3, %vm1238_vm1  ;;  %v4215_v13 = vld [vmem:[%s5588_s10 + $0x80] sm:$0xff] }
 0xb73   :  { %vm1249_vm6 = vmor %vm1247_vm5, %vm1248_vm2 }
 0xb76   :  { %v2171_v55 = vpop.f32.mrf.mxu0  ;;  %2563 = vmatpush.bf16.msrb.mxu0 %v4211_v43 }
 0xb77   :  { %v1233_v55 = vmul.f32 %v4335_v24, %v1232_v44 }
 0xb82   :  { %v2224_v59 = vpop.f32.mrf.mxu3 }
 0xb83   :  { %v2261_v27 = vsel %vm134_vm0, %v2224_v59, 0.0 }
 0xb84   :  { %v2262_v63 = vadd.f32 %v2261_v27, %v2260_v61  ;;  %v2350_v61 = vsel %vm2349_vm12, %v5195_v6, %v2346_v51  ;;  %v1243_v27 = vmul.f32 %v4337_v46, %v1242_v8 }
 0xb8a   :  { %v2226_v34 = vpop.f32.mrf.mxu3 }
 0xb8b   :  { %v1234_v34 = vmul.f32 0.5, %v1233_v55 }
 0xbe6   :  { %v2188_v2 = vpop.f32.mrf.mxu1 }
 0xbe7   :  { %v2195_v3 = vpack.c.bf16 %v2188_v2, %v2188_v2 }
 0xbe9   :  { %3951 = vmatmul.msk.bf16.vlgmr.msrb.gmra.mxu1 %vm509_vm8, %v2195_v3  ;;  %v4250_v3 = vld [vmem:[%s5613_s30 + $0x1] ss:$0 sm:$0xff] }
 0xbea   :  { %2588 = vmatpush.bf16.msrb.mxu1 %v4214_v41 }
 0xbee   :  { %v2190_v5 = vpop.f32.mrf.mxu1  ;;  %v2240_v21 = vpop.f32.mrf.mxu0  ;;  %2589 = vmatpush.bf16.msrb.mxu1 %v4213_v45 }
 0xbef   :  { %v2263_v10 = vsel %vm134_vm0, %v2240_v21, 0.0  ;;  %v2361_v5 = vmul.f32 %v2350_v61, %v5152_v30  ;;  %v1244_v21 = vmul.f32 0.5, %v1243_v27 }
 0xbf0   :  { %v2264_v19 = vadd.f32 %v2263_v10, %v2262_v63 }
 0xbf6   :  { %v2242_v57 = vpop.f32.mrf.mxu0 }
 0xc66   :  { %v2256_v11 = vpop.f32.mrf.mxu1 }
 0xc67   :  { %v2265_v14 = vsel %vm134_vm0, %v2256_v11, 0.0  ;;  %v2366_v11 = vmul.f32 %v4250_v3, %v2361_v5 }
 0xc68   :  { %v2266_v15 = vadd.f32 %v2265_v14, %v2264_v19  ;;  %v1235_v19 = vsub.f32 1.5, %v1234_v34  ;;  %v1245_v14 = vsub.f32 1.5, %v1244_v21 }
 0xc6a   :  { %v5189_v48 = vadd.f32 %v4391_v1, %v2266_v15  ;;  %v1246_v22 = vmul.f32 %v4337_v46, %v1245_v14 }
 0xc6c   :  { %v2330_v35 = vmul.f32 %v5189_v48, %v5189_v48  ;;  %v1250_v6 = vsel %vm1249_vm6, %v4337_v46, %v1246_v22  ;;  %vm3604_vm6 = vcmask 7168  }
 0xc6d   :  { %v1252_v49 = vmul.f32 %v1250_v6, %v5158_v17  ;;  %v4219_v17 = vld [vmem:[%s5588_s10 + $0xa0] sm:$0xff] }
 0xc6e   :  { %v2258_v36 = vpop.f32.mrf.mxu1  ;;  %v2334_v20 = vsel %vm134_vm0, %v2330_v35, 0.0  ;;  %v1236_v35 = vmul.f32 %v4335_v24, %v1235_v19 }
 0xc6f   :  { %2335 = vadd.xlane.f32.xlu0 %v2334_v20  ;;  %v2368_v36 = vpack.c.bf16 %v2366_v11, %v2366_v11 }
 0xc70   :  { %v1240_v23 = vsel %vm1239_vm4, %v4335_v24, %v1236_v35 }
 0xc71   :  { %v2374_v0 = vunpack.c.l.b16 %v2368_v36  ;;  %v1251_v18 = vmul.f32 %v1240_v23, %v5171_v54  ;;  %v4251_v54 = vld [vmem:[%s5611_s25 + $0x2] ss:$0 sm:$0xff] }
 0xc72   :  { %v1257_v31 = vmul.f32 %v4251_v54, %v1252_v49 }
 0xc73   :  { %v1256_v29 = vmul.f32 %v4251_v54, %v1251_v18  ;;  %v2323_v18 = vld [vmem:[%s5594_s16 + $0x10] sm:$0xff] }
 0xc74   :  { %v2371_v62 = vpack.c.bf16 %v1257_v31, %v1257_v31 }
 0xc75   :  { %v2370_v32 = vpack.c.bf16 %v1256_v29, %v1256_v29 }
 0xce2   :  { %v2336_v33 = vpop.xlane.xlu0 %2335 }
 0xce3   :  { %v2338_v37 = vmul.f32 %v2336_v33, %v4572_v12  ;;  %v2486_v33 = vunpack.c.l.b16 %v2370_v32 }
 0xce5   :  { %v2340_v40 = vadd.f32 1e-06, %v2338_v37  ;;  %v2487_v37 = vunpack.c.l.b16 %v2371_v62 }
 0xce7   :  { %4338 = vrsqrt.f32 %v2340_v40  ;;  %vm2357_vm14 = vweird.f32 %v2340_v40  ;;  %v2488_v38 = vpack.c.b16 %v2487_v37, %v2486_v33  ;;  %v2324_v37 = vld [vmem:[%s5594_s16 + $0x18] sm:$0xff] }
 0xced   :  { %v4339_v53 = vpop.eup %4338 }
 0xcee   :  { %v2352_v59 = vmul.f32 %v4339_v53, %v2340_v40  ;;  %vm2358_vm13 = vweird.f32 %v4339_v53 }
 0xcef   :  { %vm2359_vm15 = vmor %vm2357_vm14, %vm2358_vm13 }
 0xcf0   :  { %v2353_v63 = vmul.f32 %v4339_v53, %v2352_v59 }
 0xcf2   :  { %v2354_v2 = vmul.f32 0.5, %v2353_v63 }
 0xcf4   :  { %v2355_v10 = vsub.f32 1.5, %v2354_v2 }
 0xcf6   :  { %v2356_v57 = vmul.f32 %v4339_v53, %v2355_v10 }
 0xcf8   :  { %v2360_v15 = vsel %vm2359_vm15, %v4339_v53, %v2356_v57 }
 0xcf9   :  { %v2362_v1 = vmul.f32 %v2360_v15, %v5189_v48 }
 0xcfb   :  { %v2367_v20 = vmul.f32 %v4250_v3, %v2362_v1 }
 0xcfd   :  { %v2369_v7 = vpack.c.bf16 %v2367_v20, %v2367_v20 }
 0xcff   :  { %v2375_v58 = vunpack.c.l.b16 %v2369_v7 }
 0xd01   :  { %v2376_v56 = vpack.c.b16 %v2375_v58, %v2374_v0 }
 0xd03   :  { %3960 = vmatmul.msk.bf16.vlgmr.msrb.gmra.mxu2 %vm134_vm0, %v2376_v56  ;;  %3969 = vmatmul.msk.bf16.vlgmr.msrb.gmra.mxu3 %vm134_vm0, %v2376_v56 }
 0xd04   :  { %3978 = vmatmul.msk.bf16.vlgmr.msra.gmra.mxu0 %vm134_vm0, %v2376_v56  ;;  %3987 = vmatmul.msk.bf16.vlgmr.msra.gmra.mxu1 %vm134_vm0, %v2376_v56 }
 0xd05   :  { %2614 = vmatpush.bf16.msrb.mxu2 %v4216_v52  ;;  %2640 = vmatpush.bf16.msrb.mxu3 %v4218_v25 }
 0xd06   :  { %2666 = vmatpush.bf16.msra.mxu0 %v4220_v26  ;;  %2692 = vmatpush.bf16.msra.mxu1 %v4222_v50 }
 0xd09   :  { %2615 = vmatpush.bf16.msrb.mxu2 %v4215_v13  ;;  %2641 = vmatpush.bf16.msrb.mxu3 %v4217_v16  ;;  %v2321_v13 = vld [vmem:[%s5594_s16] sm:$0xff]  ;;  %v2322_v16 = vld [vmem:[%s5594_s16 + $0x8] sm:$0xff] }
 0xd0a   :  { %2667 = vmatpush.bf16.msra.mxu0 %v4219_v17  ;;  %2693 = vmatpush.bf16.msra.mxu1 %v4221_v47 }
 0xd13   :  { %3996 = vmatmul.msk.bf16.vlgmr.msra.gmra.mxu2 %vm134_vm0, %v2488_v38  ;;  %4005 = vmatmul.msk.bf16.vlgmr.msra.gmra.mxu3 %vm134_vm0, %v2488_v38 }
 0xd14   :  { %4014 = vmatmul.msk.bf16.vlgmr.msrb.gmra.mxu0 %vm134_vm0, %v2488_v38  ;;  %4023 = vmatmul.msk.bf16.vlgmr.msrb.gmra.mxu1 %vm134_vm0, %v2488_v38 }
 0xd23   :  { %4032 = vmatmul.msk.bf16.vlgmr.msrb.gmra.mxu2 %vm134_vm0, %v2488_v38  ;;  %4041 = vmatmul.msk.bf16.vlgmr.msrb.gmra.mxu3 %vm134_vm0, %v2488_v38 }
 0xd24   :  { %4050 = vmatmul.msk.bf16.vlgmr.msra.gmra.mxu0 %vm134_vm0, %v2488_v38  ;;  %4059 = vmatmul.msk.bf16.vlgmr.msra.gmra.mxu1 %vm134_vm0, %v2488_v38 }
 0xd81   :  { %v2453_v39 = vpop.f32.mrf.mxu0  ;;  %v2479_v60 = vpop.f32.mrf.mxu1 }
 0xd82   :  { %v2702_v2 = vpack.c.bf16 %v2453_v39, %v2453_v39  ;;  %v2703_v3 = vpack.c.bf16 %v2479_v60, %v2479_v60 }
 0xd86   :  { %v2401_v9 = vpop.f32.mrf.mxu2  ;;  %v2427_v40 = vpop.f32.mrf.mxu3 }
 0xd87   :  { %v2700_v10 = vpack.c.bf16 %v2401_v9, %v2401_v9  ;;  %v2701_v19 = vpack.c.bf16 %v2427_v40, %v2427_v40 }
 0xd89   :  { %v5309_v41 = vpop.f32.mrf.mxu0  ;;  %v5311_v42 = vpop.f32.mrf.mxu1 }
 0xd8e   :  { %v5313_v28 = vpop.f32.mrf.mxu2  ;;  %v5315_v24 = vpop.f32.mrf.mxu3 }
 0xd91   :  { %v2565_v43 = vpop.f32.mrf.mxu0  ;;  %v2591_v45 = vpop.f32.mrf.mxu1 }
 0xd92   :  { %v2706_v4 = vpack.c.bf16 %v2565_v43, %v2565_v43  ;;  %v2707_v46 = vpack.c.bf16 %v2591_v45, %v2591_v45 }
 0xd94   :  { %v2750_v44 = vsel %vm509_vm8, %v2706_v4, 0  ;;  %v2769_v51 = vsel %vm509_vm8, %v2707_v46, 0 }
 0xd95   :  { %2759 = vmatpush.bf16.xpose.msrb.mxu0 %v2750_v44  ;;  %2778 = vmatpush.bf16.xpose.msrb.mxu1 %v2769_v51 }
 0xd96   :  { %v2513_v8 = vpop.f32.mrf.mxu2  ;;  %v2539_v53 = vpop.f32.mrf.mxu3 }
 0xd97   :  { %v2704_v55 = vpack.c.bf16 %v2513_v8, %v2513_v8  ;;  %v2705_v59 = vpack.c.bf16 %v2539_v53, %v2539_v53 }
 0xd99   :  { %v2712_v61 = vsel %vm509_vm8, %v2704_v55, 0  ;;  %v2731_v27 = vsel %vm509_vm8, %v2705_v59, 0  ;;  %v5321_v63 = vpop.f32.mrf.mxu0  ;;  %v5323_v34 = vpop.f32.mrf.mxu1 }
 0xd9a   :  { %2721 = vmatpush.bf16.xpose.msra.mxu2 %v2712_v61  ;;  %2740 = vmatpush.bf16.xpose.msra.mxu3 %v2731_v27 }
 0xd9c   :  { %4062 = vmatmul.msk.bf16.vlgmr.msrb.gmra.mxu0 %vm509_vm8, %v2702_v2  ;;  %4063 = vmatmul.msk.bf16.vlgmr.msrb.gmra.mxu1 %vm509_vm8, %v2703_v3 }
 0xd9e   :  { %v5327_v5 = vpop.f32.mrf.mxu2  ;;  %v5329_v21 = vpop.f32.mrf.mxu3 }
 0xda1   :  { %v2669_v57 = vpop.f32.mrf.mxu0  ;;  %v2695_v11 = vpop.f32.mrf.mxu1  ;;  %4060 = vmatmul.msk.bf16.vlgmr.msra.gmra.mxu2 %vm509_vm8, %v2700_v10  ;;  %4061 = vmatmul.msk.bf16.vlgmr.msra.gmra.mxu3 %vm509_vm8, %v2701_v19 }
 0xda2   :  { %v2834_v14 = vpack.c.bf16 %v2669_v57, %v2669_v57  ;;  %v2835_v15 = vpack.c.bf16 %v2695_v11, %v2695_v11 }
 0xda4   :  { %v2878_v1 = vsel %vm641_vm9, %v2834_v14, 0  ;;  %v2897_v35 = vsel %vm641_vm9, %v2835_v15, 0  ;;  %v2319_v15 = vld [vmem:[%s5589_s11 + $0x8] sm:$0xf] }
 0xda5   :  { %2887 = vmatpush.bf16.msra.mxu0 %v2878_v1  ;;  %2906 = vmatpush.bf16.msra.mxu1 %v2897_v35  ;;  %v5369_v1 = vsel %vm641_vm9, %v2319_v15, 0  ;;  %v2317_v35 = vld [vmem:[%s5589_s11] sm:$0xf] }
 0xda6   :  { %v2617_v36 = vpop.f32.mrf.mxu2  ;;  %v2643_v20 = vpop.f32.mrf.mxu3 }
 0xda7   :  { %v2832_v22 = vpack.c.bf16 %v2617_v36, %v2617_v36  ;;  %v2833_v7 = vpack.c.bf16 %v2643_v20, %v2643_v20  ;;  %v2318_v36 = vld [vmem:[%s5589_s11 + $0x4] sm:$0xf]  ;;  %v5379_v20 = vsel %vm641_vm9, %v2317_v35, 0 }
 0xda9   :  { %v2840_v23 = vsel %vm641_vm9, %v2832_v22, 0  ;;  %v2859_v0 = vsel %vm641_vm9, %v2833_v7, 0  ;;  %v5337_v58 = vpop.f32.mrf.mxu0  ;;  %v5339_v6 = vpop.f32.mrf.mxu1  ;;  %2967 = vmatpush.bf16.msrb.mxu0 %v5369_v1  ;;  %v5382_v22 = vsel %vm641_vm9, %v2318_v36, 0  ;;  %v2320_v7 = vld [vmem:[%s5589_s11 + $0xc] sm:$0xf]  ;;  %s3648_s11 = sshll.u32 %s5598_s20, 4  ;;  %s3649_s11 = int_to_ptr.hbm [resolvable:$true] %s3648_s11 }
 0xdaa   :  { %2849 = vmatpush.bf16.msrb.mxu2 %v2840_v23  ;;  %2868 = vmatpush.bf16.msrb.mxu3 %v2859_v0  ;;  %v5390_v23 = vsel %vm641_vm9, %v2320_v7, 0 }
 0xdab   :  { %2986 = vmatpush.bf16.msrb.mxu1 %v5390_v23 }
 0xdae   :  { %v5344_v26 = vpop.f32.mrf.mxu2  ;;  %v5346_v50 = vpop.f32.mrf.mxu3  ;;  %2929 = vmatpush.bf16.msra.mxu2 %v5379_v20  ;;  %2948 = vmatpush.bf16.msra.mxu3 %v5382_v22 }
 0xe19   :  { %v2761_v56 = vpop.f32.mrf.mxu0  ;;  %v2780_v52 = vpop.f32.mrf.mxu1 }
 0xe1a   :  { %v2762_v25 = vadd.f32 %v2761_v56, %v2323_v18  ;;  %v2781_v38 = vadd.f32 %v2780_v52, %v2324_v37  ;;  %v3005_v56 = vpack.c.bf16 %v5321_v63, %v5321_v63  ;;  %v3003_v63 = vpack.c.bf16 %v5327_v5, %v5327_v5 }
 0xe1c   :  { %v2790_v54 = vsel %vm509_vm8, %v2762_v25, -inf  ;;  %v2793_v9 = vsel %vm509_vm8, %v2781_v38, -inf }
 0xe1d   :  { %2791 = vmax.xlane.f32.xlu2 %v2790_v54 }
 0xe21   :  { %v2763_v49 = vpop.f32.mrf.mxu0  ;;  %v2782_v29 = vpop.f32.mrf.mxu1 }
 0xe22   :  { %v3049_v49 = vsel %vm509_vm8, %v3005_v56, 0 }
 0xe24   :  { %v2723_v17 = vpop.f32.mrf.mxu2  ;;  %v2742_v47 = vpop.f32.mrf.mxu3 }
 0xe25   :  { %v2724_v31 = vadd.f32 %v2723_v17, %v2321_v13  ;;  %v2743_v32 = vadd.f32 %v2742_v47, %v2322_v16  ;;  %v3004_v17 = vpack.c.bf16 %v5329_v21, %v5329_v21 }
 0xe27   :  { %v2787_v62 = vsel %vm509_vm8, %v2743_v32, -inf  ;;  %v2784_v33 = vsel %vm509_vm8, %v2724_v31, -inf  ;;  %v3030_v37 = vsel %vm509_vm8, %v3004_v17, 0 }
 0xe28   :  { %2788 = vmax.xlane.f32.xlu1 %v2787_v62  ;;  %2785 = vmax.xlane.f32.xlu0 %v2784_v33 }
 0xe2c   :  { %v2725_v39 = vpop.f32.mrf.mxu2  ;;  %v2744_v60 = vpop.f32.mrf.mxu3 }
 0xe2d   :  { %v3006_v39 = vpack.c.bf16 %v5323_v34, %v5323_v34  ;;  %v3132_v34 = vpack.c.bf16 %v5346_v50, %v5346_v50 }
 0xe30   :  { %2794 = vmax.xlane.f32.xlu0 %v2793_v9  ;;  %v3068_v9 = vsel %vm509_vm8, %v3006_v39, 0 }
 0xe90   :  { %v2792_v40 = vpop.xlane.xlu2 %2791 }
 0xe91   :  { %v2798_v43 = vsub.f32 %v2762_v25, %v2792_v40  ;;  %v3133_v40 = vpack.c.bf16 %v5337_v58, %v5337_v58 }
 0xe93   :  { %v2804_v45 = vmul.f32 1.442695, %v2798_v43 }
 0xe95   :  { %4340 = vpow2.f32 %v2804_v45 }
 0xe9b   :  { %v4341_v4 = vpop.eup %4340  ;;  %v2789_v46 = vpop.xlane.xlu1 %2788 }
 0xe9c   :  { %v2786_v44 = vpop.xlane.xlu0 %2785  ;;  %v2797_v51 = vsub.f32 %v2743_v32, %v2789_v46  ;;  %v2814_v53 = vsel %vm509_vm8, %v4341_v4, 0.0 }
 0xe9d   :  { %v2796_v8 = vsub.f32 %v2724_v31, %v2786_v44  ;;  %2815 = vadd.xlane.f32.xlu0 %v2814_v53  ;;  %v3001_v44 = vpack.c.bf16 %v5309_v41, %v5309_v41 }
 0xe9e   :  { %v2802_v55 = vmul.f32 1.442695, %v2797_v51  ;;  %v3131_v51 = vpack.c.bf16 %v5344_v26, %v5344_v26 }
 0xe9f   :  { %v2800_v59 = vmul.f32 1.442695, %v2796_v8 }
 0xea0   :  { %4342 = vpow2.f32 %v2802_v55  ;;  %v3134_v55 = vpack.c.bf16 %v5339_v6, %v5339_v6  ;;  %v3139_v41 = vsel %vm641_vm9, %v3131_v51, 0 }
 0xea1   :  { %4344 = vpow2.f32 %v2800_v59 }
 0xea2   :  { %v3196_v26 = vsel %vm641_vm9, %v3134_v55, 0 }
 0xea4   :  { %v2795_v61 = vpop.xlane.xlu0 %2794 }
 0xea5   :  { %v2799_v27 = vsub.f32 %v2781_v38, %v2795_v61  ;;  %v3011_v38 = vsel %vm509_vm8, %v3003_v63, 0  ;;  %v3158_v61 = vsel %vm641_vm9, %v3132_v34, 0 }
 0xea6   :  { %v4343_v2 = vpop.eup %4342 }
 0xea7   :  { %v2806_v3 = vmul.f32 1.442695, %v2799_v27  ;;  %v4345_v10 = vpop.eup %4344  ;;  %v2811_v19 = vsel %vm509_vm8, %v4343_v2, 0.0 }
 0xea8   :  { %2812 = vadd.xlane.f32.xlu2 %v2811_v19  ;;  %v2808_v57 = vsel %vm509_vm8, %v4345_v10, 0.0  ;;  %v2999_v19 = vpack.c.bf16 %v5313_v28, %v5313_v28  ;;  %v2327_v28 = vld [vmem:[%s5594_s16 + $0x30] sm:$0xff] }
 0xea9   :  { %4346 = vpow2.f32 %v2806_v3  ;;  %2809 = vadd.xlane.f32.xlu1 %v2808_v57  ;;  %v3002_v57 = vpack.c.bf16 %v5311_v42, %v5311_v42 }
 0xeaf   :  { %v4347_v11 = vpop.eup %4346 }
 0xeb0   :  { %v2817_v14 = vsel %vm509_vm8, %v4347_v11, 0.0 }
 0xeb1   :  { %2818 = vadd.xlane.f32.xlu1 %v2817_v14 }
 0xf10   :  { %v2816_v0 = vpop.xlane.xlu0 %2815 }
 0xf11   :  { %4348 = vrcp.f32 %v2816_v0 }
 0xf17   :  { %v4349_v18 = vpop.eup %4348 }
 0xf18   :  { %v2826_v52 = vmul.f32 %v4349_v18, %v4341_v4  ;;  %v3177_v4 = vsel %vm641_vm9, %v3133_v40, 0 }
 0xf1a   :  { %v2830_v25 = vpack.c.bf16 %v2826_v52, %v2826_v52 }
 0xf1b   :  { %v2813_v54 = vpop.xlane.xlu2 %2812 }
 0xf1c   :  { %4350 = vrcp.f32 %v2813_v54  ;;  %v2810_v29 = vpop.xlane.xlu1 %2809  ;;  %4066 = vmatmul.msk.bf16.vlgmr.msra.gmra.mxu0 %vm509_vm8, %v2830_v25 }
 0xf1d   :  { %4352 = vrcp.f32 %v2810_v29  ;;  %3058 = vmatpush.bf16.xpose.msra.mxu0 %v3049_v49 }
 0xf22   :  { %v4351_v13 = vpop.eup %4350 }
 0xf23   :  { %v4353_v16 = vpop.eup %4352  ;;  %v2825_v47 = vmul.f32 %v4351_v13, %v4343_v2  ;;  %v2326_v13 = vld [vmem:[%s5594_s16 + $0x28] sm:$0xff] }
 0xf24   :  { %v2824_v31 = vmul.f32 %v4353_v16, %v4345_v10  ;;  %v2819_v32 = vpop.xlane.xlu1 %2818  ;;  %v3000_v10 = vpack.c.bf16 %v5315_v24, %v5315_v24  ;;  %v2325_v16 = vld [vmem:[%s5594_s16 + $0x20] sm:$0xff] }
 0xf25   :  { %v2829_v62 = vpack.c.bf16 %v2825_v47, %v2825_v47  ;;  %4354 = vrcp.f32 %v2819_v32 }
 0xf26   :  { %v2828_v33 = vpack.c.bf16 %v2824_v31, %v2824_v31 }
 0xf27   :  { %4065 = vmatmul.msk.bf16.vlgmr.msrb.gmra.mxu3 %vm509_vm8, %v2829_v62 }
 0xf28   :  { %4064 = vmatmul.msk.bf16.vlgmr.msrb.gmra.mxu2 %vm509_vm8, %v2828_v33  ;;  %3039 = vmatpush.bf16.xpose.msrb.mxu3 %v3030_v37  ;;  %v2328_v33 = vld [vmem:[%s5594_s16 + $0x38] sm:$0xff] }
 0xf29   :  { %3020 = vmatpush.bf16.xpose.msrb.mxu2 %v3011_v38 }
 0xf2b   :  { %v4355_v21 = vpop.eup %4354 }
 0xf2c   :  { %v2827_v5 = vmul.f32 %v4355_v21, %v4347_v11 }
 0xf2e   :  { %v2831_v60 = vpack.c.bf16 %v2827_v5, %v2827_v5 }
 0xf30   :  { %4067 = vmatmul.msk.bf16.vlgmr.msra.gmra.mxu1 %vm509_vm8, %v2831_v60 }
 0xf31   :  { %3077 = vmatpush.bf16.xpose.msra.mxu1 %v3068_v9 }
 0xf99   :  { %v2889_v43 = vpop.f32.mrf.mxu0 }
 0xf9a   :  { %v2914_v45 = vpack.c.bf16 %v2889_v43, %v2889_v43 }
 0xf9c   :  { %4070 = vmatmul.msk.bf16.vlgmr.msrb.gmra.mxu0 %vm509_vm8, %v2914_v45 }
 0xf9d   :  { %3186 = vmatpush.bf16.msrb.mxu0 %v3177_v4 }
 0xfa1   :  { %v2891_v46 = vpop.f32.mrf.mxu0 }
 0xfaa   :  { %v2870_v8 = vpop.f32.mrf.mxu3 }
 0xfab   :  { %v2851_v53 = vpop.f32.mrf.mxu2  ;;  %v2913_v58 = vpack.c.bf16 %v2870_v8, %v2870_v8 }
 0xfac   :  { %v2912_v59 = vpack.c.bf16 %v2851_v53, %v2851_v53  ;;  %4074 = vmatmul.msk.bf16.vlgmr.msra.gmra.mxu0 %vm509_vm8, %v3001_v44 }
 0xfad   :  { %v2908_v27 = vpop.f32.mrf.mxu1  ;;  %4069 = vmatmul.msk.bf16.vlgmr.msra.gmra.mxu3 %vm509_vm8, %v2913_v58  ;;  %3257 = vmatpush.bf16.msra.mxu0 %v5369_v1 }
 0xfae   :  { %v2915_v50 = vpack.c.bf16 %v2908_v27, %v2908_v27  ;;  %4068 = vmatmul.msk.bf16.vlgmr.msra.gmra.mxu2 %vm509_vm8, %v2912_v59  ;;  %3167 = vmatpush.bf16.msra.mxu3 %v3158_v61 }
 0xfaf   :  { %3148 = vmatpush.bf16.msra.mxu2 %v3139_v41 }
 0xfb0   :  { %4071 = vmatmul.msk.bf16.vlgmr.msrb.gmra.mxu1 %vm509_vm8, %v2915_v50 }
 0xfb1   :  { %3205 = vmatpush.bf16.msrb.mxu1 %v3196_v26 }
 0xfb2   :  { %v2872_v6 = vpop.f32.mrf.mxu3 }
 0xfb3   :  { %v2853_v2 = vpop.f32.mrf.mxu2 }
 0xfb5   :  { %v2910_v3 = vpop.f32.mrf.mxu1 }
 0xfbd   :  { %4073 = vmatmul.msk.bf16.vlgmr.msrb.gmra.mxu3 %vm509_vm8, %v3000_v10 }
 0xfbe   :  { %4072 = vmatmul.msk.bf16.vlgmr.msrb.gmra.mxu2 %vm509_vm8, %v2999_v19  ;;  %3241 = vmatpush.bf16.msrb.mxu3 %v5382_v22 }
 0xfbf   :  { %3225 = vmatpush.bf16.msrb.mxu2 %v5379_v20 }
 0xfc0   :  { %4075 = vmatmul.msk.bf16.vlgmr.msra.gmra.mxu1 %vm509_vm8, %v3002_v57 }
 0xfc1   :  { %3273 = vmatpush.bf16.msra.mxu1 %v5390_v23 }
0x1019   :  { %v2969_v11 = vpop.f32.mrf.mxu0 }
0x101a   :  { %v2995_v0 = vsel %vm134_vm0, %v2969_v11, 0.0 }
0x1021   :  { %v2971_v24 = vpop.f32.mrf.mxu0 }
0x1029   :  { %v3060_v14 = vpop.f32.mrf.mxu0 }
0x102a   :  { %v3061_v15 = vadd.f32 %v3060_v14, %v2327_v28 }
0x102c   :  { %v3089_v42 = vsel %vm509_vm8, %v3061_v15, -inf }
0x102d   :  { %v2988_v1 = vpop.f32.mrf.mxu1  ;;  %3090 = vmax.xlane.f32.xlu1 %v3089_v42 }
0x102e   :  { %v2997_v52 = vsel %vm134_vm0, %v2988_v1, 0.0 }
0x1030   :  { %v2950_v35 = vpop.f32.mrf.mxu3 }
0x1031   :  { %v2931_v36 = vpop.f32.mrf.mxu2  ;;  %v2993_v20 = vsel %vm134_vm0, %v2950_v35, 0.0  ;;  %v3062_v22 = vpop.f32.mrf.mxu0 }
0x1032   :  { %v2992_v7 = vsel %vm134_vm0, %v2931_v36, 0.0 }
0x1033   :  { %v2994_v23 = vadd.f32 %v2993_v20, %v2992_v7 }
0x1035   :  { %v2996_v18 = vadd.f32 %v2995_v0, %v2994_v23  ;;  %v2990_v56 = vpop.f32.mrf.mxu1 }
0x1037   :  { %v2998_v25 = vadd.f32 %v2997_v52, %v2996_v18 }
0x1038   :  { %v2952_v54 = vpop.f32.mrf.mxu3 }
0x1039   :  { %v2933_v49 = vpop.f32.mrf.mxu2  ;;  %v5464_v41 = vadd.f32 %v2998_v25, %v5152_v30 }
0x103b   :  { %v3300_v26 = vmul.f32 %v5464_v41, %v5464_v41 }
0x103d   :  { %v3079_v29 = vpop.f32.mrf.mxu1  ;;  %v3302_v2 = vsel %vm134_vm0, %v3300_v26, 0.0 }
0x103e   :  { %v3080_v38 = vadd.f32 %v3079_v29, %v2328_v33 }
0x1040   :  { %v3041_v17 = vpop.f32.mrf.mxu3  ;;  %v3092_v5 = vsel %vm509_vm8, %v3080_v38, -inf }
0x1041   :  { %v3022_v47 = vpop.f32.mrf.mxu2  ;;  %v3042_v63 = vadd.f32 %v3041_v17, %v2326_v13 }
0x1042   :  { %v3023_v31 = vadd.f32 %v3022_v47, %v2325_v16 }
0x1043   :  { %v3086_v32 = vsel %vm509_vm8, %v3042_v63, -inf }
0x1044   :  { %3087 = vmax.xlane.f32.xlu0 %v3086_v32  ;;  %v3083_v62 = vsel %vm509_vm8, %v3023_v31, -inf }
0x1045   :  { %3084 = vmax.xlane.f32.xlu2 %v3083_v62  ;;  %v3081_v37 = vpop.f32.mrf.mxu1 }
0x1048   :  { %v3043_v21 = vpop.f32.mrf.mxu3 }
0x1049   :  { %v3024_v39 = vpop.f32.mrf.mxu2 }
0x104d   :  { %3093 = vmax.xlane.f32.xlu2 %v3092_v5 }
0x10a0   :  { %v3091_v60 = vpop.xlane.xlu1 %3090 }
0x10a1   :  { %v3097_v9 = vsub.f32 %v3061_v15, %v3091_v60 }
0x10a3   :  { %v3103_v40 = vmul.f32 1.442695, %v3097_v9 }
0x10a5   :  { %4356 = vpow2.f32 %v3103_v40 }
0x10ab   :  { %v4357_v43 = vpop.eup %4356 }
0x10ac   :  { %v3113_v45 = vsel %vm509_vm8, %v4357_v43, 0.0 }
0x10ad   :  { %3114 = vadd.xlane.f32.xlu2 %v3113_v45 }
0x10b7   :  { %v3088_v4 = vpop.xlane.xlu0 %3087 }
0x10b8   :  { %v3085_v46 = vpop.xlane.xlu2 %3084  ;;  %v3096_v34 = vsub.f32 %v3042_v63, %v3088_v4 }
0x10b9   :  { %v3095_v44 = vsub.f32 %v3023_v31, %v3085_v46 }
0x10ba   :  { %v3101_v51 = vmul.f32 1.442695, %v3096_v34 }
0x10bb   :  { %v3099_v8 = vmul.f32 1.442695, %v3095_v44 }
0x10bc   :  { %4358 = vpow2.f32 %v3101_v51 }
0x10bd   :  { %4360 = vpow2.f32 %v3099_v8  ;;  %v4224_v8 = vld [vmem:[%s5590_s12 + $0x8] sm:$0xff] }
0x10c0   :  { %v3094_v53 = vpop.xlane.xlu2 %3093 }
0x10c1   :  { %v3098_v58 = vsub.f32 %v3080_v38, %v3094_v53 }
0x10c2   :  { %v4359_v55 = vpop.eup %4358 }
0x10c3   :  { %v4361_v59 = vpop.eup %4360  ;;  %v3105_v61 = vmul.f32 1.442695, %v3098_v58  ;;  %v3110_v27 = vsel %vm509_vm8, %v4359_v55, 0.0  ;;  %v4228_v58 = vld [vmem:[%s5591_s13 + $0x18] sm:$0xff] }
0x10c4   :  { %v3107_v50 = vsel %vm509_vm8, %v4361_v59, 0.0  ;;  %3111 = vadd.xlane.f32.xlu1 %v3110_v27 }
0x10c5   :  { %4362 = vpow2.f32 %v3105_v61  ;;  %3108 = vadd.xlane.f32.xlu0 %v3107_v50 }
0x10cb   :  { %v4363_v6 = vpop.eup %4362 }
0x10cc   :  { %v3116_v3 = vsel %vm509_vm8, %v4363_v6, 0.0  ;;  %3303 = vadd.xlane.f32.xlu1 %v3302_v2 }
0x10cd   :  { %3117 = vadd.xlane.f32.xlu0 %v3116_v3 }
0x1120   :  { %v3115_v10 = vpop.xlane.xlu2 %3114 }
0x1121   :  { %4364 = vrcp.f32 %v3115_v10 }
0x1127   :  { %v4365_v19 = vpop.eup %4364 }
0x1128   :  { %v3125_v30 = vmul.f32 %v4365_v19, %v4357_v43 }
0x112a   :  { %v3129_v57 = vpack.c.bf16 %v3125_v30, %v3125_v30 }
0x112c   :  { %4078 = vmatmul.msk.bf16.vlgmr.msrb.gmra.mxu0 %vm509_vm8, %v3129_v57 }
0x1137   :  { %v3112_v11 = vpop.xlane.xlu1 %3111 }
0x1138   :  { %4366 = vrcp.f32 %v3112_v11  ;;  %v3109_v24 = vpop.xlane.xlu0 %3108 }
0x1139   :  { %4368 = vrcp.f32 %v3109_v24 }
0x113e   :  { %v4367_v28 = vpop.eup %4366 }
0x113f   :  { %v4369_v14 = vpop.eup %4368  ;;  %v3124_v15 = vmul.f32 %v4367_v28, %v4359_v55  ;;  %v3304_v34 = vpop.xlane.xlu1 %3303  ;;  %v4252_v28 = vld [vmem:[%s5613_s30 + $0x2] ss:$0 sm:$0xff] }
0x1140   :  { %v3123_v42 = vmul.f32 %v4369_v14, %v4361_v59  ;;  %v3118_v1 = vpop.xlane.xlu0 %3117  ;;  %v3308_v44 = vmul.f32 %v3304_v34, %v4572_v12 }
0x1141   :  { %v3128_v35 = vpack.c.bf16 %v3124_v15, %v3124_v15  ;;  %4370 = vrcp.f32 %v3118_v1 }
0x1142   :  { %v3127_v36 = vpack.c.bf16 %v3123_v42, %v3123_v42  ;;  %v3310_v51 = vadd.f32 1e-06, %v3308_v44  ;;  %v5556_v44 = vld [vmem:[%s5596_s18] sm:$0xff] }
0x1143   :  { %4077 = vmatmul.msk.bf16.vlgmr.msra.gmra.mxu3 %vm509_vm8, %v3128_v35 }
0x1144   :  { %4076 = vmatmul.msk.bf16.vlgmr.msra.gmra.mxu2 %vm509_vm8, %v3127_v36  ;;  %4372 = vrsqrt.f32 %v3310_v51  ;;  %3403 = vmatpush.bf16.msra.mxu3 %v4228_v58  ;;  %vm3318_vm9 = vweird.f32 %v3310_v51 }
0x1145   :  { %3361 = vmatpush.bf16.msra.mxu2 %v4224_v8  ;;  %v4445_v8 = vmov 0  }
0x1146   :  { %4244 = vset.pattern.permute.xlu1 %v4445_v8  ;;  %4245 = vset.pattern.permute.xlu2 %v4445_v8 }
0x1147   :  { %v4371_v20 = vpop.eup %4370  ;;  %4246 = vset.pattern.permute.xlu0 %v4445_v8 }
0x1148   :  { %v3126_v22 = vmul.f32 %v4371_v20, %v4363_v6  ;;  %v4227_v20 = vld [vmem:[%s5591_s13 + $0x10] sm:$0xff] }
0x1149   :  { %3404 = vmatpush.bf16.msra.mxu3 %v4227_v20  ;;  %v3557_v20 = vld [vmem:[%s5596_s18 + $0x8] sm:$0xff] }
0x114a   :  { %v3130_v7 = vpack.c.bf16 %v3126_v22, %v3126_v22  ;;  %v4373_v53 = vpop.eup %4372  ;;  %v4226_v22 = vld [vmem:[%s5591_s13 + $0x8] sm:$0xff]  ;;  %vm3597_vm5 = vcmp.ne.s32.totalorder %v3557_v20, 4294967196 }
0x114b   :  { %v3313_v55 = vmul.f32 %v4373_v53, %v3310_v51 }
0x114c   :  { %4079 = vmatmul.msk.bf16.vlgmr.msrb.gmra.mxu1 %vm509_vm8, %v3130_v7  ;;  %v4225_v7 = vld [vmem:[%s5591_s13] sm:$0xff] }
0x114d   :  { %v3314_v27 = vmul.f32 %v4373_v53, %v3313_v55  ;;  %3405 = vmatpush.bf16.msra.mxu3 %v4226_v22 }
0x114f   :  { %v3315_v26 = vmul.f32 0.5, %v3314_v27 }
0x1151   :  { %v3316_v6 = vsub.f32 1.5, %v3315_v26  ;;  %3406 = vmatpush.bf16.msra.mxu3 %v4225_v7 }
0x1153   :  { %v3317_v10 = vmul.f32 %v4373_v53, %v3316_v6 }
0x11a9   :  { %v3188_v23 = vpop.f32.mrf.mxu0 }
0x11aa   :  { %v3213_v0 = vpack.c.bf16 %v3188_v23, %v3188_v23 }
0x11ac   :  { %4082 = vmatmul.msk.bf16.vlgmr.msra.gmra.mxu0 %vm509_vm8, %v3213_v0 }
0x11b1   :  { %v3190_v18 = vpop.f32.mrf.mxu0 }
0x11c6   :  { %v3169_v56 = vpop.f32.mrf.mxu3 }
0x11c7   :  { %v3150_v52 = vpop.f32.mrf.mxu2  ;;  %v3212_v25 = vpack.c.bf16 %v3169_v56, %v3169_v56 }
0x11c8   :  { %v3211_v54 = vpack.c.bf16 %v3150_v52, %v3150_v52 }
0x11c9   :  { %v3207_v49 = vpop.f32.mrf.mxu1  ;;  %4081 = vmatmul.msk.bf16.vlgmr.msrb.gmra.mxu3 %vm509_vm8, %v3212_v25  ;;  %v4236_v25 = vld [vmem:[%s5595_s17 + $0x38] sm:$0xff] }
0x11ca   :  { %v3214_v29 = vpack.c.bf16 %v3207_v49, %v3207_v49  ;;  %4080 = vmatmul.msk.bf16.vlgmr.msrb.gmra.mxu2 %vm509_vm8, %v3211_v54  ;;  %v3538_v54 = vsel %vm134_vm0, %v4236_v25, 0  ;;  %v4235_v49 = vld [vmem:[%s5595_s17 + $0x30] sm:$0xff] }
0x11cb   :  { %3540 = vmatpush.bf16.xpose.msrb.mxu0 %v3538_v54 }
0x11cc   :  { %4083 = vmatmul.msk.bf16.vlgmr.msra.gmra.mxu1 %vm509_vm8, %v3214_v29  ;;  %vm3319_vm8 = vweird.f32 %v4373_v53  ;;  %v3535_v29 = vsel %vm134_vm0, %v4235_v49, 0 }
0x11cd   :  { %vm3320_vm10 = vmor %vm3318_vm9, %vm3319_vm8  ;;  %vm3596_vm8 = vcmp.ne.s32.totalorder %v5556_v44, 4294967196  ;;  %vm3626_vm9 = vcmask 0  }
0x11ce   :  { %v3171_v13 = vpop.f32.mrf.mxu3  ;;  %v3321_v57 = vsel %vm3320_vm10, %v4373_v53, %v3317_v10 }
0x11cf   :  { %v3152_v16 = vpop.f32.mrf.mxu2  ;;  %v3332_v14 = vmul.f32 %v3321_v57, %v5464_v41  ;;  %v4234_v13 = vld [vmem:[%s5595_s17 + $0x28] sm:$0xff] }
0x11d0   :  { %v3532_v16 = vsel %vm134_vm0, %v4234_v13, 0 }
0x11d1   :  { %v3209_v17 = vpop.f32.mrf.mxu1  ;;  %v3337_v1 = vmul.f32 %v4252_v28, %v3332_v14 }
0x11d3   :  { %3541 = vmatpush.bf16.xpose.msrb.mxu0 %v3535_v29 }
0x11db   :  { %3542 = vmatpush.bf16.xpose.msrb.mxu0 %v3532_v16 }
0x1229   :  { %v3259_v47 = vpop.f32.mrf.mxu0 }
0x122a   :  { %v3282_v21 = vsel %vm134_vm0, %v3259_v47, 0.0 }
0x1231   :  { %v3261_v63 = vpop.f32.mrf.mxu0 }
0x1232   :  { %v4233_v63 = vld [vmem:[%s5595_s17 + $0x20] sm:$0xff] }
0x1249   :  { %v3275_v31 = vpop.f32.mrf.mxu1 }
0x124a   :  { %v3284_v60 = vsel %vm134_vm0, %v3275_v31, 0.0 }
0x124c   :  { %v3243_v32 = vpop.f32.mrf.mxu3 }
0x124d   :  { %v3227_v62 = vpop.f32.mrf.mxu2  ;;  %v3280_v33 = vsel %vm134_vm0, %v3243_v32, 0.0 }
0x124e   :  { %v3279_v37 = vsel %vm134_vm0, %v3227_v62, 0.0  ;;  %v3529_v62 = vsel %vm134_vm0, %v4233_v63, 0 }
0x124f   :  { %v3281_v38 = vadd.f32 %v3280_v33, %v3279_v37  ;;  %3543 = vmatpush.bf16.xpose.msrb.mxu0 %v3529_v62 }
0x1251   :  { %v3283_v39 = vadd.f32 %v3282_v21, %v3281_v38  ;;  %v3277_v5 = vpop.f32.mrf.mxu1 }
0x1252   :  { %v4231_v5 = vld [vmem:[%s5595_s17 + $0x10] sm:$0xff] }
0x1253   :  { %v3285_v9 = vadd.f32 %v3284_v60, %v3283_v39  ;;  %v3523_v60 = vsel %vm134_vm0, %v4231_v5, 0 }
0x1254   :  { %v3245_v40 = vpop.f32.mrf.mxu3 }
0x1255   :  { %v3229_v43 = vpop.f32.mrf.mxu2  ;;  %v5484_v45 = vadd.f32 %v3285_v9, %v5189_v48  ;;  %v4223_v48 = vld [vmem:[%s5590_s12] sm:$0xff]  ;;  %v4230_v9 = vld [vmem:[%s5595_s17 + $0x8] sm:$0xff] }
0x1256   :  { %3362 = vmatpush.bf16.msra.mxu2 %v4223_v48  ;;  %v3520_v40 = vsel %vm134_vm0, %v4230_v9, 0  ;;  %v4229_v43 = vld [vmem:[%s5595_s17] sm:$0xff] }
0x1257   :  { %v3301_v4 = vmul.f32 %v5484_v45, %v5484_v45 }
0x1259   :  { %v3305_v46 = vsel %vm134_vm0, %v3301_v4, 0.0  ;;  %v3517_v4 = vsel %vm134_vm0, %v4229_v43, 0 }
0x125a   :  { %3306 = vadd.xlane.f32.xlu2 %v3305_v46 }
0x12cd   :  { %v3307_v59 = vpop.xlane.xlu2 %3306 }
0x12ce   :  { %v3309_v61 = vmul.f32 %v3307_v59, %v4572_v12 }
0x12d0   :  { %v3311_v50 = vadd.f32 1e-06, %v3309_v61 }
0x12d2   :  { %4374 = vrsqrt.f32 %v3311_v50  ;;  %vm3328_vm12 = vweird.f32 %v3311_v50 }
0x12d8   :  { %v4375_v2 = vpop.eup %4374 }
0x12d9   :  { %v3323_v3 = vmul.f32 %v4375_v2, %v3311_v50  ;;  %vm3329_vm11 = vweird.f32 %v4375_v2 }
0x12da   :  { %vm3330_vm13 = vmor %vm3328_vm12, %vm3329_vm11 }
0x12db   :  { %v3324_v19 = vmul.f32 %v4375_v2, %v3323_v3 }
0x12dd   :  { %v3325_v30 = vmul.f32 0.5, %v3324_v19  ;;  %v4253_v19 = vld [vmem:[%s5613_s30 + $0x3] ss:$0 sm:$0xff] }
0x12df   :  { %v3326_v11 = vsub.f32 1.5, %v3325_v30 }
0x12e1   :  { %v3327_v24 = vmul.f32 %v4375_v2, %v3326_v11 }
0x12e3   :  { %v3331_v15 = vsel %vm3330_vm13, %v4375_v2, %v3327_v24 }
0x12e4   :  { %v3333_v42 = vmul.f32 %v3331_v15, %v5484_v45 }
0x12e6   :  { %v3338_v35 = vmul.f32 %v4252_v28, %v3333_v42 }
0x12e8   :  { %v3339_v36 = vpack.c.bf16 %v3338_v35, %v3337_v1 }
0x12ea   :  { %4092 = vmatmul.msk.bf16.vlgmr.msra.gmra.mxu2 %vm134_vm0, %v3339_v36 }
0x136d   :  { %v3364_v23 = vpop.f32.mrf.mxu2 }
0x136e   :  { %v3369_v18 = vmax.f32 %v3364_v23, 0.0  ;;  %v3558_v23 = vlaneseq }
0x1375   :  { %v3366_v0 = vpop.f32.mrf.mxu2 }
0x1376   :  { %v3370_v56 = vmax.f32 %v3366_v0, 0.0 }
0x1378   :  { %v3371_v52 = vpack.c.bf16 %v3370_v56, %v3369_v18  ;;  %v3559_v18 = vand.u32 127, %v3558_v23 }
0x137a   :  { %4109 = vmatmul.msk.bf16.vlgmr.msra.gmra.mxu3 %vm1199_vm7, %v3371_v52 }
0x13fd   :  { %v3408_v17 = vpop.f32.mrf.mxu3 }
0x13fe   :  { %v3413_v47 = vadd.f32 %v3408_v17, %v5464_v41  ;;  %v4232_v41 = vld [vmem:[%s5595_s17 + $0x18] sm:$0xff] }
0x13ff   :  { %v3526_v39 = vsel %vm134_vm0, %v4232_v41, 0 }
0x1400   :  { %v3415_v31 = vmul.f32 %v3413_v47, %v3413_v47  ;;  %3544 = vmatpush.bf16.xpose.msrb.mxu0 %v3526_v39 }
0x1402   :  { %v3417_v32 = vsel %vm134_vm0, %v3415_v31, 0.0 }
0x1403   :  { %3418 = vadd.xlane.f32.xlu0 %v3417_v32 }
0x1405   :  { %v3410_v33 = vpop.f32.mrf.mxu3 }
0x1406   :  { %v3414_v37 = vadd.f32 %v3410_v33, %v5484_v45 }
0x1408   :  { %v3416_v38 = vmul.f32 %v3414_v37, %v3414_v37  ;;  %3545 = vmatpush.bf16.xpose.msrb.mxu0 %v3523_v60 }
0x140a   :  { %v3420_v21 = vsel %vm134_vm0, %v3416_v38, 0.0 }
0x140b   :  { %3421 = vadd.xlane.f32.xlu1 %v3420_v21 }
0x1410   :  { %3546 = vmatpush.bf16.xpose.msrb.mxu0 %v3520_v40 }
0x1418   :  { %3547 = vmatpush.bf16.xpose.msrb.mxu0 %v3517_v4 }
0x1424   :  { %3561 = vperm.xlu1 %4244, %v5556_v44  }
0x1476   :  { %v3419_v45 = vpop.xlane.xlu0 %3418 }
0x1477   :  { %v3423_v46 = vmul.f32 %v3419_v45, %v4572_v12 }
0x1479   :  { %v3425_v34 = vadd.f32 1e-06, %v3423_v46 }
0x147b   :  { %4376 = vrsqrt.f32 %v3425_v34  ;;  %vm3433_vm14 = vweird.f32 %v3425_v34 }
0x147e   :  { %v3422_v51 = vpop.xlane.xlu1 %3421 }
0x147f   :  { %v3424_v48 = vmul.f32 %v3422_v51, %v4572_v12 }
0x1481   :  { %v4377_v53 = vpop.eup %4376  ;;  %v3426_v58 = vadd.f32 1e-06, %v3424_v48 }
0x1482   :  { %v3428_v55 = vmul.f32 %v4377_v53, %v3425_v34  ;;  %vm3434_vm7 = vweird.f32 %v4377_v53 }
0x1483   :  { %4378 = vrsqrt.f32 %v3426_v58  ;;  %vm3435_vm15 = vmor %vm3433_vm14, %vm3434_vm7  ;;  %vm3443_vm2 = vweird.f32 %v3426_v58 }
0x1484   :  { %v3429_v59 = vmul.f32 %v4377_v53, %v3428_v55 }
0x1486   :  { %v3430_v61 = vmul.f32 0.5, %v3429_v59 }
0x1488   :  { %v3431_v27 = vsub.f32 1.5, %v3430_v61 }
0x1489   :  { %v4379_v50 = vpop.eup %4378 }
0x148a   :  { %v3432_v26 = vmul.f32 %v4377_v53, %v3431_v27  ;;  %v3438_v6 = vmul.f32 %v4379_v50, %v3426_v58  ;;  %vm3444_vm1 = vweird.f32 %v4379_v50 }
0x148b   :  { %vm3445_vm3 = vmor %vm3443_vm2, %vm3444_vm1 }
0x148c   :  { %v3439_v2 = vmul.f32 %v4379_v50, %v3438_v6  ;;  %v3436_v3 = vsel %vm3435_vm15, %v4377_v53, %v3432_v26 }
0x148d   :  { %v3447_v30 = vmul.f32 %v3436_v3, %v3413_v47  ;;  %v4449_v47 = vmov 0.0  }
0x148e   :  { %v3440_v10 = vmul.f32 0.5, %v3439_v2  ;;  %v4144_v63 = vsel %vm3597_vm5, 1.0, %v4449_v47  ;;  %v4143_v32 = vsel %vm3596_vm8, 1.0, %v4449_v47 }
0x148f   :  { %v3452_v24 = vmul.f32 %v4253_v19, %v3447_v30  ;;  %v3615_v31 = vsel %vm3604_vm6, %v4144_v63, 0.0  ;;  %v3614_v62 = vsel %vm3604_vm6, %v4143_v32, 0.0 }
0x1490   :  { %v3441_v12 = vsub.f32 1.5, %v3440_v10  ;;  %v3616_v33 = vadd.f32 %v3615_v31, %v3614_v62 }
0x1491   :  { %v3454_v15 = vmul.f32 0.17677669, %v3452_v24 }
0x1492   :  { %v3442_v57 = vmul.f32 %v4379_v50, %v3441_v12  ;;  %v3617_v38 = vrot.slane %v3616_v33, 4 }
0x1494   :  { %v3446_v11 = vsel %vm3445_vm3, %v4379_v50, %v3442_v57  ;;  %v3618_v21 = vadd.f32 %v3617_v38, %v3616_v33 }
0x1495   :  { %v3448_v28 = vmul.f32 %v3446_v11, %v3414_v37 }
0x1496   :  { %v3562_v16 = vpop.permute.xlu1 %3561  ;;  %v3619_v5 = vrot.slane %v3618_v21, 2 }
0x1497   :  { %v3453_v14 = vmul.f32 %v4253_v19, %v3448_v28  ;;  %vm3566_vm4 = vcmp.eq.s32.totalorder %v3559_v18, %v3562_v16 }
0x1498   :  { %v3620_v9 = vadd.f32 %v3619_v5, %v3618_v21 }
0x1499   :  { %v3455_v42 = vmul.f32 0.17677669, %v3453_v14 }
0x149a   :  { %v3621_v44 = vrot.slane %v3620_v9, 1 }
0x149b   :  { %v3456_v1 = vpack.c.bf16 %v3455_v42, %v3454_v15 }
0x149c   :  { %v3622_v58 = vadd.f32 %v3621_v44, %v3620_v9 }
0x149d   :  { %4142 = vmatmul.msk.bf16.vlgmr.msrb.gmra.mxu0 %vm134_vm0, %v3456_v1 }
0x149e   :  { %v3623_v27 = vmax.f32 %v3622_v58, 1.0 }
0x151a   :  { %v3549_v35 = vpop.f32.mrf.mxu0 }
0x151b   :  { %3554 = vst [vmem:[#allocation2] sm:$0xff] %v3549_v35  ;;  %3574 = vmax.xlane.f32.xlu2 %v3549_v35  ;;  %v3568_v17 = vsel %vm3566_vm4, %v3549_v35, 0.0 }
0x1522   :  { %v3551_v36 = vpop.f32.mrf.mxu0 }
0x1523   :  { %3555 = vst [vmem:[#allocation2 + $0x8] sm:$0xff] %v3551_v36  ;;  %3576 = vmax.xlane.f32.xlu0 %v3551_v36 }
0x1524   :  { %3640 = dma.vmem_to_hbm [thread:$0]  %s3633_s24, 256, %s3635_s9, [#allocation3], %s4447_s21, %s4447_s21, %s4448_s1  }
0x1533   :  { %3564 = vperm.xlu2 %4245, %v3557_v20  }
0x158e   :  { %v3575_v22 = vpop.xlane.xlu2 %3574 }
0x158f   :  { %v3578_v7 = vsub.f32 %v3549_v35, %v3575_v22 }
0x1591   :  { %v3580_v0 = vmul.f32 1.442695, %v3578_v7 }
0x1593   :  { %4380 = vpow2.f32 %v3580_v0 }
0x1596   :  { %v3565_v56 = vpop.permute.xlu2 %3564  ;;  %v3577_v52 = vpop.xlane.xlu0 %3576 }
0x1597   :  { %vm3567_vm0 = vcmp.eq.s32.totalorder %v3559_v18, %v3565_v56  ;;  %v3579_v25 = vsub.f32 %v3551_v36, %v3577_v52 }
0x1598   :  { %v3569_v54 = vsel %vm3567_vm0, %v3551_v36, 0.0 }
0x1599   :  { %v4381_v49 = vpop.eup %4380  ;;  %v3582_v29 = vmul.f32 1.442695, %v3579_v25  ;;  %3572 = vadd.xlane.f32.xlu2 %v3569_v54 }
0x159a   :  { %3584 = vadd.xlane.f32.xlu0 %v4381_v49 }
0x159b   :  { %4382 = vpow2.f32 %v3582_v29 }
0x15a1   :  { %v4383_v13 = vpop.eup %4382 }
0x15a2   :  { %3586 = vadd.xlane.f32.xlu0 %v4383_v13 }
0x15aa   :  { %3570 = vadd.xlane.f32.xlu0 %v3568_v17 }
0x160c   :  { %v3573_v51 = vpop.xlane.xlu2 %3572 }
0x160d   :  { %v3585_v37 = vpop.xlane.xlu0 %3584 }
0x160e   :  { %4384 = vlog2.f32 %v3585_v37 }
0x1614   :  { %v4385_v41 = vpop.eup %4384 }
0x1615   :  { %v3587_v39 = vpop.xlane.xlu0 %3586  ;;  %v3589_v60 = vmul.f32 0.6931472, %v4385_v41 }
0x1616   :  { %4386 = vlog2.f32 %v3587_v39 }
0x1617   :  { %v3592_v43 = vadd.f32 %v3589_v60, %v3575_v22  ;;  %4388 = vrcp.f32 %v3623_v27 }
0x161c   :  { %v4387_v40 = vpop.eup %4386 }
0x161d   :  { %v3591_v45 = vmul.f32 0.6931472, %v4387_v40  ;;  %v3571_v4 = vpop.xlane.xlu0 %3570  ;;  %v4389_v10 = vpop.eup %4388 }
0x161e   :  { %v3594_v46 = vsub.f32 %v3592_v43, %v3571_v4 }
0x161f   :  { %v3593_v34 = vadd.f32 %v3591_v45, %v3577_v52 }
0x1620   :  { %v3602_v48 = vmul.f32 %v4143_v32, %v3594_v46 }
0x1621   :  { %v3595_v8 = vsub.f32 %v3593_v34, %v3573_v51 }
0x1622   :  { %v3605_v59 = vsel %vm3604_vm6, %v3602_v48, 0.0 }
0x1623   :  { %v3603_v53 = vmul.f32 %v4144_v63, %v3595_v8 }
0x1625   :  { %v3606_v55 = vsel %vm3604_vm6, %v3603_v53, 0.0 }
0x1626   :  { %v3607_v61 = vadd.f32 %v3606_v55, %v3605_v59 }
0x1628   :  { %v3608_v50 = vrot.slane %v3607_v61, 4 }
0x162a   :  { %v3609_v26 = vadd.f32 %v3608_v50, %v3607_v61 }
0x162c   :  { %v3610_v6 = vrot.slane %v3609_v26, 2 }
0x162e   :  { %v3611_v2 = vadd.f32 %v3610_v6, %v3609_v26 }
0x1630   :  { %v3612_v3 = vrot.slane %v3611_v2, 1 }
0x1632   :  { %v3613_v12 = vadd.f32 %v3612_v3, %v3611_v2 }
0x1634   :  { %v3625_v19 = vmul.f32 %v4389_v10, %v3613_v12 }
0x1636   :  { %3627 = vst.msk [vmem:[#allocation4] sm:$0x1] %vm3626_vm9, %v3625_v19 }
0x1637   :  { %3651 = dma.vmem_to_hbm [thread:$0]  %s3647_s6, 16, %s3649_s11, [#allocation5]  }
0x1638   :  { %4440 = dma.done.wait [#allocation3], 256  }
0x1639   :  { %4441 = vsyncadd [#allocation3], 4294967040 }
0x163a   :  { %4442 = dma.done.wait [#allocation5], 16  }
0x163b   :  { %4443 = vsyncadd [#allocation5], 4294967280 }
0x163c   :  { %3660 = vsyncpa [#allocation3], 1 }
0x163d   :  { %3661 = vsyncpa [#allocation5], 1 }

</bundles_post_ra>
